<compile_context>
chip_gen: v6e
topology: v6e:2x2x1
jax: 0.10.0
libtpu: 0.0.40
codegen_flags: <defaults>
</compile_context>

<pallas_src>
import functools

import jax
import jax.numpy as jnp
import numpy as np
from jax.experimental import pallas as pl
from jax.experimental.pallas import tpu as pltpu

K = 7            # conv kernel size
P = (K - 1) // 2 # padding


def _round_up(v, m):
    return (v + m - 1) // m * m


def spatial_attention_kernel(x_ref, w_ref, bn_ref, out_ref,
                             shifted_ref, scale_ref, *, C, H, W):
    # x_ref      : VMEM (1, C, H*W)  lane-dense input block (one batch element)
    # w_ref      : SMEM (2*K*K,)     flattened conv weight (out=1, in=2, K, K)
    # bn_ref     : SMEM (2,)         folded BN affine: y = a*conv + b
    # out_ref    : VMEM (1, C, H*W)
    # shifted_ref: VMEM (2, K, H+2P, WPAD) scratch; slot kw holds the padded
    #              pooled map pre-rotated by kw lanes.
    # scale_ref  : VMEM (1, H*W)     scratch; flattened conv output
    HP = H + 2 * P
    WPAD = shifted_ref.shape[-1]

    # ---- ChannelPool on the lane-dense (C, HW) slab ----
    xf = x_ref[0].astype(jnp.float32)                        # (C, HW)
    cmax = jnp.max(xf, axis=0, keepdims=True)                # (1, HW)
    cmean = jnp.sum(xf, axis=0, keepdims=True) * (1.0 / C)   # (1, HW)
    pooled = (cmax, cmean)
    # xf is not reused below; the gating re-reads x_ref so the big tile is not
    # kept live in vregs across the unrolled conv loop.

    # ---- stage pooled maps as 2-D zero-padded images in scratch (slot kw=0) ----
    for c in range(2):
        # zero only the padding border (interior is fully overwritten below)
        shifted_ref[c, 0, 0:P, :] = jnp.zeros((P, WPAD), jnp.float32)
        shifted_ref[c, 0, P + H:HP, :] = jnp.zeros((HP - P - H, WPAD), jnp.float32)
        shifted_ref[c, 0, P:P + H, 0:P] = jnp.zeros((H, P), jnp.float32)
        shifted_ref[c, 0, P:P + H, P + W:W + 2 * P] = jnp.zeros((H, P), jnp.float32)
        # un-flatten the pooled (1, HW) row into (H, W), one row at a time
        for i in range(H):
            shifted_ref[c, 0, P + i:P + i + 1, P:P + W] = pooled[c][:, i * W:(i + 1) * W]

    # ---- pre-rotate by each kw: 2*(K-1) lane rolls on the XLU ----
    for c in range(2):
        base_img = shifted_ref[c, 0, :, :]                   # (HP, WPAD)
        for kw in range(1, K):
            # roll by -kw  <=>  roll by (WPAD - kw)  (positive static shift)
            shifted_ref[c, kw] = pltpu.roll(base_img, WPAD - kw, axis=1)

    # ---- 7x7 conv (2 in -> 1 out): only aligned sublane-offset loads ----
    acc = jnp.zeros((H, WPAD), jnp.float32)
    for c in range(2):
        for kw in range(K):
            for kh in range(K):
                w_val = w_ref[c * K * K + kh * K + kw]
                acc = acc + w_val * shifted_ref[c, kw, kh:kh + H, :]

    # ---- flatten the (H, W) conv result back to a lane-dense (1, HW) row ----
    for i in range(H):
        scale_ref[:, i * W:(i + 1) * W] = acc[i:i + 1, 0:W]

    # ---- folded BatchNorm (eval) + sigmoid, then gate the input ----
    a = bn_ref[0]
    b = bn_ref[1]
    scale = jax.nn.sigmoid(a * scale_ref[...] + b)           # (1, HW)
    out_ref[0] = (x_ref[0].astype(jnp.float32) * scale).astype(out_ref.dtype)


def spatial_attention(x, conv_w, gamma, beta, running_mean, running_var,
                      eps=1e-5, *, vmem_limit_bytes=None):
    """x: (B, C, H, W). conv_w: (1, 2, K, K). BN params: scalars or traced arrays."""
    B, C, H, W = x.shape
    HW = H * W
    HP = H + 2 * P
    WPAD = _round_up(W + 2 * P, 128)

    # Fold eval-mode BatchNorm into y = a*conv + b using jnp ops so that the
    # parameters may be traced jax arrays (no Python float() folding).
    gamma = jnp.asarray(gamma, jnp.float32)
    beta = jnp.asarray(beta, jnp.float32)
    running_mean = jnp.asarray(running_mean, jnp.float32)
    running_var = jnp.asarray(running_var, jnp.float32)
    a = (gamma * jax.lax.rsqrt(running_var + eps)).reshape(())
    b = (beta - running_mean * gamma * jax.lax.rsqrt(running_var + eps)).reshape(())
    bn_params = jnp.stack([a, b]).astype(jnp.float32)        # (2,)

    w_flat = jnp.asarray(conv_w, jnp.float32).reshape(2 * K * K)

    x_flat = x.reshape(B, C, HW)                             # lane-dense layout

    kernel = functools.partial(spatial_attention_kernel, C=C, H=H, W=W)

    grid_spec = pltpu.PrefetchScalarGridSpec(
        num_scalar_prefetch=0,
        grid=(B,),
        in_specs=[
            pl.BlockSpec((1, C, HW), lambda bidx: (bidx, 0, 0)),
            pl.BlockSpec(memory_space=pltpu.MemorySpace.SMEM),
            pl.BlockSpec(memory_space=pltpu.MemorySpace.SMEM),
        ],
        out_specs=pl.BlockSpec((1, C, HW), lambda bidx: (bidx, 0, 0)),
        scratch_shapes=[
            pltpu.VMEM((2, K, HP, WPAD), jnp.float32),
            pltpu.VMEM((1, HW), jnp.float32),
        ],
    )

    out_flat = pl.pallas_call(
        kernel,
        out_shape=jax.ShapeDtypeStruct((B, C, HW), x.dtype),
        grid_spec=grid_spec,
        compiler_params=pltpu.CompilerParams(
            dimension_semantics=("parallel",),
            vmem_limit_bytes=vmem_limit_bytes,
        ),
    )(x_flat, w_flat, bn_params)

    return out_flat.reshape(B, C, H, W)


def reference_forward(x, conv_w, gamma, beta, running_mean, running_var, eps=1e-5):
    cmax = jnp.max(x, axis=1, keepdims=True)
    cmean = jnp.mean(x, axis=1, keepdims=True)
    xc = jnp.concatenate([cmax, cmean], axis=1)              # (B, 2, H, W)
    conv = jax.lax.conv_general_dilated(
        xc, conv_w, window_strides=(1, 1), padding=[(P, P), (P, P)],
        dimension_numbers=("NCHW", "OIHW", "NCHW"))
    bn = gamma * (conv - running_mean) / jnp.sqrt(running_var + eps) + beta
    return x * jax.nn.sigmoid(bn)


if __name__ == "__main__":
    key = jax.random.PRNGKey(0)
    kx, kw = jax.random.split(key)

    B, C, H, W = 2, 4, 16, 16
    x = jax.random.normal(kx, (B, C, H, W), dtype=jnp.float32)

    # Conv2d(2 -> 1, k=7, bias=False) weight, kaiming-uniform-like init
    fan_in = 2 * K * K
    bound = 1.0 / np.sqrt(fan_in)
    conv_w = jax.random.uniform(kw, (1, 2, K, K), jnp.float32, -bound, bound)

    # BatchNorm2d(1) default init (eval mode / running stats)
    gamma, beta, running_mean, running_var = 1.0, 0.0, 0.0, 1.0

    out = spatial_attention(x, conv_w, gamma, beta, running_mean, running_var)
    out = jax.block_until_ready(out)

    ref = reference_forward(x, conv_w, gamma, beta, running_mean, running_var)
    np.testing.assert_allclose(np.asarray(out), np.asarray(ref), rtol=1e-4, atol=1e-4)

    print("KERNEL_OK")
</pallas_src>

<mosaic_0001>
module attributes {stable_mosaic.version = 11 : i64} {
  func.func @spatial_attention_kernel(%arg0: i32, %arg1: memref<1x4x256xf32, #tpu.memory_space<vmem>>, %arg2: memref<98xf32, #tpu.memory_space<smem>>, %arg3: memref<2xf32, #tpu.memory_space<smem>>, %arg4: memref<1x4x256xf32, #tpu.memory_space<vmem>>, %arg5: memref<2x7x22x128xf32, #tpu.memory_space<vmem>>, %arg6: memref<1x256xf32, #tpu.memory_space<vmem>>) attributes {dimension_semantics = [#tpu.dimension_semantics<parallel>], iteration_bounds = array<i64: 2>, scalar_prefetch = 0 : i64, scratch_operands = 2 : i64, tpu.core_type = #tpu.core_type<tc>, window_params = [{transform_indices = @transform_0, window_bounds = array<i64: 1, 4, 256>}, {transform_indices = @transform_1, window_bounds = array<i64: 98>}, {transform_indices = @transform_2, window_bounds = array<i64: 2>}, {transform_indices = @transform_3, window_bounds = array<i64: 1, 4, 256>}]} {
    %c0 = arith.constant 0 : index
    %c0_0 = arith.constant 0 : index
    %c0_1 = arith.constant 0 : index
    %0 = vector.load %arg1[%c0, %c0_0, %c0_1] : memref<1x4x256xf32, #tpu.memory_space<vmem>>, vector<1x4x256xf32>
    %1 = vector.shape_cast %0 : vector<1x4x256xf32> to vector<4x256xf32>
    %cst = arith.constant dense<0xFF800000> : vector<256xf32>
    %2 = vector.multi_reduction <maximumf>, %1, %cst [0] : vector<4x256xf32> to vector<256xf32>
    %3 = vector.shape_cast %2 : vector<256xf32> to vector<1x256xf32>
    %cst_2 = arith.constant dense<0.000000e+00> : vector<256xf32>
    %4 = vector.multi_reduction <add>, %1, %cst_2 [0] : vector<4x256xf32> to vector<256xf32>
    %5 = vector.shape_cast %4 : vector<256xf32> to vector<1x256xf32>
    %cst_3 = arith.constant 2.500000e-01 : f32
    %6 = vector.broadcast %cst_3 : f32 to vector<1x256xf32>
    %7 = arith.mulf %5, %6 : vector<1x256xf32>
    %cst_4 = arith.constant 0.000000e+00 : f32
    %8 = vector.broadcast %cst_4 : f32 to vector<3x128xf32>
    %c0_5 = arith.constant 0 : index
    %c0_6 = arith.constant 0 : index
    %c0_7 = arith.constant 0 : index
    %c0_8 = arith.constant 0 : index
    %9 = vector.load %arg5[%c0_5, %c0_6, %c0_7, %c0_8] : memref<2x7x22x128xf32, #tpu.memory_space<vmem>>, vector<1x1x3x128xf32>
    %10 = vector.shape_cast %9 : vector<1x1x3x128xf32> to vector<3x128xf32>
    %11 = vector.shape_cast %8 : vector<3x128xf32> to vector<1x1x3x128xf32>
    tpu.vector_store %arg5[%c0_5, %c0_6, %c0_7, %c0_8], %11 {strides = array<i32>} : memref<2x7x22x128xf32, #tpu.memory_space<vmem>>, vector<1x1x3x128xf32>,
    %cst_9 = arith.constant 0.000000e+00 : f32
    %12 = vector.broadcast %cst_9 : f32 to vector<3x128xf32>
    %c0_10 = arith.constant 0 : index
    %c0_11 = arith.constant 0 : index
    %c19 = arith.constant 19 : index
    %c0_12 = arith.constant 0 : index
    %13 = vector.load %arg5[%c0_10, %c0_11, %c19, %c0_12] : memref<2x7x22x128xf32, #tpu.memory_space<vmem>>, vector<1x1x3x128xf32>
    %14 = vector.shape_cast %13 : vector<1x1x3x128xf32> to vector<3x128xf32>
    %15 = vector.shape_cast %12 : vector<3x128xf32> to vector<1x1x3x128xf32>
    tpu.vector_store %arg5[%c0_10, %c0_11, %c19, %c0_12], %15 {strides = array<i32>} : memref<2x7x22x128xf32, #tpu.memory_space<vmem>>, vector<1x1x3x128xf32>,
    %cst_13 = arith.constant 0.000000e+00 : f32
    %16 = vector.broadcast %cst_13 : f32 to vector<16x3xf32>
    %c0_14 = arith.constant 0 : index
    %c0_15 = arith.constant 0 : index
    %c3 = arith.constant 3 : index
    %c0_16 = arith.constant 0 : index
    %17 = vector.load %arg5[%c0_14, %c0_15, %c3, %c0_16] : memref<2x7x22x128xf32, #tpu.memory_space<vmem>>, vector<1x1x16x3xf32>
    %18 = vector.shape_cast %17 : vector<1x1x16x3xf32> to vector<16x3xf32>
    %19 = vector.shape_cast %16 : vector<16x3xf32> to vector<1x1x16x3xf32>
    tpu.vector_store %arg5[%c0_14, %c0_15, %c3, %c0_16], %19 {strides = array<i32>} : memref<2x7x22x128xf32, #tpu.memory_space<vmem>>, vector<1x1x16x3xf32>,
    %cst_17 = arith.constant 0.000000e+00 : f32
    %20 = vector.broadcast %cst_17 : f32 to vector<16x3xf32>
    %c0_18 = arith.constant 0 : index
    %c0_19 = arith.constant 0 : index
    %c3_20 = arith.constant 3 : index
    %c19_21 = arith.constant 19 : index
    %21 = vector.load %arg5[%c0_18, %c0_19, %c3_20, %c19_21] : memref<2x7x22x128xf32, #tpu.memory_space<vmem>>, vector<1x1x16x3xf32>
    %22 = vector.shape_cast %21 : vector<1x1x16x3xf32> to vector<16x3xf32>
    %23 = vector.shape_cast %20 : vector<16x3xf32> to vector<1x1x16x3xf32>
    tpu.vector_store %arg5[%c0_18, %c0_19, %c3_20, %c19_21], %23 {strides = array<i32>} : memref<2x7x22x128xf32, #tpu.memory_space<vmem>>, vector<1x1x16x3xf32>,
    %24 = vector.extract_strided_slice %3 {offsets = [0, 0], sizes = [1, 16], strides = [1, 1]} : vector<1x256xf32> to vector<1x16xf32>
    %c0_22 = arith.constant 0 : index
    %c0_23 = arith.constant 0 : index
    %c3_24 = arith.constant 3 : index
    %c3_25 = arith.constant 3 : index
    %25 = vector.load %arg5[%c0_22, %c0_23, %c3_24, %c3_25] : memref<2x7x22x128xf32, #tpu.memory_space<vmem>>, vector<1x1x1x16xf32>
    %26 = vector.shape_cast %25 : vector<1x1x1x16xf32> to vector<1x16xf32>
    %27 = vector.shape_cast %24 : vector<1x16xf32> to vector<1x1x1x16xf32>
    tpu.vector_store %arg5[%c0_22, %c0_23, %c3_24, %c3_25], %27 {strides = array<i32>} : memref<2x7x22x128xf32, #tpu.memory_space<vmem>>, vector<1x1x1x16xf32>,
    %28 = vector.extract_strided_slice %3 {offsets = [0, 16], sizes = [1, 16], strides = [1, 1]} : vector<1x256xf32> to vector<1x16xf32>
    %c0_26 = arith.constant 0 : index
    %c0_27 = arith.constant 0 : index
    %c4 = arith.constant 4 : index
    %c3_28 = arith.constant 3 : index
    %29 = vector.load %arg5[%c0_26, %c0_27, %c4, %c3_28] : memref<2x7x22x128xf32, #tpu.memory_space<vmem>>, vector<1x1x1x16xf32>
    %30 = vector.shape_cast %29 : vector<1x1x1x16xf32> to vector<1x16xf32>
    %31 = vector.shape_cast %28 : vector<1x16xf32> to vector<1x1x1x16xf32>
    tpu.vector_store %arg5[%c0_26, %c0_27, %c4, %c3_28], %31 {strides = array<i32>} : memref<2x7x22x128xf32, #tpu.memory_space<vmem>>, vector<1x1x1x16xf32>,
    %32 = vector.extract_strided_slice %3 {offsets = [0, 32], sizes = [1, 16], strides = [1, 1]} : vector<1x256xf32> to vector<1x16xf32>
    %c0_29 = arith.constant 0 : index
    %c0_30 = arith.constant 0 : index
    %c5 = arith.constant 5 : index
    %c3_31 = arith.constant 3 : index
    %33 = vector.load %arg5[%c0_29, %c0_30, %c5, %c3_31] : memref<2x7x22x128xf32, #tpu.memory_space<vmem>>, vector<1x1x1x16xf32>
    %34 = vector.shape_cast %33 : vector<1x1x1x16xf32> to vector<1x16xf32>
    %35 = vector.shape_cast %32 : vector<1x16xf32> to vector<1x1x1x16xf32>
    tpu.vector_store %arg5[%c0_29, %c0_30, %c5, %c3_31], %35 {strides = array<i32>} : memref<2x7x22x128xf32, #tpu.memory_space<vmem>>, vector<1x1x1x16xf32>,
    %36 = vector.extract_strided_slice %3 {offsets = [0, 48], sizes = [1, 16], strides = [1, 1]} : vector<1x256xf32> to vector<1x16xf32>
    %c0_32 = arith.constant 0 : index
    %c0_33 = arith.constant 0 : index
    %c6 = arith.constant 6 : index
    %c3_34 = arith.constant 3 : index
    %37 = vector.load %arg5[%c0_32, %c0_33, %c6, %c3_34] : memref<2x7x22x128xf32, #tpu.memory_space<vmem>>, vector<1x1x1x16xf32>
    %38 = vector.shape_cast %37 : vector<1x1x1x16xf32> to vector<1x16xf32>
    %39 = vector.shape_cast %36 : vector<1x16xf32> to vector<1x1x1x16xf32>
    tpu.vector_store %arg5[%c0_32, %c0_33, %c6, %c3_34], %39 {strides = array<i32>} : memref<2x7x22x128xf32, #tpu.memory_space<vmem>>, vector<1x1x1x16xf32>,
    %40 = vector.extract_strided_slice %3 {offsets = [0, 64], sizes = [1, 16], strides = [1, 1]} : vector<1x256xf32> to vector<1x16xf32>
    %c0_35 = arith.constant 0 : index
    %c0_36 = arith.constant 0 : index
    %c7 = arith.constant 7 : index
    %c3_37 = arith.constant 3 : index
    %41 = vector.load %arg5[%c0_35, %c0_36, %c7, %c3_37] : memref<2x7x22x128xf32, #tpu.memory_space<vmem>>, vector<1x1x1x16xf32>
    %42 = vector.shape_cast %41 : vector<1x1x1x16xf32> to vector<1x16xf32>
    %43 = vector.shape_cast %40 : vector<1x16xf32> to vector<1x1x1x16xf32>
    tpu.vector_store %arg5[%c0_35, %c0_36, %c7, %c3_37], %43 {strides = array<i32>} : memref<2x7x22x128xf32, #tpu.memory_space<vmem>>, vector<1x1x1x16xf32>,
    %44 = vector.extract_strided_slice %3 {offsets = [0, 80], sizes = [1, 16], strides = [1, 1]} : vector<1x256xf32> to vector<1x16xf32>
    %c0_38 = arith.constant 0 : index
    %c0_39 = arith.constant 0 : index
    %c8 = arith.constant 8 : index
    %c3_40 = arith.constant 3 : index
    %45 = vector.load %arg5[%c0_38, %c0_39, %c8, %c3_40] : memref<2x7x22x128xf32, #tpu.memory_space<vmem>>, vector<1x1x1x16xf32>
    %46 = vector.shape_cast %45 : vector<1x1x1x16xf32> to vector<1x16xf32>
    %47 = vector.shape_cast %44 : vector<1x16xf32> to vector<1x1x1x16xf32>
    tpu.vector_store %arg5[%c0_38, %c0_39, %c8, %c3_40], %47 {strides = array<i32>} : memref<2x7x22x128xf32, #tpu.memory_space<vmem>>, vector<1x1x1x16xf32>,
    %48 = vector.extract_strided_slice %3 {offsets = [0, 96], sizes = [1, 16], strides = [1, 1]} : vector<1x256xf32> to vector<1x16xf32>
    %c0_41 = arith.constant 0 : index
    %c0_42 = arith.constant 0 : index
    %c9 = arith.constant 9 : index
    %c3_43 = arith.constant 3 : index
    %49 = vector.load %arg5[%c0_41, %c0_42, %c9, %c3_43] : memref<2x7x22x128xf32, #tpu.memory_space<vmem>>, vector<1x1x1x16xf32>
    %50 = vector.shape_cast %49 : vector<1x1x1x16xf32> to vector<1x16xf32>
    %51 = vector.shape_cast %48 : vector<1x16xf32> to vector<1x1x1x16xf32>
    tpu.vector_store %arg5[%c0_41, %c0_42, %c9, %c3_43], %51 {strides = array<i32>} : memref<2x7x22x128xf32, #tpu.memory_space<vmem>>, vector<1x1x1x16xf32>,
    %52 = vector.extract_strided_slice %3 {offsets = [0, 112], sizes = [1, 16], strides = [1, 1]} : vector<1x256xf32> to vector<1x16xf32>
    %c0_44 = arith.constant 0 : index
    %c0_45 = arith.constant 0 : index
    %c10 = arith.constant 10 : index
    %c3_46 = arith.constant 3 : index
    %53 = vector.load %arg5[%c0_44, %c0_45, %c10, %c3_46] : memref<2x7x22x128xf32, #tpu.memory_space<vmem>>, vector<1x1x1x16xf32>
    %54 = vector.shape_cast %53 : vector<1x1x1x16xf32> to vector<1x16xf32>
    %55 = vector.shape_cast %52 : vector<1x16xf32> to vector<1x1x1x16xf32>
    tpu.vector_store %arg5[%c0_44, %c0_45, %c10, %c3_46], %55 {strides = array<i32>} : memref<2x7x22x128xf32, #tpu.memory_space<vmem>>, vector<1x1x1x16xf32>,
    %56 = vector.extract_strided_slice %3 {offsets = [0, 128], sizes = [1, 16], strides = [1, 1]} : vector<1x256xf32> to vector<1x16xf32>
    %c0_47 = arith.constant 0 : index
    %c0_48 = arith.constant 0 : index
    %c11 = arith.constant 11 : index
    %c3_49 = arith.constant 3 : index
    %57 = vector.load %arg5[%c0_47, %c0_48, %c11, %c3_49] : memref<2x7x22x128xf32, #tpu.memory_space<vmem>>, vector<1x1x1x16xf32>
    %58 = vector.shape_cast %57 : vector<1x1x1x16xf32> to vector<1x16xf32>
    %59 = vector.shape_cast %56 : vector<1x16xf32> to vector<1x1x1x16xf32>
    tpu.vector_store %arg5[%c0_47, %c0_48, %c11, %c3_49], %59 {strides = array<i32>} : memref<2x7x22x128xf32, #tpu.memory_space<vmem>>, vector<1x1x1x16xf32>,
    %60 = vector.extract_strided_slice %3 {offsets = [0, 144], sizes = [1, 16], strides = [1, 1]} : vector<1x256xf32> to vector<1x16xf32>
    %c0_50 = arith.constant 0 : index
    %c0_51 = arith.constant 0 : index
    %c12 = arith.constant 12 : index
    %c3_52 = arith.constant 3 : index
    %61 = vector.load %arg5[%c0_50, %c0_51, %c12, %c3_52] : memref<2x7x22x128xf32, #tpu.memory_space<vmem>>, vector<1x1x1x16xf32>
    %62 = vector.shape_cast %61 : vector<1x1x1x16xf32> to vector<1x16xf32>
    %63 = vector.shape_cast %60 : vector<1x16xf32> to vector<1x1x1x16xf32>
    tpu.vector_store %arg5[%c0_50, %c0_51, %c12, %c3_52], %63 {strides = array<i32>} : memref<2x7x22x128xf32, #tpu.memory_space<vmem>>, vector<1x1x1x16xf32>,
    %64 = vector.extract_strided_slice %3 {offsets = [0, 160], sizes = [1, 16], strides = [1, 1]} : vector<1x256xf32> to vector<1x16xf32>
    %c0_53 = arith.constant 0 : index
    %c0_54 = arith.constant 0 : index
    %c13 = arith.constant 13 : index
    %c3_55 = arith.constant 3 : index
    %65 = vector.load %arg5[%c0_53, %c0_54, %c13, %c3_55] : memref<2x7x22x128xf32, #tpu.memory_space<vmem>>, vector<1x1x1x16xf32>
    %66 = vector.shape_cast %65 : vector<1x1x1x16xf32> to vector<1x16xf32>
    %67 = vector.shape_cast %64 : vector<1x16xf32> to vector<1x1x1x16xf32>
    tpu.vector_store %arg5[%c0_53, %c0_54, %c13, %c3_55], %67 {strides = array<i32>} : memref<2x7x22x128xf32, #tpu.memory_space<vmem>>, vector<1x1x1x16xf32>,
    %68 = vector.extract_strided_slice %3 {offsets = [0, 176], sizes = [1, 16], strides = [1, 1]} : vector<1x256xf32> to vector<1x16xf32>
    %c0_56 = arith.constant 0 : index
    %c0_57 = arith.constant 0 : index
    %c14 = arith.constant 14 : index
    %c3_58 = arith.constant 3 : index
    %69 = vector.load %arg5[%c0_56, %c0_57, %c14, %c3_58] : memref<2x7x22x128xf32, #tpu.memory_space<vmem>>, vector<1x1x1x16xf32>
    %70 = vector.shape_cast %69 : vector<1x1x1x16xf32> to vector<1x16xf32>
    %71 = vector.shape_cast %68 : vector<1x16xf32> to vector<1x1x1x16xf32>
    tpu.vector_store %arg5[%c0_56, %c0_57, %c14, %c3_58], %71 {strides = array<i32>} : memref<2x7x22x128xf32, #tpu.memory_space<vmem>>, vector<1x1x1x16xf32>,
    %72 = vector.extract_strided_slice %3 {offsets = [0, 192], sizes = [1, 16], strides = [1, 1]} : vector<1x256xf32> to vector<1x16xf32>
    %c0_59 = arith.constant 0 : index
    %c0_60 = arith.constant 0 : index
    %c15 = arith.constant 15 : index
    %c3_61 = arith.constant 3 : index
    %73 = vector.load %arg5[%c0_59, %c0_60, %c15, %c3_61] : memref<2x7x22x128xf32, #tpu.memory_space<vmem>>, vector<1x1x1x16xf32>
    %74 = vector.shape_cast %73 : vector<1x1x1x16xf32> to vector<1x16xf32>
    %75 = vector.shape_cast %72 : vector<1x16xf32> to vector<1x1x1x16xf32>
    tpu.vector_store %arg5[%c0_59, %c0_60, %c15, %c3_61], %75 {strides = array<i32>} : memref<2x7x22x128xf32, #tpu.memory_space<vmem>>, vector<1x1x1x16xf32>,
    %76 = vector.extract_strided_slice %3 {offsets = [0, 208], sizes = [1, 16], strides = [1, 1]} : vector<1x256xf32> to vector<1x16xf32>
    %c0_62 = arith.constant 0 : index
    %c0_63 = arith.constant 0 : index
    %c16 = arith.constant 16 : index
    %c3_64 = arith.constant 3 : index
    %77 = vector.load %arg5[%c0_62, %c0_63, %c16, %c3_64] : memref<2x7x22x128xf32, #tpu.memory_space<vmem>>, vector<1x1x1x16xf32>
    %78 = vector.shape_cast %77 : vector<1x1x1x16xf32> to vector<1x16xf32>
    %79 = vector.shape_cast %76 : vector<1x16xf32> to vector<1x1x1x16xf32>
    tpu.vector_store %arg5[%c0_62, %c0_63, %c16, %c3_64], %79 {strides = array<i32>} : memref<2x7x22x128xf32, #tpu.memory_space<vmem>>, vector<1x1x1x16xf32>,
    %80 = vector.extract_strided_slice %3 {offsets = [0, 224], sizes = [1, 16], strides = [1, 1]} : vector<1x256xf32> to vector<1x16xf32>
    %c0_65 = arith.constant 0 : index
    %c0_66 = arith.constant 0 : index
    %c17 = arith.constant 17 : index
    %c3_67 = arith.constant 3 : index
    %81 = vector.load %arg5[%c0_65, %c0_66, %c17, %c3_67] : memref<2x7x22x128xf32, #tpu.memory_space<vmem>>, vector<1x1x1x16xf32>
    %82 = vector.shape_cast %81 : vector<1x1x1x16xf32> to vector<1x16xf32>
    %83 = vector.shape_cast %80 : vector<1x16xf32> to vector<1x1x1x16xf32>
    tpu.vector_store %arg5[%c0_65, %c0_66, %c17, %c3_67], %83 {strides = array<i32>} : memref<2x7x22x128xf32, #tpu.memory_space<vmem>>, vector<1x1x1x16xf32>,
    %84 = vector.extract_strided_slice %3 {offsets = [0, 240], sizes = [1, 16], strides = [1, 1]} : vector<1x256xf32> to vector<1x16xf32>
    %c0_68 = arith.constant 0 : index
    %c0_69 = arith.constant 0 : index
    %c18 = arith.constant 18 : index
    %c3_70 = arith.constant 3 : index
    %85 = vector.load %arg5[%c0_68, %c0_69, %c18, %c3_70] : memref<2x7x22x128xf32, #tpu.memory_space<vmem>>, vector<1x1x1x16xf32>
    %86 = vector.shape_cast %85 : vector<1x1x1x16xf32> to vector<1x16xf32>
    %87 = vector.shape_cast %84 : vector<1x16xf32> to vector<1x1x1x16xf32>
    tpu.vector_store %arg5[%c0_68, %c0_69, %c18, %c3_70], %87 {strides = array<i32>} : memref<2x7x22x128xf32, #tpu.memory_space<vmem>>, vector<1x1x1x16xf32>,
    %cst_71 = arith.constant 0.000000e+00 : f32
    %88 = vector.broadcast %cst_71 : f32 to vector<3x128xf32>
    %c1 = arith.constant 1 : index
    %c0_72 = arith.constant 0 : index
    %c0_73 = arith.constant 0 : index
    %c0_74 = arith.constant 0 : index
    %89 = vector.load %arg5[%c1, %c0_72, %c0_73, %c0_74] : memref<2x7x22x128xf32, #tpu.memory_space<vmem>>, vector<1x1x3x128xf32>
    %90 = vector.shape_cast %89 : vector<1x1x3x128xf32> to vector<3x128xf32>
    %91 = vector.shape_cast %88 : vector<3x128xf32> to vector<1x1x3x128xf32>
    tpu.vector_store %arg5[%c1, %c0_72, %c0_73, %c0_74], %91 {strides = array<i32>} : memref<2x7x22x128xf32, #tpu.memory_space<vmem>>, vector<1x1x3x128xf32>,
    %cst_75 = arith.constant 0.000000e+00 : f32
    %92 = vector.broadcast %cst_75 : f32 to vector<3x128xf32>
    %c1_76 = arith.constant 1 : index
    %c0_77 = arith.constant 0 : index
    %c19_78 = arith.constant 19 : index
    %c0_79 = arith.constant 0 : index
    %93 = vector.load %arg5[%c1_76, %c0_77, %c19_78, %c0_79] : memref<2x7x22x128xf32, #tpu.memory_space<vmem>>, vector<1x1x3x128xf32>
    %94 = vector.shape_cast %93 : vector<1x1x3x128xf32> to vector<3x128xf32>
    %95 = vector.shape_cast %92 : vector<3x128xf32> to vector<1x1x3x128xf32>
    tpu.vector_store %arg5[%c1_76, %c0_77, %c19_78, %c0_79], %95 {strides = array<i32>} : memref<2x7x22x128xf32, #tpu.memory_space<vmem>>, vector<1x1x3x128xf32>,
    %cst_80 = arith.constant 0.000000e+00 : f32
    %96 = vector.broadcast %cst_80 : f32 to vector<16x3xf32>
    %c1_81 = arith.constant 1 : index
    %c0_82 = arith.constant 0 : index
    %c3_83 = arith.constant 3 : index
    %c0_84 = arith.constant 0 : index
    %97 = vector.load %arg5[%c1_81, %c0_82, %c3_83, %c0_84] : memref<2x7x22x128xf32, #tpu.memory_space<vmem>>, vector<1x1x16x3xf32>
    %98 = vector.shape_cast %97 : vector<1x1x16x3xf32> to vector<16x3xf32>
    %99 = vector.shape_cast %96 : vector<16x3xf32> to vector<1x1x16x3xf32>
    tpu.vector_store %arg5[%c1_81, %c0_82, %c3_83, %c0_84], %99 {strides = array<i32>} : memref<2x7x22x128xf32, #tpu.memory_space<vmem>>, vector<1x1x16x3xf32>,
    %cst_85 = arith.constant 0.000000e+00 : f32
    %100 = vector.broadcast %cst_85 : f32 to vector<16x3xf32>
    %c1_86 = arith.constant 1 : index
    %c0_87 = arith.constant 0 : index
    %c3_88 = arith.constant 3 : index
    %c19_89 = arith.constant 19 : index
    %101 = vector.load %arg5[%c1_86, %c0_87, %c3_88, %c19_89] : memref<2x7x22x128xf32, #tpu.memory_space<vmem>>, vector<1x1x16x3xf32>
    %102 = vector.shape_cast %101 : vector<1x1x16x3xf32> to vector<16x3xf32>
    %103 = vector.shape_cast %100 : vector<16x3xf32> to vector<1x1x16x3xf32>
    tpu.vector_store %arg5[%c1_86, %c0_87, %c3_88, %c19_89], %103 {strides = array<i32>} : memref<2x7x22x128xf32, #tpu.memory_space<vmem>>, vector<1x1x16x3xf32>,
    %104 = vector.extract_strided_slice %7 {offsets = [0, 0], sizes = [1, 16], strides = [1, 1]} : vector<1x256xf32> to vector<1x16xf32>
    %c1_90 = arith.constant 1 : index
    %c0_91 = arith.constant 0 : index
    %c3_92 = arith.constant 3 : index
    %c3_93 = arith.constant 3 : index
    %105 = vector.load %arg5[%c1_90, %c0_91, %c3_92, %c3_93] : memref<2x7x22x128xf32, #tpu.memory_space<vmem>>, vector<1x1x1x16xf32>
    %106 = vector.shape_cast %105 : vector<1x1x1x16xf32> to vector<1x16xf32>
    %107 = vector.shape_cast %104 : vector<1x16xf32> to vector<1x1x1x16xf32>
    tpu.vector_store %arg5[%c1_90, %c0_91, %c3_92, %c3_93], %107 {strides = array<i32>} : memref<2x7x22x128xf32, #tpu.memory_space<vmem>>, vector<1x1x1x16xf32>,
    %108 = vector.extract_strided_slice %7 {offsets = [0, 16], sizes = [1, 16], strides = [1, 1]} : vector<1x256xf32> to vector<1x16xf32>
    %c1_94 = arith.constant 1 : index
    %c0_95 = arith.constant 0 : index
    %c4_96 = arith.constant 4 : index
    %c3_97 = arith.constant 3 : index
    %109 = vector.load %arg5[%c1_94, %c0_95, %c4_96, %c3_97] : memref<2x7x22x128xf32, #tpu.memory_space<vmem>>, vector<1x1x1x16xf32>
    %110 = vector.shape_cast %109 : vector<1x1x1x16xf32> to vector<1x16xf32>
    %111 = vector.shape_cast %108 : vector<1x16xf32> to vector<1x1x1x16xf32>
    tpu.vector_store %arg5[%c1_94, %c0_95, %c4_96, %c3_97], %111 {strides = array<i32>} : memref<2x7x22x128xf32, #tpu.memory_space<vmem>>, vector<1x1x1x16xf32>,
    %112 = vector.extract_strided_slice %7 {offsets = [0, 32], sizes = [1, 16], strides = [1, 1]} : vector<1x256xf32> to vector<1x16xf32>
    %c1_98 = arith.constant 1 : index
    %c0_99 = arith.constant 0 : index
    %c5_100 = arith.constant 5 : index
    %c3_101 = arith.constant 3 : index
    %113 = vector.load %arg5[%c1_98, %c0_99, %c5_100, %c3_101] : memref<2x7x22x128xf32, #tpu.memory_space<vmem>>, vector<1x1x1x16xf32>
    %114 = vector.shape_cast %113 : vector<1x1x1x16xf32> to vector<1x16xf32>
    %115 = vector.shape_cast %112 : vector<1x16xf32> to vector<1x1x1x16xf32>
    tpu.vector_store %arg5[%c1_98, %c0_99, %c5_100, %c3_101], %115 {strides = array<i32>} : memref<2x7x22x128xf32, #tpu.memory_space<vmem>>, vector<1x1x1x16xf32>,
    %116 = vector.extract_strided_slice %7 {offsets = [0, 48], sizes = [1, 16], strides = [1, 1]} : vector<1x256xf32> to vector<1x16xf32>
    %c1_102 = arith.constant 1 : index
    %c0_103 = arith.constant 0 : index
    %c6_104 = arith.constant 6 : index
    %c3_105 = arith.constant 3 : index
    %117 = vector.load %arg5[%c1_102, %c0_103, %c6_104, %c3_105] : memref<2x7x22x128xf32, #tpu.memory_space<vmem>>, vector<1x1x1x16xf32>
    %118 = vector.shape_cast %117 : vector<1x1x1x16xf32> to vector<1x16xf32>
    %119 = vector.shape_cast %116 : vector<1x16xf32> to vector<1x1x1x16xf32>
    tpu.vector_store %arg5[%c1_102, %c0_103, %c6_104, %c3_105], %119 {strides = array<i32>} : memref<2x7x22x128xf32, #tpu.memory_space<vmem>>, vector<1x1x1x16xf32>,
    %120 = vector.extract_strided_slice %7 {offsets = [0, 64], sizes = [1, 16], strides = [1, 1]} : vector<1x256xf32> to vector<1x16xf32>
    %c1_106 = arith.constant 1 : index
    %c0_107 = arith.constant 0 : index
    %c7_108 = arith.constant 7 : index
    %c3_109 = arith.constant 3 : index
    %121 = vector.load %arg5[%c1_106, %c0_107, %c7_108, %c3_109] : memref<2x7x22x128xf32, #tpu.memory_space<vmem>>, vector<1x1x1x16xf32>
    %122 = vector.shape_cast %121 : vector<1x1x1x16xf32> to vector<1x16xf32>
    %123 = vector.shape_cast %120 : vector<1x16xf32> to vector<1x1x1x16xf32>
    tpu.vector_store %arg5[%c1_106, %c0_107, %c7_108, %c3_109], %123 {strides = array<i32>} : memref<2x7x22x128xf32, #tpu.memory_space<vmem>>, vector<1x1x1x16xf32>,
    %124 = vector.extract_strided_slice %7 {offsets = [0, 80], sizes = [1, 16], strides = [1, 1]} : vector<1x256xf32> to vector<1x16xf32>
    %c1_110 = arith.constant 1 : index
    %c0_111 = arith.constant 0 : index
    %c8_112 = arith.constant 8 : index
    %c3_113 = arith.constant 3 : index
    %125 = vector.load %arg5[%c1_110, %c0_111, %c8_112, %c3_113] : memref<2x7x22x128xf32, #tpu.memory_space<vmem>>, vector<1x1x1x16xf32>
    %126 = vector.shape_cast %125 : vector<1x1x1x16xf32> to vector<1x16xf32>
    %127 = vector.shape_cast %124 : vector<1x16xf32> to vector<1x1x1x16xf32>
    tpu.vector_store %arg5[%c1_110, %c0_111, %c8_112, %c3_113], %127 {strides = array<i32>} : memref<2x7x22x128xf32, #tpu.memory_space<vmem>>, vector<1x1x1x16xf32>,
    %128 = vector.extract_strided_slice %7 {offsets = [0, 96], sizes = [1, 16], strides = [1, 1]} : vector<1x256xf32> to vector<1x16xf32>
    %c1_114 = arith.constant 1 : index
    %c0_115 = arith.constant 0 : index
    %c9_116 = arith.constant 9 : index
    %c3_117 = arith.constant 3 : index
    %129 = vector.load %arg5[%c1_114, %c0_115, %c9_116, %c3_117] : memref<2x7x22x128xf32, #tpu.memory_space<vmem>>, vector<1x1x1x16xf32>
    %130 = vector.shape_cast %129 : vector<1x1x1x16xf32> to vector<1x16xf32>
    %131 = vector.shape_cast %128 : vector<1x16xf32> to vector<1x1x1x16xf32>
    tpu.vector_store %arg5[%c1_114, %c0_115, %c9_116, %c3_117], %131 {strides = array<i32>} : memref<2x7x22x128xf32, #tpu.memory_space<vmem>>, vector<1x1x1x16xf32>,
    %132 = vector.extract_strided_slice %7 {offsets = [0, 112], sizes = [1, 16], strides = [1, 1]} : vector<1x256xf32> to vector<1x16xf32>
    %c1_118 = arith.constant 1 : index
    %c0_119 = arith.constant 0 : index
    %c10_120 = arith.constant 10 : index
    %c3_121 = arith.constant 3 : index
    %133 = vector.load %arg5[%c1_118, %c0_119, %c10_120, %c3_121] : memref<2x7x22x128xf32, #tpu.memory_space<vmem>>, vector<1x1x1x16xf32>
    %134 = vector.shape_cast %133 : vector<1x1x1x16xf32> to vector<1x16xf32>
    %135 = vector.shape_cast %132 : vector<1x16xf32> to vector<1x1x1x16xf32>
    tpu.vector_store %arg5[%c1_118, %c0_119, %c10_120, %c3_121], %135 {strides = array<i32>} : memref<2x7x22x128xf32, #tpu.memory_space<vmem>>, vector<1x1x1x16xf32>,
    %136 = vector.extract_strided_slice %7 {offsets = [0, 128], sizes = [1, 16], strides = [1, 1]} : vector<1x256xf32> to vector<1x16xf32>
    %c1_122 = arith.constant 1 : index
    %c0_123 = arith.constant 0 : index
    %c11_124 = arith.constant 11 : index
    %c3_125 = arith.constant 3 : index
    %137 = vector.load %arg5[%c1_122, %c0_123, %c11_124, %c3_125] : memref<2x7x22x128xf32, #tpu.memory_space<vmem>>, vector<1x1x1x16xf32>
    %138 = vector.shape_cast %137 : vector<1x1x1x16xf32> to vector<1x16xf32>
    %139 = vector.shape_cast %136 : vector<1x16xf32> to vector<1x1x1x16xf32>
    tpu.vector_store %arg5[%c1_122, %c0_123, %c11_124, %c3_125], %139 {strides = array<i32>} : memref<2x7x22x128xf32, #tpu.memory_space<vmem>>, vector<1x1x1x16xf32>,
    %140 = vector.extract_strided_slice %7 {offsets = [0, 144], sizes = [1, 16], strides = [1, 1]} : vector<1x256xf32> to vector<1x16xf32>
    %c1_126 = arith.constant 1 : index
    %c0_127 = arith.constant 0 : index
    %c12_128 = arith.constant 12 : index
    %c3_129 = arith.constant 3 : index
    %141 = vector.load %arg5[%c1_126, %c0_127, %c12_128, %c3_129] : memref<2x7x22x128xf32, #tpu.memory_space<vmem>>, vector<1x1x1x16xf32>
    %142 = vector.shape_cast %141 : vector<1x1x1x16xf32> to vector<1x16xf32>
    %143 = vector.shape_cast %140 : vector<1x16xf32> to vector<1x1x1x16xf32>
    tpu.vector_store %arg5[%c1_126, %c0_127, %c12_128, %c3_129], %143 {strides = array<i32>} : memref<2x7x22x128xf32, #tpu.memory_space<vmem>>, vector<1x1x1x16xf32>,
    %144 = vector.extract_strided_slice %7 {offsets = [0, 160], sizes = [1, 16], strides = [1, 1]} : vector<1x256xf32> to vector<1x16xf32>
    %c1_130 = arith.constant 1 : index
    %c0_131 = arith.constant 0 : index
    %c13_132 = arith.constant 13 : index
    %c3_133 = arith.constant 3 : index
    %145 = vector.load %arg5[%c1_130, %c0_131, %c13_132, %c3_133] : memref<2x7x22x128xf32, #tpu.memory_space<vmem>>, vector<1x1x1x16xf32>
    %146 = vector.shape_cast %145 : vector<1x1x1x16xf32> to vector<1x16xf32>
    %147 = vector.shape_cast %144 : vector<1x16xf32> to vector<1x1x1x16xf32>
    tpu.vector_store %arg5[%c1_130, %c0_131, %c13_132, %c3_133], %147 {strides = array<i32>} : memref<2x7x22x128xf32, #tpu.memory_space<vmem>>, vector<1x1x1x16xf32>,
    %148 = vector.extract_strided_slice %7 {offsets = [0, 176], sizes = [1, 16], strides = [1, 1]} : vector<1x256xf32> to vector<1x16xf32>
    %c1_134 = arith.constant 1 : index
    %c0_135 = arith.constant 0 : index
    %c14_136 = arith.constant 14 : index
    %c3_137 = arith.constant 3 : index
    %149 = vector.load %arg5[%c1_134, %c0_135, %c14_136, %c3_137] : memref<2x7x22x128xf32, #tpu.memory_space<vmem>>, vector<1x1x1x16xf32>
    %150 = vector.shape_cast %149 : vector<1x1x1x16xf32> to vector<1x16xf32>
    %151 = vector.shape_cast %148 : vector<1x16xf32> to vector<1x1x1x16xf32>
    tpu.vector_store %arg5[%c1_134, %c0_135, %c14_136, %c3_137], %151 {strides = array<i32>} : memref<2x7x22x128xf32, #tpu.memory_space<vmem>>, vector<1x1x1x16xf32>,
    %152 = vector.extract_strided_slice %7 {offsets = [0, 192], sizes = [1, 16], strides = [1, 1]} : vector<1x256xf32> to vector<1x16xf32>
    %c1_138 = arith.constant 1 : index
    %c0_139 = arith.constant 0 : index
    %c15_140 = arith.constant 15 : index
    %c3_141 = arith.constant 3 : index
    %153 = vector.load %arg5[%c1_138, %c0_139, %c15_140, %c3_141] : memref<2x7x22x128xf32, #tpu.memory_space<vmem>>, vector<1x1x1x16xf32>
    %154 = vector.shape_cast %153 : vector<1x1x1x16xf32> to vector<1x16xf32>
    %155 = vector.shape_cast %152 : vector<1x16xf32> to vector<1x1x1x16xf32>
    tpu.vector_store %arg5[%c1_138, %c0_139, %c15_140, %c3_141], %155 {strides = array<i32>} : memref<2x7x22x128xf32, #tpu.memory_space<vmem>>, vector<1x1x1x16xf32>,
    %156 = vector.extract_strided_slice %7 {offsets = [0, 208], sizes = [1, 16], strides = [1, 1]} : vector<1x256xf32> to vector<1x16xf32>
    %c1_142 = arith.constant 1 : index
    %c0_143 = arith.constant 0 : index
    %c16_144 = arith.constant 16 : index
    %c3_145 = arith.constant 3 : index
    %157 = vector.load %arg5[%c1_142, %c0_143, %c16_144, %c3_145] : memref<2x7x22x128xf32, #tpu.memory_space<vmem>>, vector<1x1x1x16xf32>
    %158 = vector.shape_cast %157 : vector<1x1x1x16xf32> to vector<1x16xf32>
    %159 = vector.shape_cast %156 : vector<1x16xf32> to vector<1x1x1x16xf32>
    tpu.vector_store %arg5[%c1_142, %c0_143, %c16_144, %c3_145], %159 {strides = array<i32>} : memref<2x7x22x128xf32, #tpu.memory_space<vmem>>, vector<1x1x1x16xf32>,
    %160 = vector.extract_strided_slice %7 {offsets = [0, 224], sizes = [1, 16], strides = [1, 1]} : vector<1x256xf32> to vector<1x16xf32>
    %c1_146 = arith.constant 1 : index
    %c0_147 = arith.constant 0 : index
    %c17_148 = arith.constant 17 : index
    %c3_149 = arith.constant 3 : index
    %161 = vector.load %arg5[%c1_146, %c0_147, %c17_148, %c3_149] : memref<2x7x22x128xf32, #tpu.memory_space<vmem>>, vector<1x1x1x16xf32>
    %162 = vector.shape_cast %161 : vector<1x1x1x16xf32> to vector<1x16xf32>
    %163 = vector.shape_cast %160 : vector<1x16xf32> to vector<1x1x1x16xf32>
    tpu.vector_store %arg5[%c1_146, %c0_147, %c17_148, %c3_149], %163 {strides = array<i32>} : memref<2x7x22x128xf32, #tpu.memory_space<vmem>>, vector<1x1x1x16xf32>,
    %164 = vector.extract_strided_slice %7 {offsets = [0, 240], sizes = [1, 16], strides = [1, 1]} : vector<1x256xf32> to vector<1x16xf32>
    %c1_150 = arith.constant 1 : index
    %c0_151 = arith.constant 0 : index
    %c18_152 = arith.constant 18 : index
    %c3_153 = arith.constant 3 : index
    %165 = vector.load %arg5[%c1_150, %c0_151, %c18_152, %c3_153] : memref<2x7x22x128xf32, #tpu.memory_space<vmem>>, vector<1x1x1x16xf32>
    %166 = vector.shape_cast %165 : vector<1x1x1x16xf32> to vector<1x16xf32>
    %167 = vector.shape_cast %164 : vector<1x16xf32> to vector<1x1x1x16xf32>
    tpu.vector_store %arg5[%c1_150, %c0_151, %c18_152, %c3_153], %167 {strides = array<i32>} : memref<2x7x22x128xf32, #tpu.memory_space<vmem>>, vector<1x1x1x16xf32>,
    %c0_154 = arith.constant 0 : index
    %c0_155 = arith.constant 0 : index
    %c0_156 = arith.constant 0 : index
    %c0_157 = arith.constant 0 : index
    %168 = vector.load %arg5[%c0_154, %c0_155, %c0_156, %c0_157] : memref<2x7x22x128xf32, #tpu.memory_space<vmem>>, vector<1x1x22x128xf32>
    %169 = vector.shape_cast %168 : vector<1x1x22x128xf32> to vector<22x128xf32>
    %c127_i32 = arith.constant 127 : i32
    %170 = tpu.dynamic_rotate %169 by %c127_i32 dim 1 : vector<22x128xf32>, i32 -> vector<22x128xf32>
    %c0_158 = arith.constant 0 : index
    %c1_159 = arith.constant 1 : index
    %c0_160 = arith.constant 0 : index
    %c0_161 = arith.constant 0 : index
    %171 = vector.load %arg5[%c0_158, %c1_159, %c0_160, %c0_161] : memref<2x7x22x128xf32, #tpu.memory_space<vmem>>, vector<1x1x22x128xf32>
    %172 = vector.shape_cast %171 : vector<1x1x22x128xf32> to vector<22x128xf32>
    %173 = vector.shape_cast %170 : vector<22x128xf32> to vector<1x1x22x128xf32>
    tpu.vector_store %arg5[%c0_158, %c1_159, %c0_160, %c0_161], %173 {strides = array<i32>} : memref<2x7x22x128xf32, #tpu.memory_space<vmem>>, vector<1x1x22x128xf32>,
    %c126_i32 = arith.constant 126 : i32
    %174 = tpu.dynamic_rotate %169 by %c126_i32 dim 1 : vector<22x128xf32>, i32 -> vector<22x128xf32>
    %c0_162 = arith.constant 0 : index
    %c2 = arith.constant 2 : index
    %c0_163 = arith.constant 0 : index
    %c0_164 = arith.constant 0 : index
    %175 = vector.load %arg5[%c0_162, %c2, %c0_163, %c0_164] : memref<2x7x22x128xf32, #tpu.memory_space<vmem>>, vector<1x1x22x128xf32>
    %176 = vector.shape_cast %175 : vector<1x1x22x128xf32> to vector<22x128xf32>
    %177 = vector.shape_cast %174 : vector<22x128xf32> to vector<1x1x22x128xf32>
    tpu.vector_store %arg5[%c0_162, %c2, %c0_163, %c0_164], %177 {strides = array<i32>} : memref<2x7x22x128xf32, #tpu.memory_space<vmem>>, vector<1x1x22x128xf32>,
    %c125_i32 = arith.constant 125 : i32
    %178 = tpu.dynamic_rotate %169 by %c125_i32 dim 1 : vector<22x128xf32>, i32 -> vector<22x128xf32>
    %c0_165 = arith.constant 0 : index
    %c3_166 = arith.constant 3 : index
    %c0_167 = arith.constant 0 : index
    %c0_168 = arith.constant 0 : index
    %179 = vector.load %arg5[%c0_165, %c3_166, %c0_167, %c0_168] : memref<2x7x22x128xf32, #tpu.memory_space<vmem>>, vector<1x1x22x128xf32>
    %180 = vector.shape_cast %179 : vector<1x1x22x128xf32> to vector<22x128xf32>
    %181 = vector.shape_cast %178 : vector<22x128xf32> to vector<1x1x22x128xf32>
    tpu.vector_store %arg5[%c0_165, %c3_166, %c0_167, %c0_168], %181 {strides = array<i32>} : memref<2x7x22x128xf32, #tpu.memory_space<vmem>>, vector<1x1x22x128xf32>,
    %c124_i32 = arith.constant 124 : i32
    %182 = tpu.dynamic_rotate %169 by %c124_i32 dim 1 : vector<22x128xf32>, i32 -> vector<22x128xf32>
    %c0_169 = arith.constant 0 : index
    %c4_170 = arith.constant 4 : index
    %c0_171 = arith.constant 0 : index
    %c0_172 = arith.constant 0 : index
    %183 = vector.load %arg5[%c0_169, %c4_170, %c0_171, %c0_172] : memref<2x7x22x128xf32, #tpu.memory_space<vmem>>, vector<1x1x22x128xf32>
    %184 = vector.shape_cast %183 : vector<1x1x22x128xf32> to vector<22x128xf32>
    %185 = vector.shape_cast %182 : vector<22x128xf32> to vector<1x1x22x128xf32>
    tpu.vector_store %arg5[%c0_169, %c4_170, %c0_171, %c0_172], %185 {strides = array<i32>} : memref<2x7x22x128xf32, #tpu.memory_space<vmem>>, vector<1x1x22x128xf32>,
    %c123_i32 = arith.constant 123 : i32
    %186 = tpu.dynamic_rotate %169 by %c123_i32 dim 1 : vector<22x128xf32>, i32 -> vector<22x128xf32>
    %c0_173 = arith.constant 0 : index
    %c5_174 = arith.constant 5 : index
    %c0_175 = arith.constant 0 : index
    %c0_176 = arith.constant 0 : index
    %187 = vector.load %arg5[%c0_173, %c5_174, %c0_175, %c0_176] : memref<2x7x22x128xf32, #tpu.memory_space<vmem>>, vector<1x1x22x128xf32>
    %188 = vector.shape_cast %187 : vector<1x1x22x128xf32> to vector<22x128xf32>
    %189 = vector.shape_cast %186 : vector<22x128xf32> to vector<1x1x22x128xf32>
    tpu.vector_store %arg5[%c0_173, %c5_174, %c0_175, %c0_176], %189 {strides = array<i32>} : memref<2x7x22x128xf32, #tpu.memory_space<vmem>>, vector<1x1x22x128xf32>,
    %c122_i32 = arith.constant 122 : i32
    %190 = tpu.dynamic_rotate %169 by %c122_i32 dim 1 : vector<22x128xf32>, i32 -> vector<22x128xf32>
    %c0_177 = arith.constant 0 : index
    %c6_178 = arith.constant 6 : index
    %c0_179 = arith.constant 0 : index
    %c0_180 = arith.constant 0 : index
    %191 = vector.load %arg5[%c0_177, %c6_178, %c0_179, %c0_180] : memref<2x7x22x128xf32, #tpu.memory_space<vmem>>, vector<1x1x22x128xf32>
    %192 = vector.shape_cast %191 : vector<1x1x22x128xf32> to vector<22x128xf32>
    %193 = vector.shape_cast %190 : vector<22x128xf32> to vector<1x1x22x128xf32>
    tpu.vector_store %arg5[%c0_177, %c6_178, %c0_179, %c0_180], %193 {strides = array<i32>} : memref<2x7x22x128xf32, #tpu.memory_space<vmem>>, vector<1x1x22x128xf32>,
    %c1_181 = arith.constant 1 : index
    %c0_182 = arith.constant 0 : index
    %c0_183 = arith.constant 0 : index
    %c0_184 = arith.constant 0 : index
    %194 = vector.load %arg5[%c1_181, %c0_182, %c0_183, %c0_184] : memref<2x7x22x128xf32, #tpu.memory_space<vmem>>, vector<1x1x22x128xf32>
    %195 = vector.shape_cast %194 : vector<1x1x22x128xf32> to vector<22x128xf32>
    %c127_i32_185 = arith.constant 127 : i32
    %196 = tpu.dynamic_rotate %195 by %c127_i32_185 dim 1 : vector<22x128xf32>, i32 -> vector<22x128xf32>
    %c1_186 = arith.constant 1 : index
    %c1_187 = arith.constant 1 : index
    %c0_188 = arith.constant 0 : index
    %c0_189 = arith.constant 0 : index
    %197 = vector.load %arg5[%c1_186, %c1_187, %c0_188, %c0_189] : memref<2x7x22x128xf32, #tpu.memory_space<vmem>>, vector<1x1x22x128xf32>
    %198 = vector.shape_cast %197 : vector<1x1x22x128xf32> to vector<22x128xf32>
    %199 = vector.shape_cast %196 : vector<22x128xf32> to vector<1x1x22x128xf32>
    tpu.vector_store %arg5[%c1_186, %c1_187, %c0_188, %c0_189], %199 {strides = array<i32>} : memref<2x7x22x128xf32, #tpu.memory_space<vmem>>, vector<1x1x22x128xf32>,
    %c126_i32_190 = arith.constant 126 : i32
    %200 = tpu.dynamic_rotate %195 by %c126_i32_190 dim 1 : vector<22x128xf32>, i32 -> vector<22x128xf32>
    %c1_191 = arith.constant 1 : index
    %c2_192 = arith.constant 2 : index
    %c0_193 = arith.constant 0 : index
    %c0_194 = arith.constant 0 : index
    %201 = vector.load %arg5[%c1_191, %c2_192, %c0_193, %c0_194] : memref<2x7x22x128xf32, #tpu.memory_space<vmem>>, vector<1x1x22x128xf32>
    %202 = vector.shape_cast %201 : vector<1x1x22x128xf32> to vector<22x128xf32>
    %203 = vector.shape_cast %200 : vector<22x128xf32> to vector<1x1x22x128xf32>
    tpu.vector_store %arg5[%c1_191, %c2_192, %c0_193, %c0_194], %203 {strides = array<i32>} : memref<2x7x22x128xf32, #tpu.memory_space<vmem>>, vector<1x1x22x128xf32>,
    %c125_i32_195 = arith.constant 125 : i32
    %204 = tpu.dynamic_rotate %195 by %c125_i32_195 dim 1 : vector<22x128xf32>, i32 -> vector<22x128xf32>
    %c1_196 = arith.constant 1 : index
    %c3_197 = arith.constant 3 : index
    %c0_198 = arith.constant 0 : index
    %c0_199 = arith.constant 0 : index
    %205 = vector.load %arg5[%c1_196, %c3_197, %c0_198, %c0_199] : memref<2x7x22x128xf32, #tpu.memory_space<vmem>>, vector<1x1x22x128xf32>
    %206 = vector.shape_cast %205 : vector<1x1x22x128xf32> to vector<22x128xf32>
    %207 = vector.shape_cast %204 : vector<22x128xf32> to vector<1x1x22x128xf32>
    tpu.vector_store %arg5[%c1_196, %c3_197, %c0_198, %c0_199], %207 {strides = array<i32>} : memref<2x7x22x128xf32, #tpu.memory_space<vmem>>, vector<1x1x22x128xf32>,
    %c124_i32_200 = arith.constant 124 : i32
    %208 = tpu.dynamic_rotate %195 by %c124_i32_200 dim 1 : vector<22x128xf32>, i32 -> vector<22x128xf32>
    %c1_201 = arith.constant 1 : index
    %c4_202 = arith.constant 4 : index
    %c0_203 = arith.constant 0 : index
    %c0_204 = arith.constant 0 : index
    %209 = vector.load %arg5[%c1_201, %c4_202, %c0_203, %c0_204] : memref<2x7x22x128xf32, #tpu.memory_space<vmem>>, vector<1x1x22x128xf32>
    %210 = vector.shape_cast %209 : vector<1x1x22x128xf32> to vector<22x128xf32>
    %211 = vector.shape_cast %208 : vector<22x128xf32> to vector<1x1x22x128xf32>
    tpu.vector_store %arg5[%c1_201, %c4_202, %c0_203, %c0_204], %211 {strides = array<i32>} : memref<2x7x22x128xf32, #tpu.memory_space<vmem>>, vector<1x1x22x128xf32>,
    %c123_i32_205 = arith.constant 123 : i32
    %212 = tpu.dynamic_rotate %195 by %c123_i32_205 dim 1 : vector<22x128xf32>, i32 -> vector<22x128xf32>
    %c1_206 = arith.constant 1 : index
    %c5_207 = arith.constant 5 : index
    %c0_208 = arith.constant 0 : index
    %c0_209 = arith.constant 0 : index
    %213 = vector.load %arg5[%c1_206, %c5_207, %c0_208, %c0_209] : memref<2x7x22x128xf32, #tpu.memory_space<vmem>>, vector<1x1x22x128xf32>
    %214 = vector.shape_cast %213 : vector<1x1x22x128xf32> to vector<22x128xf32>
    %215 = vector.shape_cast %212 : vector<22x128xf32> to vector<1x1x22x128xf32>
    tpu.vector_store %arg5[%c1_206, %c5_207, %c0_208, %c0_209], %215 {strides = array<i32>} : memref<2x7x22x128xf32, #tpu.memory_space<vmem>>, vector<1x1x22x128xf32>,
    %c122_i32_210 = arith.constant 122 : i32
    %216 = tpu.dynamic_rotate %195 by %c122_i32_210 dim 1 : vector<22x128xf32>, i32 -> vector<22x128xf32>
    %c1_211 = arith.constant 1 : index
    %c6_212 = arith.constant 6 : index
    %c0_213 = arith.constant 0 : index
    %c0_214 = arith.constant 0 : index
    %217 = vector.load %arg5[%c1_211, %c6_212, %c0_213, %c0_214] : memref<2x7x22x128xf32, #tpu.memory_space<vmem>>, vector<1x1x22x128xf32>
    %218 = vector.shape_cast %217 : vector<1x1x22x128xf32> to vector<22x128xf32>
    %219 = vector.shape_cast %216 : vector<22x128xf32> to vector<1x1x22x128xf32>
    tpu.vector_store %arg5[%c1_211, %c6_212, %c0_213, %c0_214], %219 {strides = array<i32>} : memref<2x7x22x128xf32, #tpu.memory_space<vmem>>, vector<1x1x22x128xf32>,
    %cst_215 = arith.constant 0.000000e+00 : f32
    %220 = vector.broadcast %cst_215 : f32 to vector<16x128xf32>
    %c0_216 = arith.constant 0 : index
    %221 = memref.load %arg2[%c0_216] : memref<98xf32, #tpu.memory_space<smem>>
    %c0_217 = arith.constant 0 : index
    %c0_218 = arith.constant 0 : index
    %c0_219 = arith.constant 0 : index
    %c0_220 = arith.constant 0 : index
    %222 = vector.load %arg5[%c0_217, %c0_218, %c0_219, %c0_220] : memref<2x7x22x128xf32, #tpu.memory_space<vmem>>, vector<1x1x16x128xf32>
    %223 = vector.shape_cast %222 : vector<1x1x16x128xf32> to vector<16x128xf32>
    %224 = vector.broadcast %221 : f32 to vector<16x128xf32>
    %225 = arith.mulf %224, %223 : vector<16x128xf32>
    %226 = arith.addf %220, %225 : vector<16x128xf32>
    %c7_221 = arith.constant 7 : index
    %227 = memref.load %arg2[%c7_221] : memref<98xf32, #tpu.memory_space<smem>>
    %c0_222 = arith.constant 0 : index
    %c0_223 = arith.constant 0 : index
    %c1_224 = arith.constant 1 : index
    %c0_225 = arith.constant 0 : index
    %228 = vector.load %arg5[%c0_222, %c0_223, %c1_224, %c0_225] : memref<2x7x22x128xf32, #tpu.memory_space<vmem>>, vector<1x1x16x128xf32>
    %229 = vector.shape_cast %228 : vector<1x1x16x128xf32> to vector<16x128xf32>
    %230 = vector.broadcast %227 : f32 to vector<16x128xf32>
    %231 = arith.mulf %230, %229 : vector<16x128xf32>
    %232 = arith.addf %226, %231 : vector<16x128xf32>
    %c14_226 = arith.constant 14 : index
    %233 = memref.load %arg2[%c14_226] : memref<98xf32, #tpu.memory_space<smem>>
    %c0_227 = arith.constant 0 : index
    %c0_228 = arith.constant 0 : index
    %c2_229 = arith.constant 2 : index
    %c0_230 = arith.constant 0 : index
    %234 = vector.load %arg5[%c0_227, %c0_228, %c2_229, %c0_230] : memref<2x7x22x128xf32, #tpu.memory_space<vmem>>, vector<1x1x16x128xf32>
    %235 = vector.shape_cast %234 : vector<1x1x16x128xf32> to vector<16x128xf32>
    %236 = vector.broadcast %233 : f32 to vector<16x128xf32>
    %237 = arith.mulf %236, %235 : vector<16x128xf32>
    %238 = arith.addf %232, %237 : vector<16x128xf32>
    %c21 = arith.constant 21 : index
    %239 = memref.load %arg2[%c21] : memref<98xf32, #tpu.memory_space<smem>>
    %c0_231 = arith.constant 0 : index
    %c0_232 = arith.constant 0 : index
    %c3_233 = arith.constant 3 : index
    %c0_234 = arith.constant 0 : index
    %240 = vector.load %arg5[%c0_231, %c0_232, %c3_233, %c0_234] : memref<2x7x22x128xf32, #tpu.memory_space<vmem>>, vector<1x1x16x128xf32>
    %241 = vector.shape_cast %240 : vector<1x1x16x128xf32> to vector<16x128xf32>
    %242 = vector.broadcast %239 : f32 to vector<16x128xf32>
    %243 = arith.mulf %242, %241 : vector<16x128xf32>
    %244 = arith.addf %238, %243 : vector<16x128xf32>
    %c28 = arith.constant 28 : index
    %245 = memref.load %arg2[%c28] : memref<98xf32, #tpu.memory_space<smem>>
    %c0_235 = arith.constant 0 : index
    %c0_236 = arith.constant 0 : index
    %c4_237 = arith.constant 4 : index
    %c0_238 = arith.constant 0 : index
    %246 = vector.load %arg5[%c0_235, %c0_236, %c4_237, %c0_238] : memref<2x7x22x128xf32, #tpu.memory_space<vmem>>, vector<1x1x16x128xf32>
    %247 = vector.shape_cast %246 : vector<1x1x16x128xf32> to vector<16x128xf32>
    %248 = vector.broadcast %245 : f32 to vector<16x128xf32>
    %249 = arith.mulf %248, %247 : vector<16x128xf32>
    %250 = arith.addf %244, %249 : vector<16x128xf32>
    %c35 = arith.constant 35 : index
    %251 = memref.load %arg2[%c35] : memref<98xf32, #tpu.memory_space<smem>>
    %c0_239 = arith.constant 0 : index
    %c0_240 = arith.constant 0 : index
    %c5_241 = arith.constant 5 : index
    %c0_242 = arith.constant 0 : index
    %252 = vector.load %arg5[%c0_239, %c0_240, %c5_241, %c0_242] : memref<2x7x22x128xf32, #tpu.memory_space<vmem>>, vector<1x1x16x128xf32>
    %253 = vector.shape_cast %252 : vector<1x1x16x128xf32> to vector<16x128xf32>
    %254 = vector.broadcast %251 : f32 to vector<16x128xf32>
    %255 = arith.mulf %254, %253 : vector<16x128xf32>
    %256 = arith.addf %250, %255 : vector<16x128xf32>
    %c42 = arith.constant 42 : index
    %257 = memref.load %arg2[%c42] : memref<98xf32, #tpu.memory_space<smem>>
    %c0_243 = arith.constant 0 : index
    %c0_244 = arith.constant 0 : index
    %c6_245 = arith.constant 6 : index
    %c0_246 = arith.constant 0 : index
    %258 = vector.load %arg5[%c0_243, %c0_244, %c6_245, %c0_246] : memref<2x7x22x128xf32, #tpu.memory_space<vmem>>, vector<1x1x16x128xf32>
    %259 = vector.shape_cast %258 : vector<1x1x16x128xf32> to vector<16x128xf32>
    %260 = vector.broadcast %257 : f32 to vector<16x128xf32>
    %261 = arith.mulf %260, %259 : vector<16x128xf32>
    %262 = arith.addf %256, %261 : vector<16x128xf32>
    %c1_247 = arith.constant 1 : index
    %263 = memref.load %arg2[%c1_247] : memref<98xf32, #tpu.memory_space<smem>>
    %c0_248 = arith.constant 0 : index
    %c1_249 = arith.constant 1 : index
    %c0_250 = arith.constant 0 : index
    %c0_251 = arith.constant 0 : index
    %264 = vector.load %arg5[%c0_248, %c1_249, %c0_250, %c0_251] : memref<2x7x22x128xf32, #tpu.memory_space<vmem>>, vector<1x1x16x128xf32>
    %265 = vector.shape_cast %264 : vector<1x1x16x128xf32> to vector<16x128xf32>
    %266 = vector.broadcast %263 : f32 to vector<16x128xf32>
    %267 = arith.mulf %266, %265 : vector<16x128xf32>
    %268 = arith.addf %262, %267 : vector<16x128xf32>
    %c8_252 = arith.constant 8 : index
    %269 = memref.load %arg2[%c8_252] : memref<98xf32, #tpu.memory_space<smem>>
    %c0_253 = arith.constant 0 : index
    %c1_254 = arith.constant 1 : index
    %c1_255 = arith.constant 1 : index
    %c0_256 = arith.constant 0 : index
    %270 = vector.load %arg5[%c0_253, %c1_254, %c1_255, %c0_256] : memref<2x7x22x128xf32, #tpu.memory_space<vmem>>, vector<1x1x16x128xf32>
    %271 = vector.shape_cast %270 : vector<1x1x16x128xf32> to vector<16x128xf32>
    %272 = vector.broadcast %269 : f32 to vector<16x128xf32>
    %273 = arith.mulf %272, %271 : vector<16x128xf32>
    %274 = arith.addf %268, %273 : vector<16x128xf32>
    %c15_257 = arith.constant 15 : index
    %275 = memref.load %arg2[%c15_257] : memref<98xf32, #tpu.memory_space<smem>>
    %c0_258 = arith.constant 0 : index
    %c1_259 = arith.constant 1 : index
    %c2_260 = arith.constant 2 : index
    %c0_261 = arith.constant 0 : index
    %276 = vector.load %arg5[%c0_258, %c1_259, %c2_260, %c0_261] : memref<2x7x22x128xf32, #tpu.memory_space<vmem>>, vector<1x1x16x128xf32>
    %277 = vector.shape_cast %276 : vector<1x1x16x128xf32> to vector<16x128xf32>
    %278 = vector.broadcast %275 : f32 to vector<16x128xf32>
    %279 = arith.mulf %278, %277 : vector<16x128xf32>
    %280 = arith.addf %274, %279 : vector<16x128xf32>
    %c22 = arith.constant 22 : index
    %281 = memref.load %arg2[%c22] : memref<98xf32, #tpu.memory_space<smem>>
    %c0_262 = arith.constant 0 : index
    %c1_263 = arith.constant 1 : index
    %c3_264 = arith.constant 3 : index
    %c0_265 = arith.constant 0 : index
    %282 = vector.load %arg5[%c0_262, %c1_263, %c3_264, %c0_265] : memref<2x7x22x128xf32, #tpu.memory_space<vmem>>, vector<1x1x16x128xf32>
    %283 = vector.shape_cast %282 : vector<1x1x16x128xf32> to vector<16x128xf32>
    %284 = vector.broadcast %281 : f32 to vector<16x128xf32>
    %285 = arith.mulf %284, %283 : vector<16x128xf32>
    %286 = arith.addf %280, %285 : vector<16x128xf32>
    %c29 = arith.constant 29 : index
    %287 = memref.load %arg2[%c29] : memref<98xf32, #tpu.memory_space<smem>>
    %c0_266 = arith.constant 0 : index
    %c1_267 = arith.constant 1 : index
    %c4_268 = arith.constant 4 : index
    %c0_269 = arith.constant 0 : index
    %288 = vector.load %arg5[%c0_266, %c1_267, %c4_268, %c0_269] : memref<2x7x22x128xf32, #tpu.memory_space<vmem>>, vector<1x1x16x128xf32>
    %289 = vector.shape_cast %288 : vector<1x1x16x128xf32> to vector<16x128xf32>
    %290 = vector.broadcast %287 : f32 to vector<16x128xf32>
    %291 = arith.mulf %290, %289 : vector<16x128xf32>
    %292 = arith.addf %286, %291 : vector<16x128xf32>
    %c36 = arith.constant 36 : index
    %293 = memref.load %arg2[%c36] : memref<98xf32, #tpu.memory_space<smem>>
    %c0_270 = arith.constant 0 : index
    %c1_271 = arith.constant 1 : index
    %c5_272 = arith.constant 5 : index
    %c0_273 = arith.constant 0 : index
    %294 = vector.load %arg5[%c0_270, %c1_271, %c5_272, %c0_273] : memref<2x7x22x128xf32, #tpu.memory_space<vmem>>, vector<1x1x16x128xf32>
    %295 = vector.shape_cast %294 : vector<1x1x16x128xf32> to vector<16x128xf32>
    %296 = vector.broadcast %293 : f32 to vector<16x128xf32>
    %297 = arith.mulf %296, %295 : vector<16x128xf32>
    %298 = arith.addf %292, %297 : vector<16x128xf32>
    %c43 = arith.constant 43 : index
    %299 = memref.load %arg2[%c43] : memref<98xf32, #tpu.memory_space<smem>>
    %c0_274 = arith.constant 0 : index
    %c1_275 = arith.constant 1 : index
    %c6_276 = arith.constant 6 : index
    %c0_277 = arith.constant 0 : index
    %300 = vector.load %arg5[%c0_274, %c1_275, %c6_276, %c0_277] : memref<2x7x22x128xf32, #tpu.memory_space<vmem>>, vector<1x1x16x128xf32>
    %301 = vector.shape_cast %300 : vector<1x1x16x128xf32> to vector<16x128xf32>
    %302 = vector.broadcast %299 : f32 to vector<16x128xf32>
    %303 = arith.mulf %302, %301 : vector<16x128xf32>
    %304 = arith.addf %298, %303 : vector<16x128xf32>
    %c2_278 = arith.constant 2 : index
    %305 = memref.load %arg2[%c2_278] : memref<98xf32, #tpu.memory_space<smem>>
    %c0_279 = arith.constant 0 : index
    %c2_280 = arith.constant 2 : index
    %c0_281 = arith.constant 0 : index
    %c0_282 = arith.constant 0 : index
    %306 = vector.load %arg5[%c0_279, %c2_280, %c0_281, %c0_282] : memref<2x7x22x128xf32, #tpu.memory_space<vmem>>, vector<1x1x16x128xf32>
    %307 = vector.shape_cast %306 : vector<1x1x16x128xf32> to vector<16x128xf32>
    %308 = vector.broadcast %305 : f32 to vector<16x128xf32>
    %309 = arith.mulf %308, %307 : vector<16x128xf32>
    %310 = arith.addf %304, %309 : vector<16x128xf32>
    %c9_283 = arith.constant 9 : index
    %311 = memref.load %arg2[%c9_283] : memref<98xf32, #tpu.memory_space<smem>>
    %c0_284 = arith.constant 0 : index
    %c2_285 = arith.constant 2 : index
    %c1_286 = arith.constant 1 : index
    %c0_287 = arith.constant 0 : index
    %312 = vector.load %arg5[%c0_284, %c2_285, %c1_286, %c0_287] : memref<2x7x22x128xf32, #tpu.memory_space<vmem>>, vector<1x1x16x128xf32>
    %313 = vector.shape_cast %312 : vector<1x1x16x128xf32> to vector<16x128xf32>
    %314 = vector.broadcast %311 : f32 to vector<16x128xf32>
    %315 = arith.mulf %314, %313 : vector<16x128xf32>
    %316 = arith.addf %310, %315 : vector<16x128xf32>
    %c16_288 = arith.constant 16 : index
    %317 = memref.load %arg2[%c16_288] : memref<98xf32, #tpu.memory_space<smem>>
    %c0_289 = arith.constant 0 : index
    %c2_290 = arith.constant 2 : index
    %c2_291 = arith.constant 2 : index
    %c0_292 = arith.constant 0 : index
    %318 = vector.load %arg5[%c0_289, %c2_290, %c2_291, %c0_292] : memref<2x7x22x128xf32, #tpu.memory_space<vmem>>, vector<1x1x16x128xf32>
    %319 = vector.shape_cast %318 : vector<1x1x16x128xf32> to vector<16x128xf32>
    %320 = vector.broadcast %317 : f32 to vector<16x128xf32>
    %321 = arith.mulf %320, %319 : vector<16x128xf32>
    %322 = arith.addf %316, %321 : vector<16x128xf32>
    %c23 = arith.constant 23 : index
    %323 = memref.load %arg2[%c23] : memref<98xf32, #tpu.memory_space<smem>>
    %c0_293 = arith.constant 0 : index
    %c2_294 = arith.constant 2 : index
    %c3_295 = arith.constant 3 : index
    %c0_296 = arith.constant 0 : index
    %324 = vector.load %arg5[%c0_293, %c2_294, %c3_295, %c0_296] : memref<2x7x22x128xf32, #tpu.memory_space<vmem>>, vector<1x1x16x128xf32>
    %325 = vector.shape_cast %324 : vector<1x1x16x128xf32> to vector<16x128xf32>
    %326 = vector.broadcast %323 : f32 to vector<16x128xf32>
    %327 = arith.mulf %326, %325 : vector<16x128xf32>
    %328 = arith.addf %322, %327 : vector<16x128xf32>
    %c30 = arith.constant 30 : index
    %329 = memref.load %arg2[%c30] : memref<98xf32, #tpu.memory_space<smem>>
    %c0_297 = arith.constant 0 : index
    %c2_298 = arith.constant 2 : index
    %c4_299 = arith.constant 4 : index
    %c0_300 = arith.constant 0 : index
    %330 = vector.load %arg5[%c0_297, %c2_298, %c4_299, %c0_300] : memref<2x7x22x128xf32, #tpu.memory_space<vmem>>, vector<1x1x16x128xf32>
    %331 = vector.shape_cast %330 : vector<1x1x16x128xf32> to vector<16x128xf32>
    %332 = vector.broadcast %329 : f32 to vector<16x128xf32>
    %333 = arith.mulf %332, %331 : vector<16x128xf32>
    %334 = arith.addf %328, %333 : vector<16x128xf32>
    %c37 = arith.constant 37 : index
    %335 = memref.load %arg2[%c37] : memref<98xf32, #tpu.memory_space<smem>>
    %c0_301 = arith.constant 0 : index
    %c2_302 = arith.constant 2 : index
    %c5_303 = arith.constant 5 : index
    %c0_304 = arith.constant 0 : index
    %336 = vector.load %arg5[%c0_301, %c2_302, %c5_303, %c0_304] : memref<2x7x22x128xf32, #tpu.memory_space<vmem>>, vector<1x1x16x128xf32>
    %337 = vector.shape_cast %336 : vector<1x1x16x128xf32> to vector<16x128xf32>
    %338 = vector.broadcast %335 : f32 to vector<16x128xf32>
    %339 = arith.mulf %338, %337 : vector<16x128xf32>
    %340 = arith.addf %334, %339 : vector<16x128xf32>
    %c44 = arith.constant 44 : index
    %341 = memref.load %arg2[%c44] : memref<98xf32, #tpu.memory_space<smem>>
    %c0_305 = arith.constant 0 : index
    %c2_306 = arith.constant 2 : index
    %c6_307 = arith.constant 6 : index
    %c0_308 = arith.constant 0 : index
    %342 = vector.load %arg5[%c0_305, %c2_306, %c6_307, %c0_308] : memref<2x7x22x128xf32, #tpu.memory_space<vmem>>, vector<1x1x16x128xf32>
    %343 = vector.shape_cast %342 : vector<1x1x16x128xf32> to vector<16x128xf32>
    %344 = vector.broadcast %341 : f32 to vector<16x128xf32>
    %345 = arith.mulf %344, %343 : vector<16x128xf32>
    %346 = arith.addf %340, %345 : vector<16x128xf32>
    %c3_309 = arith.constant 3 : index
    %347 = memref.load %arg2[%c3_309] : memref<98xf32, #tpu.memory_space<smem>>
    %c0_310 = arith.constant 0 : index
    %c3_311 = arith.constant 3 : index
    %c0_312 = arith.constant 0 : index
    %c0_313 = arith.constant 0 : index
    %348 = vector.load %arg5[%c0_310, %c3_311, %c0_312, %c0_313] : memref<2x7x22x128xf32, #tpu.memory_space<vmem>>, vector<1x1x16x128xf32>
    %349 = vector.shape_cast %348 : vector<1x1x16x128xf32> to vector<16x128xf32>
    %350 = vector.broadcast %347 : f32 to vector<16x128xf32>
    %351 = arith.mulf %350, %349 : vector<16x128xf32>
    %352 = arith.addf %346, %351 : vector<16x128xf32>
    %c10_314 = arith.constant 10 : index
    %353 = memref.load %arg2[%c10_314] : memref<98xf32, #tpu.memory_space<smem>>
    %c0_315 = arith.constant 0 : index
    %c3_316 = arith.constant 3 : index
    %c1_317 = arith.constant 1 : index
    %c0_318 = arith.constant 0 : index
    %354 = vector.load %arg5[%c0_315, %c3_316, %c1_317, %c0_318] : memref<2x7x22x128xf32, #tpu.memory_space<vmem>>, vector<1x1x16x128xf32>
    %355 = vector.shape_cast %354 : vector<1x1x16x128xf32> to vector<16x128xf32>
    %356 = vector.broadcast %353 : f32 to vector<16x128xf32>
    %357 = arith.mulf %356, %355 : vector<16x128xf32>
    %358 = arith.addf %352, %357 : vector<16x128xf32>
    %c17_319 = arith.constant 17 : index
    %359 = memref.load %arg2[%c17_319] : memref<98xf32, #tpu.memory_space<smem>>
    %c0_320 = arith.constant 0 : index
    %c3_321 = arith.constant 3 : index
    %c2_322 = arith.constant 2 : index
    %c0_323 = arith.constant 0 : index
    %360 = vector.load %arg5[%c0_320, %c3_321, %c2_322, %c0_323] : memref<2x7x22x128xf32, #tpu.memory_space<vmem>>, vector<1x1x16x128xf32>
    %361 = vector.shape_cast %360 : vector<1x1x16x128xf32> to vector<16x128xf32>
    %362 = vector.broadcast %359 : f32 to vector<16x128xf32>
    %363 = arith.mulf %362, %361 : vector<16x128xf32>
    %364 = arith.addf %358, %363 : vector<16x128xf32>
    %c24 = arith.constant 24 : index
    %365 = memref.load %arg2[%c24] : memref<98xf32, #tpu.memory_space<smem>>
    %c0_324 = arith.constant 0 : index
    %c3_325 = arith.constant 3 : index
    %c3_326 = arith.constant 3 : index
    %c0_327 = arith.constant 0 : index
    %366 = vector.load %arg5[%c0_324, %c3_325, %c3_326, %c0_327] : memref<2x7x22x128xf32, #tpu.memory_space<vmem>>, vector<1x1x16x128xf32>
    %367 = vector.shape_cast %366 : vector<1x1x16x128xf32> to vector<16x128xf32>
    %368 = vector.broadcast %365 : f32 to vector<16x128xf32>
    %369 = arith.mulf %368, %367 : vector<16x128xf32>
    %370 = arith.addf %364, %369 : vector<16x128xf32>
    %c31 = arith.constant 31 : index
    %371 = memref.load %arg2[%c31] : memref<98xf32, #tpu.memory_space<smem>>
    %c0_328 = arith.constant 0 : index
    %c3_329 = arith.constant 3 : index
    %c4_330 = arith.constant 4 : index
    %c0_331 = arith.constant 0 : index
    %372 = vector.load %arg5[%c0_328, %c3_329, %c4_330, %c0_331] : memref<2x7x22x128xf32, #tpu.memory_space<vmem>>, vector<1x1x16x128xf32>
    %373 = vector.shape_cast %372 : vector<1x1x16x128xf32> to vector<16x128xf32>
    %374 = vector.broadcast %371 : f32 to vector<16x128xf32>
    %375 = arith.mulf %374, %373 : vector<16x128xf32>
    %376 = arith.addf %370, %375 : vector<16x128xf32>
    %c38 = arith.constant 38 : index
    %377 = memref.load %arg2[%c38] : memref<98xf32, #tpu.memory_space<smem>>
    %c0_332 = arith.constant 0 : index
    %c3_333 = arith.constant 3 : index
    %c5_334 = arith.constant 5 : index
    %c0_335 = arith.constant 0 : index
    %378 = vector.load %arg5[%c0_332, %c3_333, %c5_334, %c0_335] : memref<2x7x22x128xf32, #tpu.memory_space<vmem>>, vector<1x1x16x128xf32>
    %379 = vector.shape_cast %378 : vector<1x1x16x128xf32> to vector<16x128xf32>
    %380 = vector.broadcast %377 : f32 to vector<16x128xf32>
    %381 = arith.mulf %380, %379 : vector<16x128xf32>
    %382 = arith.addf %376, %381 : vector<16x128xf32>
    %c45 = arith.constant 45 : index
    %383 = memref.load %arg2[%c45] : memref<98xf32, #tpu.memory_space<smem>>
    %c0_336 = arith.constant 0 : index
    %c3_337 = arith.constant 3 : index
    %c6_338 = arith.constant 6 : index
    %c0_339 = arith.constant 0 : index
    %384 = vector.load %arg5[%c0_336, %c3_337, %c6_338, %c0_339] : memref<2x7x22x128xf32, #tpu.memory_space<vmem>>, vector<1x1x16x128xf32>
    %385 = vector.shape_cast %384 : vector<1x1x16x128xf32> to vector<16x128xf32>
    %386 = vector.broadcast %383 : f32 to vector<16x128xf32>
    %387 = arith.mulf %386, %385 : vector<16x128xf32>
    %388 = arith.addf %382, %387 : vector<16x128xf32>
    %c4_340 = arith.constant 4 : index
    %389 = memref.load %arg2[%c4_340] : memref<98xf32, #tpu.memory_space<smem>>
    %c0_341 = arith.constant 0 : index
    %c4_342 = arith.constant 4 : index
    %c0_343 = arith.constant 0 : index
    %c0_344 = arith.constant 0 : index
    %390 = vector.load %arg5[%c0_341, %c4_342, %c0_343, %c0_344] : memref<2x7x22x128xf32, #tpu.memory_space<vmem>>, vector<1x1x16x128xf32>
    %391 = vector.shape_cast %390 : vector<1x1x16x128xf32> to vector<16x128xf32>
    %392 = vector.broadcast %389 : f32 to vector<16x128xf32>
    %393 = arith.mulf %392, %391 : vector<16x128xf32>
    %394 = arith.addf %388, %393 : vector<16x128xf32>
    %c11_345 = arith.constant 11 : index
    %395 = memref.load %arg2[%c11_345] : memref<98xf32, #tpu.memory_space<smem>>
    %c0_346 = arith.constant 0 : index
    %c4_347 = arith.constant 4 : index
    %c1_348 = arith.constant 1 : index
    %c0_349 = arith.constant 0 : index
    %396 = vector.load %arg5[%c0_346, %c4_347, %c1_348, %c0_349] : memref<2x7x22x128xf32, #tpu.memory_space<vmem>>, vector<1x1x16x128xf32>
    %397 = vector.shape_cast %396 : vector<1x1x16x128xf32> to vector<16x128xf32>
    %398 = vector.broadcast %395 : f32 to vector<16x128xf32>
    %399 = arith.mulf %398, %397 : vector<16x128xf32>
    %400 = arith.addf %394, %399 : vector<16x128xf32>
    %c18_350 = arith.constant 18 : index
    %401 = memref.load %arg2[%c18_350] : memref<98xf32, #tpu.memory_space<smem>>
    %c0_351 = arith.constant 0 : index
    %c4_352 = arith.constant 4 : index
    %c2_353 = arith.constant 2 : index
    %c0_354 = arith.constant 0 : index
    %402 = vector.load %arg5[%c0_351, %c4_352, %c2_353, %c0_354] : memref<2x7x22x128xf32, #tpu.memory_space<vmem>>, vector<1x1x16x128xf32>
    %403 = vector.shape_cast %402 : vector<1x1x16x128xf32> to vector<16x128xf32>
    %404 = vector.broadcast %401 : f32 to vector<16x128xf32>
    %405 = arith.mulf %404, %403 : vector<16x128xf32>
    %406 = arith.addf %400, %405 : vector<16x128xf32>
    %c25 = arith.constant 25 : index
    %407 = memref.load %arg2[%c25] : memref<98xf32, #tpu.memory_space<smem>>
    %c0_355 = arith.constant 0 : index
    %c4_356 = arith.constant 4 : index
    %c3_357 = arith.constant 3 : index
    %c0_358 = arith.constant 0 : index
    %408 = vector.load %arg5[%c0_355, %c4_356, %c3_357, %c0_358] : memref<2x7x22x128xf32, #tpu.memory_space<vmem>>, vector<1x1x16x128xf32>
    %409 = vector.shape_cast %408 : vector<1x1x16x128xf32> to vector<16x128xf32>
    %410 = vector.broadcast %407 : f32 to vector<16x128xf32>
    %411 = arith.mulf %410, %409 : vector<16x128xf32>
    %412 = arith.addf %406, %411 : vector<16x128xf32>
    %c32 = arith.constant 32 : index
    %413 = memref.load %arg2[%c32] : memref<98xf32, #tpu.memory_space<smem>>
    %c0_359 = arith.constant 0 : index
    %c4_360 = arith.constant 4 : index
    %c4_361 = arith.constant 4 : index
    %c0_362 = arith.constant 0 : index
    %414 = vector.load %arg5[%c0_359, %c4_360, %c4_361, %c0_362] : memref<2x7x22x128xf32, #tpu.memory_space<vmem>>, vector<1x1x16x128xf32>
    %415 = vector.shape_cast %414 : vector<1x1x16x128xf32> to vector<16x128xf32>
    %416 = vector.broadcast %413 : f32 to vector<16x128xf32>
    %417 = arith.mulf %416, %415 : vector<16x128xf32>
    %418 = arith.addf %412, %417 : vector<16x128xf32>
    %c39 = arith.constant 39 : index
    %419 = memref.load %arg2[%c39] : memref<98xf32, #tpu.memory_space<smem>>
    %c0_363 = arith.constant 0 : index
    %c4_364 = arith.constant 4 : index
    %c5_365 = arith.constant 5 : index
    %c0_366 = arith.constant 0 : index
    %420 = vector.load %arg5[%c0_363, %c4_364, %c5_365, %c0_366] : memref<2x7x22x128xf32, #tpu.memory_space<vmem>>, vector<1x1x16x128xf32>
    %421 = vector.shape_cast %420 : vector<1x1x16x128xf32> to vector<16x128xf32>
    %422 = vector.broadcast %419 : f32 to vector<16x128xf32>
    %423 = arith.mulf %422, %421 : vector<16x128xf32>
    %424 = arith.addf %418, %423 : vector<16x128xf32>
    %c46 = arith.constant 46 : index
    %425 = memref.load %arg2[%c46] : memref<98xf32, #tpu.memory_space<smem>>
    %c0_367 = arith.constant 0 : index
    %c4_368 = arith.constant 4 : index
    %c6_369 = arith.constant 6 : index
    %c0_370 = arith.constant 0 : index
    %426 = vector.load %arg5[%c0_367, %c4_368, %c6_369, %c0_370] : memref<2x7x22x128xf32, #tpu.memory_space<vmem>>, vector<1x1x16x128xf32>
    %427 = vector.shape_cast %426 : vector<1x1x16x128xf32> to vector<16x128xf32>
    %428 = vector.broadcast %425 : f32 to vector<16x128xf32>
    %429 = arith.mulf %428, %427 : vector<16x128xf32>
    %430 = arith.addf %424, %429 : vector<16x128xf32>
    %c5_371 = arith.constant 5 : index
    %431 = memref.load %arg2[%c5_371] : memref<98xf32, #tpu.memory_space<smem>>
    %c0_372 = arith.constant 0 : index
    %c5_373 = arith.constant 5 : index
    %c0_374 = arith.constant 0 : index
    %c0_375 = arith.constant 0 : index
    %432 = vector.load %arg5[%c0_372, %c5_373, %c0_374, %c0_375] : memref<2x7x22x128xf32, #tpu.memory_space<vmem>>, vector<1x1x16x128xf32>
    %433 = vector.shape_cast %432 : vector<1x1x16x128xf32> to vector<16x128xf32>
    %434 = vector.broadcast %431 : f32 to vector<16x128xf32>
    %435 = arith.mulf %434, %433 : vector<16x128xf32>
    %436 = arith.addf %430, %435 : vector<16x128xf32>
    %c12_376 = arith.constant 12 : index
    %437 = memref.load %arg2[%c12_376] : memref<98xf32, #tpu.memory_space<smem>>
    %c0_377 = arith.constant 0 : index
    %c5_378 = arith.constant 5 : index
    %c1_379 = arith.constant 1 : index
    %c0_380 = arith.constant 0 : index
    %438 = vector.load %arg5[%c0_377, %c5_378, %c1_379, %c0_380] : memref<2x7x22x128xf32, #tpu.memory_space<vmem>>, vector<1x1x16x128xf32>
    %439 = vector.shape_cast %438 : vector<1x1x16x128xf32> to vector<16x128xf32>
    %440 = vector.broadcast %437 : f32 to vector<16x128xf32>
    %441 = arith.mulf %440, %439 : vector<16x128xf32>
    %442 = arith.addf %436, %441 : vector<16x128xf32>
    %c19_381 = arith.constant 19 : index
    %443 = memref.load %arg2[%c19_381] : memref<98xf32, #tpu.memory_space<smem>>
    %c0_382 = arith.constant 0 : index
    %c5_383 = arith.constant 5 : index
    %c2_384 = arith.constant 2 : index
    %c0_385 = arith.constant 0 : index
    %444 = vector.load %arg5[%c0_382, %c5_383, %c2_384, %c0_385] : memref<2x7x22x128xf32, #tpu.memory_space<vmem>>, vector<1x1x16x128xf32>
    %445 = vector.shape_cast %444 : vector<1x1x16x128xf32> to vector<16x128xf32>
    %446 = vector.broadcast %443 : f32 to vector<16x128xf32>
    %447 = arith.mulf %446, %445 : vector<16x128xf32>
    %448 = arith.addf %442, %447 : vector<16x128xf32>
    %c26 = arith.constant 26 : index
    %449 = memref.load %arg2[%c26] : memref<98xf32, #tpu.memory_space<smem>>
    %c0_386 = arith.constant 0 : index
    %c5_387 = arith.constant 5 : index
    %c3_388 = arith.constant 3 : index
    %c0_389 = arith.constant 0 : index
    %450 = vector.load %arg5[%c0_386, %c5_387, %c3_388, %c0_389] : memref<2x7x22x128xf32, #tpu.memory_space<vmem>>, vector<1x1x16x128xf32>
    %451 = vector.shape_cast %450 : vector<1x1x16x128xf32> to vector<16x128xf32>
    %452 = vector.broadcast %449 : f32 to vector<16x128xf32>
    %453 = arith.mulf %452, %451 : vector<16x128xf32>
    %454 = arith.addf %448, %453 : vector<16x128xf32>
    %c33 = arith.constant 33 : index
    %455 = memref.load %arg2[%c33] : memref<98xf32, #tpu.memory_space<smem>>
    %c0_390 = arith.constant 0 : index
    %c5_391 = arith.constant 5 : index
    %c4_392 = arith.constant 4 : index
    %c0_393 = arith.constant 0 : index
    %456 = vector.load %arg5[%c0_390, %c5_391, %c4_392, %c0_393] : memref<2x7x22x128xf32, #tpu.memory_space<vmem>>, vector<1x1x16x128xf32>
    %457 = vector.shape_cast %456 : vector<1x1x16x128xf32> to vector<16x128xf32>
    %458 = vector.broadcast %455 : f32 to vector<16x128xf32>
    %459 = arith.mulf %458, %457 : vector<16x128xf32>
    %460 = arith.addf %454, %459 : vector<16x128xf32>
    %c40 = arith.constant 40 : index
    %461 = memref.load %arg2[%c40] : memref<98xf32, #tpu.memory_space<smem>>
    %c0_394 = arith.constant 0 : index
    %c5_395 = arith.constant 5 : index
    %c5_396 = arith.constant 5 : index
    %c0_397 = arith.constant 0 : index
    %462 = vector.load %arg5[%c0_394, %c5_395, %c5_396, %c0_397] : memref<2x7x22x128xf32, #tpu.memory_space<vmem>>, vector<1x1x16x128xf32>
    %463 = vector.shape_cast %462 : vector<1x1x16x128xf32> to vector<16x128xf32>
    %464 = vector.broadcast %461 : f32 to vector<16x128xf32>
    %465 = arith.mulf %464, %463 : vector<16x128xf32>
    %466 = arith.addf %460, %465 : vector<16x128xf32>
    %c47 = arith.constant 47 : index
    %467 = memref.load %arg2[%c47] : memref<98xf32, #tpu.memory_space<smem>>
    %c0_398 = arith.constant 0 : index
    %c5_399 = arith.constant 5 : index
    %c6_400 = arith.constant 6 : index
    %c0_401 = arith.constant 0 : index
    %468 = vector.load %arg5[%c0_398, %c5_399, %c6_400, %c0_401] : memref<2x7x22x128xf32, #tpu.memory_space<vmem>>, vector<1x1x16x128xf32>
    %469 = vector.shape_cast %468 : vector<1x1x16x128xf32> to vector<16x128xf32>
    %470 = vector.broadcast %467 : f32 to vector<16x128xf32>
    %471 = arith.mulf %470, %469 : vector<16x128xf32>
    %472 = arith.addf %466, %471 : vector<16x128xf32>
    %c6_402 = arith.constant 6 : index
    %473 = memref.load %arg2[%c6_402] : memref<98xf32, #tpu.memory_space<smem>>
    %c0_403 = arith.constant 0 : index
    %c6_404 = arith.constant 6 : index
    %c0_405 = arith.constant 0 : index
    %c0_406 = arith.constant 0 : index
    %474 = vector.load %arg5[%c0_403, %c6_404, %c0_405, %c0_406] : memref<2x7x22x128xf32, #tpu.memory_space<vmem>>, vector<1x1x16x128xf32>
    %475 = vector.shape_cast %474 : vector<1x1x16x128xf32> to vector<16x128xf32>
    %476 = vector.broadcast %473 : f32 to vector<16x128xf32>
    %477 = arith.mulf %476, %475 : vector<16x128xf32>
    %478 = arith.addf %472, %477 : vector<16x128xf32>
    %c13_407 = arith.constant 13 : index
    %479 = memref.load %arg2[%c13_407] : memref<98xf32, #tpu.memory_space<smem>>
    %c0_408 = arith.constant 0 : index
    %c6_409 = arith.constant 6 : index
    %c1_410 = arith.constant 1 : index
    %c0_411 = arith.constant 0 : index
    %480 = vector.load %arg5[%c0_408, %c6_409, %c1_410, %c0_411] : memref<2x7x22x128xf32, #tpu.memory_space<vmem>>, vector<1x1x16x128xf32>
    %481 = vector.shape_cast %480 : vector<1x1x16x128xf32> to vector<16x128xf32>
    %482 = vector.broadcast %479 : f32 to vector<16x128xf32>
    %483 = arith.mulf %482, %481 : vector<16x128xf32>
    %484 = arith.addf %478, %483 : vector<16x128xf32>
    %c20 = arith.constant 20 : index
    %485 = memref.load %arg2[%c20] : memref<98xf32, #tpu.memory_space<smem>>
    %c0_412 = arith.constant 0 : index
    %c6_413 = arith.constant 6 : index
    %c2_414 = arith.constant 2 : index
    %c0_415 = arith.constant 0 : index
    %486 = vector.load %arg5[%c0_412, %c6_413, %c2_414, %c0_415] : memref<2x7x22x128xf32, #tpu.memory_space<vmem>>, vector<1x1x16x128xf32>
    %487 = vector.shape_cast %486 : vector<1x1x16x128xf32> to vector<16x128xf32>
    %488 = vector.broadcast %485 : f32 to vector<16x128xf32>
    %489 = arith.mulf %488, %487 : vector<16x128xf32>
    %490 = arith.addf %484, %489 : vector<16x128xf32>
    %c27 = arith.constant 27 : index
    %491 = memref.load %arg2[%c27] : memref<98xf32, #tpu.memory_space<smem>>
    %c0_416 = arith.constant 0 : index
    %c6_417 = arith.constant 6 : index
    %c3_418 = arith.constant 3 : index
    %c0_419 = arith.constant 0 : index
    %492 = vector.load %arg5[%c0_416, %c6_417, %c3_418, %c0_419] : memref<2x7x22x128xf32, #tpu.memory_space<vmem>>, vector<1x1x16x128xf32>
    %493 = vector.shape_cast %492 : vector<1x1x16x128xf32> to vector<16x128xf32>
    %494 = vector.broadcast %491 : f32 to vector<16x128xf32>
    %495 = arith.mulf %494, %493 : vector<16x128xf32>
    %496 = arith.addf %490, %495 : vector<16x128xf32>
    %c34 = arith.constant 34 : index
    %497 = memref.load %arg2[%c34] : memref<98xf32, #tpu.memory_space<smem>>
    %c0_420 = arith.constant 0 : index
    %c6_421 = arith.constant 6 : index
    %c4_422 = arith.constant 4 : index
    %c0_423 = arith.constant 0 : index
    %498 = vector.load %arg5[%c0_420, %c6_421, %c4_422, %c0_423] : memref<2x7x22x128xf32, #tpu.memory_space<vmem>>, vector<1x1x16x128xf32>
    %499 = vector.shape_cast %498 : vector<1x1x16x128xf32> to vector<16x128xf32>
    %500 = vector.broadcast %497 : f32 to vector<16x128xf32>
    %501 = arith.mulf %500, %499 : vector<16x128xf32>
    %502 = arith.addf %496, %501 : vector<16x128xf32>
    %c41 = arith.constant 41 : index
    %503 = memref.load %arg2[%c41] : memref<98xf32, #tpu.memory_space<smem>>
    %c0_424 = arith.constant 0 : index
    %c6_425 = arith.constant 6 : index
    %c5_426 = arith.constant 5 : index
    %c0_427 = arith.constant 0 : index
    %504 = vector.load %arg5[%c0_424, %c6_425, %c5_426, %c0_427] : memref<2x7x22x128xf32, #tpu.memory_space<vmem>>, vector<1x1x16x128xf32>
    %505 = vector.shape_cast %504 : vector<1x1x16x128xf32> to vector<16x128xf32>
    %506 = vector.broadcast %503 : f32 to vector<16x128xf32>
    %507 = arith.mulf %506, %505 : vector<16x128xf32>
    %508 = arith.addf %502, %507 : vector<16x128xf32>
    %c48 = arith.constant 48 : index
    %509 = memref.load %arg2[%c48] : memref<98xf32, #tpu.memory_space<smem>>
    %c0_428 = arith.constant 0 : index
    %c6_429 = arith.constant 6 : index
    %c6_430 = arith.constant 6 : index
    %c0_431 = arith.constant 0 : index
    %510 = vector.load %arg5[%c0_428, %c6_429, %c6_430, %c0_431] : memref<2x7x22x128xf32, #tpu.memory_space<vmem>>, vector<1x1x16x128xf32>
    %511 = vector.shape_cast %510 : vector<1x1x16x128xf32> to vector<16x128xf32>
    %512 = vector.broadcast %509 : f32 to vector<16x128xf32>
    %513 = arith.mulf %512, %511 : vector<16x128xf32>
    %514 = arith.addf %508, %513 : vector<16x128xf32>
    %c49 = arith.constant 49 : index
    %515 = memref.load %arg2[%c49] : memref<98xf32, #tpu.memory_space<smem>>
    %c1_432 = arith.constant 1 : index
    %c0_433 = arith.constant 0 : index
    %c0_434 = arith.constant 0 : index
    %c0_435 = arith.constant 0 : index
    %516 = vector.load %arg5[%c1_432, %c0_433, %c0_434, %c0_435] : memref<2x7x22x128xf32, #tpu.memory_space<vmem>>, vector<1x1x16x128xf32>
    %517 = vector.shape_cast %516 : vector<1x1x16x128xf32> to vector<16x128xf32>
    %518 = vector.broadcast %515 : f32 to vector<16x128xf32>
    %519 = arith.mulf %518, %517 : vector<16x128xf32>
    %520 = arith.addf %514, %519 : vector<16x128xf32>
    %c56 = arith.constant 56 : index
    %521 = memref.load %arg2[%c56] : memref<98xf32, #tpu.memory_space<smem>>
    %c1_436 = arith.constant 1 : index
    %c0_437 = arith.constant 0 : index
    %c1_438 = arith.constant 1 : index
    %c0_439 = arith.constant 0 : index
    %522 = vector.load %arg5[%c1_436, %c0_437, %c1_438, %c0_439] : memref<2x7x22x128xf32, #tpu.memory_space<vmem>>, vector<1x1x16x128xf32>
    %523 = vector.shape_cast %522 : vector<1x1x16x128xf32> to vector<16x128xf32>
    %524 = vector.broadcast %521 : f32 to vector<16x128xf32>
    %525 = arith.mulf %524, %523 : vector<16x128xf32>
    %526 = arith.addf %520, %525 : vector<16x128xf32>
    %c63 = arith.constant 63 : index
    %527 = memref.load %arg2[%c63] : memref<98xf32, #tpu.memory_space<smem>>
    %c1_440 = arith.constant 1 : index
    %c0_441 = arith.constant 0 : index
    %c2_442 = arith.constant 2 : index
    %c0_443 = arith.constant 0 : index
    %528 = vector.load %arg5[%c1_440, %c0_441, %c2_442, %c0_443] : memref<2x7x22x128xf32, #tpu.memory_space<vmem>>, vector<1x1x16x128xf32>
    %529 = vector.shape_cast %528 : vector<1x1x16x128xf32> to vector<16x128xf32>
    %530 = vector.broadcast %527 : f32 to vector<16x128xf32>
    %531 = arith.mulf %530, %529 : vector<16x128xf32>
    %532 = arith.addf %526, %531 : vector<16x128xf32>
    %c70 = arith.constant 70 : index
    %533 = memref.load %arg2[%c70] : memref<98xf32, #tpu.memory_space<smem>>
    %c1_444 = arith.constant 1 : index
    %c0_445 = arith.constant 0 : index
    %c3_446 = arith.constant 3 : index
    %c0_447 = arith.constant 0 : index
    %534 = vector.load %arg5[%c1_444, %c0_445, %c3_446, %c0_447] : memref<2x7x22x128xf32, #tpu.memory_space<vmem>>, vector<1x1x16x128xf32>
    %535 = vector.shape_cast %534 : vector<1x1x16x128xf32> to vector<16x128xf32>
    %536 = vector.broadcast %533 : f32 to vector<16x128xf32>
    %537 = arith.mulf %536, %535 : vector<16x128xf32>
    %538 = arith.addf %532, %537 : vector<16x128xf32>
    %c77 = arith.constant 77 : index
    %539 = memref.load %arg2[%c77] : memref<98xf32, #tpu.memory_space<smem>>
    %c1_448 = arith.constant 1 : index
    %c0_449 = arith.constant 0 : index
    %c4_450 = arith.constant 4 : index
    %c0_451 = arith.constant 0 : index
    %540 = vector.load %arg5[%c1_448, %c0_449, %c4_450, %c0_451] : memref<2x7x22x128xf32, #tpu.memory_space<vmem>>, vector<1x1x16x128xf32>
    %541 = vector.shape_cast %540 : vector<1x1x16x128xf32> to vector<16x128xf32>
    %542 = vector.broadcast %539 : f32 to vector<16x128xf32>
    %543 = arith.mulf %542, %541 : vector<16x128xf32>
    %544 = arith.addf %538, %543 : vector<16x128xf32>
    %c84 = arith.constant 84 : index
    %545 = memref.load %arg2[%c84] : memref<98xf32, #tpu.memory_space<smem>>
    %c1_452 = arith.constant 1 : index
    %c0_453 = arith.constant 0 : index
    %c5_454 = arith.constant 5 : index
    %c0_455 = arith.constant 0 : index
    %546 = vector.load %arg5[%c1_452, %c0_453, %c5_454, %c0_455] : memref<2x7x22x128xf32, #tpu.memory_space<vmem>>, vector<1x1x16x128xf32>
    %547 = vector.shape_cast %546 : vector<1x1x16x128xf32> to vector<16x128xf32>
    %548 = vector.broadcast %545 : f32 to vector<16x128xf32>
    %549 = arith.mulf %548, %547 : vector<16x128xf32>
    %550 = arith.addf %544, %549 : vector<16x128xf32>
    %c91 = arith.constant 91 : index
    %551 = memref.load %arg2[%c91] : memref<98xf32, #tpu.memory_space<smem>>
    %c1_456 = arith.constant 1 : index
    %c0_457 = arith.constant 0 : index
    %c6_458 = arith.constant 6 : index
    %c0_459 = arith.constant 0 : index
    %552 = vector.load %arg5[%c1_456, %c0_457, %c6_458, %c0_459] : memref<2x7x22x128xf32, #tpu.memory_space<vmem>>, vector<1x1x16x128xf32>
    %553 = vector.shape_cast %552 : vector<1x1x16x128xf32> to vector<16x128xf32>
    %554 = vector.broadcast %551 : f32 to vector<16x128xf32>
    %555 = arith.mulf %554, %553 : vector<16x128xf32>
    %556 = arith.addf %550, %555 : vector<16x128xf32>
    %c50 = arith.constant 50 : index
    %557 = memref.load %arg2[%c50] : memref<98xf32, #tpu.memory_space<smem>>
    %c1_460 = arith.constant 1 : index
    %c1_461 = arith.constant 1 : index
    %c0_462 = arith.constant 0 : index
    %c0_463 = arith.constant 0 : index
    %558 = vector.load %arg5[%c1_460, %c1_461, %c0_462, %c0_463] : memref<2x7x22x128xf32, #tpu.memory_space<vmem>>, vector<1x1x16x128xf32>
    %559 = vector.shape_cast %558 : vector<1x1x16x128xf32> to vector<16x128xf32>
    %560 = vector.broadcast %557 : f32 to vector<16x128xf32>
    %561 = arith.mulf %560, %559 : vector<16x128xf32>
    %562 = arith.addf %556, %561 : vector<16x128xf32>
    %c57 = arith.constant 57 : index
    %563 = memref.load %arg2[%c57] : memref<98xf32, #tpu.memory_space<smem>>
    %c1_464 = arith.constant 1 : index
    %c1_465 = arith.constant 1 : index
    %c1_466 = arith.constant 1 : index
    %c0_467 = arith.constant 0 : index
    %564 = vector.load %arg5[%c1_464, %c1_465, %c1_466, %c0_467] : memref<2x7x22x128xf32, #tpu.memory_space<vmem>>, vector<1x1x16x128xf32>
    %565 = vector.shape_cast %564 : vector<1x1x16x128xf32> to vector<16x128xf32>
    %566 = vector.broadcast %563 : f32 to vector<16x128xf32>
    %567 = arith.mulf %566, %565 : vector<16x128xf32>
    %568 = arith.addf %562, %567 : vector<16x128xf32>
    %c64 = arith.constant 64 : index
    %569 = memref.load %arg2[%c64] : memref<98xf32, #tpu.memory_space<smem>>
    %c1_468 = arith.constant 1 : index
    %c1_469 = arith.constant 1 : index
    %c2_470 = arith.constant 2 : index
    %c0_471 = arith.constant 0 : index
    %570 = vector.load %arg5[%c1_468, %c1_469, %c2_470, %c0_471] : memref<2x7x22x128xf32, #tpu.memory_space<vmem>>, vector<1x1x16x128xf32>
    %571 = vector.shape_cast %570 : vector<1x1x16x128xf32> to vector<16x128xf32>
    %572 = vector.broadcast %569 : f32 to vector<16x128xf32>
    %573 = arith.mulf %572, %571 : vector<16x128xf32>
    %574 = arith.addf %568, %573 : vector<16x128xf32>
    %c71 = arith.constant 71 : index
    %575 = memref.load %arg2[%c71] : memref<98xf32, #tpu.memory_space<smem>>
    %c1_472 = arith.constant 1 : index
    %c1_473 = arith.constant 1 : index
    %c3_474 = arith.constant 3 : index
    %c0_475 = arith.constant 0 : index
    %576 = vector.load %arg5[%c1_472, %c1_473, %c3_474, %c0_475] : memref<2x7x22x128xf32, #tpu.memory_space<vmem>>, vector<1x1x16x128xf32>
    %577 = vector.shape_cast %576 : vector<1x1x16x128xf32> to vector<16x128xf32>
    %578 = vector.broadcast %575 : f32 to vector<16x128xf32>
    %579 = arith.mulf %578, %577 : vector<16x128xf32>
    %580 = arith.addf %574, %579 : vector<16x128xf32>
    %c78 = arith.constant 78 : index
    %581 = memref.load %arg2[%c78] : memref<98xf32, #tpu.memory_space<smem>>
    %c1_476 = arith.constant 1 : index
    %c1_477 = arith.constant 1 : index
    %c4_478 = arith.constant 4 : index
    %c0_479 = arith.constant 0 : index
    %582 = vector.load %arg5[%c1_476, %c1_477, %c4_478, %c0_479] : memref<2x7x22x128xf32, #tpu.memory_space<vmem>>, vector<1x1x16x128xf32>
    %583 = vector.shape_cast %582 : vector<1x1x16x128xf32> to vector<16x128xf32>
    %584 = vector.broadcast %581 : f32 to vector<16x128xf32>
    %585 = arith.mulf %584, %583 : vector<16x128xf32>
    %586 = arith.addf %580, %585 : vector<16x128xf32>
    %c85 = arith.constant 85 : index
    %587 = memref.load %arg2[%c85] : memref<98xf32, #tpu.memory_space<smem>>
    %c1_480 = arith.constant 1 : index
    %c1_481 = arith.constant 1 : index
    %c5_482 = arith.constant 5 : index
    %c0_483 = arith.constant 0 : index
    %588 = vector.load %arg5[%c1_480, %c1_481, %c5_482, %c0_483] : memref<2x7x22x128xf32, #tpu.memory_space<vmem>>, vector<1x1x16x128xf32>
    %589 = vector.shape_cast %588 : vector<1x1x16x128xf32> to vector<16x128xf32>
    %590 = vector.broadcast %587 : f32 to vector<16x128xf32>
    %591 = arith.mulf %590, %589 : vector<16x128xf32>
    %592 = arith.addf %586, %591 : vector<16x128xf32>
    %c92 = arith.constant 92 : index
    %593 = memref.load %arg2[%c92] : memref<98xf32, #tpu.memory_space<smem>>
    %c1_484 = arith.constant 1 : index
    %c1_485 = arith.constant 1 : index
    %c6_486 = arith.constant 6 : index
    %c0_487 = arith.constant 0 : index
    %594 = vector.load %arg5[%c1_484, %c1_485, %c6_486, %c0_487] : memref<2x7x22x128xf32, #tpu.memory_space<vmem>>, vector<1x1x16x128xf32>
    %595 = vector.shape_cast %594 : vector<1x1x16x128xf32> to vector<16x128xf32>
    %596 = vector.broadcast %593 : f32 to vector<16x128xf32>
    %597 = arith.mulf %596, %595 : vector<16x128xf32>
    %598 = arith.addf %592, %597 : vector<16x128xf32>
    %c51 = arith.constant 51 : index
    %599 = memref.load %arg2[%c51] : memref<98xf32, #tpu.memory_space<smem>>
    %c1_488 = arith.constant 1 : index
    %c2_489 = arith.constant 2 : index
    %c0_490 = arith.constant 0 : index
    %c0_491 = arith.constant 0 : index
    %600 = vector.load %arg5[%c1_488, %c2_489, %c0_490, %c0_491] : memref<2x7x22x128xf32, #tpu.memory_space<vmem>>, vector<1x1x16x128xf32>
    %601 = vector.shape_cast %600 : vector<1x1x16x128xf32> to vector<16x128xf32>
    %602 = vector.broadcast %599 : f32 to vector<16x128xf32>
    %603 = arith.mulf %602, %601 : vector<16x128xf32>
    %604 = arith.addf %598, %603 : vector<16x128xf32>
    %c58 = arith.constant 58 : index
    %605 = memref.load %arg2[%c58] : memref<98xf32, #tpu.memory_space<smem>>
    %c1_492 = arith.constant 1 : index
    %c2_493 = arith.constant 2 : index
    %c1_494 = arith.constant 1 : index
    %c0_495 = arith.constant 0 : index
    %606 = vector.load %arg5[%c1_492, %c2_493, %c1_494, %c0_495] : memref<2x7x22x128xf32, #tpu.memory_space<vmem>>, vector<1x1x16x128xf32>
    %607 = vector.shape_cast %606 : vector<1x1x16x128xf32> to vector<16x128xf32>
    %608 = vector.broadcast %605 : f32 to vector<16x128xf32>
    %609 = arith.mulf %608, %607 : vector<16x128xf32>
    %610 = arith.addf %604, %609 : vector<16x128xf32>
    %c65 = arith.constant 65 : index
    %611 = memref.load %arg2[%c65] : memref<98xf32, #tpu.memory_space<smem>>
    %c1_496 = arith.constant 1 : index
    %c2_497 = arith.constant 2 : index
    %c2_498 = arith.constant 2 : index
    %c0_499 = arith.constant 0 : index
    %612 = vector.load %arg5[%c1_496, %c2_497, %c2_498, %c0_499] : memref<2x7x22x128xf32, #tpu.memory_space<vmem>>, vector<1x1x16x128xf32>
    %613 = vector.shape_cast %612 : vector<1x1x16x128xf32> to vector<16x128xf32>
    %614 = vector.broadcast %611 : f32 to vector<16x128xf32>
    %615 = arith.mulf %614, %613 : vector<16x128xf32>
    %616 = arith.addf %610, %615 : vector<16x128xf32>
    %c72 = arith.constant 72 : index
    %617 = memref.load %arg2[%c72] : memref<98xf32, #tpu.memory_space<smem>>
    %c1_500 = arith.constant 1 : index
    %c2_501 = arith.constant 2 : index
    %c3_502 = arith.constant 3 : index
    %c0_503 = arith.constant 0 : index
    %618 = vector.load %arg5[%c1_500, %c2_501, %c3_502, %c0_503] : memref<2x7x22x128xf32, #tpu.memory_space<vmem>>, vector<1x1x16x128xf32>
    %619 = vector.shape_cast %618 : vector<1x1x16x128xf32> to vector<16x128xf32>
    %620 = vector.broadcast %617 : f32 to vector<16x128xf32>
    %621 = arith.mulf %620, %619 : vector<16x128xf32>
    %622 = arith.addf %616, %621 : vector<16x128xf32>
    %c79 = arith.constant 79 : index
    %623 = memref.load %arg2[%c79] : memref<98xf32, #tpu.memory_space<smem>>
    %c1_504 = arith.constant 1 : index
    %c2_505 = arith.constant 2 : index
    %c4_506 = arith.constant 4 : index
    %c0_507 = arith.constant 0 : index
    %624 = vector.load %arg5[%c1_504, %c2_505, %c4_506, %c0_507] : memref<2x7x22x128xf32, #tpu.memory_space<vmem>>, vector<1x1x16x128xf32>
    %625 = vector.shape_cast %624 : vector<1x1x16x128xf32> to vector<16x128xf32>
    %626 = vector.broadcast %623 : f32 to vector<16x128xf32>
    %627 = arith.mulf %626, %625 : vector<16x128xf32>
    %628 = arith.addf %622, %627 : vector<16x128xf32>
    %c86 = arith.constant 86 : index
    %629 = memref.load %arg2[%c86] : memref<98xf32, #tpu.memory_space<smem>>
    %c1_508 = arith.constant 1 : index
    %c2_509 = arith.constant 2 : index
    %c5_510 = arith.constant 5 : index
    %c0_511 = arith.constant 0 : index
    %630 = vector.load %arg5[%c1_508, %c2_509, %c5_510, %c0_511] : memref<2x7x22x128xf32, #tpu.memory_space<vmem>>, vector<1x1x16x128xf32>
    %631 = vector.shape_cast %630 : vector<1x1x16x128xf32> to vector<16x128xf32>
    %632 = vector.broadcast %629 : f32 to vector<16x128xf32>
    %633 = arith.mulf %632, %631 : vector<16x128xf32>
    %634 = arith.addf %628, %633 : vector<16x128xf32>
    %c93 = arith.constant 93 : index
    %635 = memref.load %arg2[%c93] : memref<98xf32, #tpu.memory_space<smem>>
    %c1_512 = arith.constant 1 : index
    %c2_513 = arith.constant 2 : index
    %c6_514 = arith.constant 6 : index
    %c0_515 = arith.constant 0 : index
    %636 = vector.load %arg5[%c1_512, %c2_513, %c6_514, %c0_515] : memref<2x7x22x128xf32, #tpu.memory_space<vmem>>, vector<1x1x16x128xf32>
    %637 = vector.shape_cast %636 : vector<1x1x16x128xf32> to vector<16x128xf32>
    %638 = vector.broadcast %635 : f32 to vector<16x128xf32>
    %639 = arith.mulf %638, %637 : vector<16x128xf32>
    %640 = arith.addf %634, %639 : vector<16x128xf32>
    %c52 = arith.constant 52 : index
    %641 = memref.load %arg2[%c52] : memref<98xf32, #tpu.memory_space<smem>>
    %c1_516 = arith.constant 1 : index
    %c3_517 = arith.constant 3 : index
    %c0_518 = arith.constant 0 : index
    %c0_519 = arith.constant 0 : index
    %642 = vector.load %arg5[%c1_516, %c3_517, %c0_518, %c0_519] : memref<2x7x22x128xf32, #tpu.memory_space<vmem>>, vector<1x1x16x128xf32>
    %643 = vector.shape_cast %642 : vector<1x1x16x128xf32> to vector<16x128xf32>
    %644 = vector.broadcast %641 : f32 to vector<16x128xf32>
    %645 = arith.mulf %644, %643 : vector<16x128xf32>
    %646 = arith.addf %640, %645 : vector<16x128xf32>
    %c59 = arith.constant 59 : index
    %647 = memref.load %arg2[%c59] : memref<98xf32, #tpu.memory_space<smem>>
    %c1_520 = arith.constant 1 : index
    %c3_521 = arith.constant 3 : index
    %c1_522 = arith.constant 1 : index
    %c0_523 = arith.constant 0 : index
    %648 = vector.load %arg5[%c1_520, %c3_521, %c1_522, %c0_523] : memref<2x7x22x128xf32, #tpu.memory_space<vmem>>, vector<1x1x16x128xf32>
    %649 = vector.shape_cast %648 : vector<1x1x16x128xf32> to vector<16x128xf32>
    %650 = vector.broadcast %647 : f32 to vector<16x128xf32>
    %651 = arith.mulf %650, %649 : vector<16x128xf32>
    %652 = arith.addf %646, %651 : vector<16x128xf32>
    %c66 = arith.constant 66 : index
    %653 = memref.load %arg2[%c66] : memref<98xf32, #tpu.memory_space<smem>>
    %c1_524 = arith.constant 1 : index
    %c3_525 = arith.constant 3 : index
    %c2_526 = arith.constant 2 : index
    %c0_527 = arith.constant 0 : index
    %654 = vector.load %arg5[%c1_524, %c3_525, %c2_526, %c0_527] : memref<2x7x22x128xf32, #tpu.memory_space<vmem>>, vector<1x1x16x128xf32>
    %655 = vector.shape_cast %654 : vector<1x1x16x128xf32> to vector<16x128xf32>
    %656 = vector.broadcast %653 : f32 to vector<16x128xf32>
    %657 = arith.mulf %656, %655 : vector<16x128xf32>
    %658 = arith.addf %652, %657 : vector<16x128xf32>
    %c73 = arith.constant 73 : index
    %659 = memref.load %arg2[%c73] : memref<98xf32, #tpu.memory_space<smem>>
    %c1_528 = arith.constant 1 : index
    %c3_529 = arith.constant 3 : index
    %c3_530 = arith.constant 3 : index
    %c0_531 = arith.constant 0 : index
    %660 = vector.load %arg5[%c1_528, %c3_529, %c3_530, %c0_531] : memref<2x7x22x128xf32, #tpu.memory_space<vmem>>, vector<1x1x16x128xf32>
    %661 = vector.shape_cast %660 : vector<1x1x16x128xf32> to vector<16x128xf32>
    %662 = vector.broadcast %659 : f32 to vector<16x128xf32>
    %663 = arith.mulf %662, %661 : vector<16x128xf32>
    %664 = arith.addf %658, %663 : vector<16x128xf32>
    %c80 = arith.constant 80 : index
    %665 = memref.load %arg2[%c80] : memref<98xf32, #tpu.memory_space<smem>>
    %c1_532 = arith.constant 1 : index
    %c3_533 = arith.constant 3 : index
    %c4_534 = arith.constant 4 : index
    %c0_535 = arith.constant 0 : index
    %666 = vector.load %arg5[%c1_532, %c3_533, %c4_534, %c0_535] : memref<2x7x22x128xf32, #tpu.memory_space<vmem>>, vector<1x1x16x128xf32>
    %667 = vector.shape_cast %666 : vector<1x1x16x128xf32> to vector<16x128xf32>
    %668 = vector.broadcast %665 : f32 to vector<16x128xf32>
    %669 = arith.mulf %668, %667 : vector<16x128xf32>
    %670 = arith.addf %664, %669 : vector<16x128xf32>
    %c87 = arith.constant 87 : index
    %671 = memref.load %arg2[%c87] : memref<98xf32, #tpu.memory_space<smem>>
    %c1_536 = arith.constant 1 : index
    %c3_537 = arith.constant 3 : index
    %c5_538 = arith.constant 5 : index
    %c0_539 = arith.constant 0 : index
    %672 = vector.load %arg5[%c1_536, %c3_537, %c5_538, %c0_539] : memref<2x7x22x128xf32, #tpu.memory_space<vmem>>, vector<1x1x16x128xf32>
    %673 = vector.shape_cast %672 : vector<1x1x16x128xf32> to vector<16x128xf32>
    %674 = vector.broadcast %671 : f32 to vector<16x128xf32>
    %675 = arith.mulf %674, %673 : vector<16x128xf32>
    %676 = arith.addf %670, %675 : vector<16x128xf32>
    %c94 = arith.constant 94 : index
    %677 = memref.load %arg2[%c94] : memref<98xf32, #tpu.memory_space<smem>>
    %c1_540 = arith.constant 1 : index
    %c3_541 = arith.constant 3 : index
    %c6_542 = arith.constant 6 : index
    %c0_543 = arith.constant 0 : index
    %678 = vector.load %arg5[%c1_540, %c3_541, %c6_542, %c0_543] : memref<2x7x22x128xf32, #tpu.memory_space<vmem>>, vector<1x1x16x128xf32>
    %679 = vector.shape_cast %678 : vector<1x1x16x128xf32> to vector<16x128xf32>
    %680 = vector.broadcast %677 : f32 to vector<16x128xf32>
    %681 = arith.mulf %680, %679 : vector<16x128xf32>
    %682 = arith.addf %676, %681 : vector<16x128xf32>
    %c53 = arith.constant 53 : index
    %683 = memref.load %arg2[%c53] : memref<98xf32, #tpu.memory_space<smem>>
    %c1_544 = arith.constant 1 : index
    %c4_545 = arith.constant 4 : index
    %c0_546 = arith.constant 0 : index
    %c0_547 = arith.constant 0 : index
    %684 = vector.load %arg5[%c1_544, %c4_545, %c0_546, %c0_547] : memref<2x7x22x128xf32, #tpu.memory_space<vmem>>, vector<1x1x16x128xf32>
    %685 = vector.shape_cast %684 : vector<1x1x16x128xf32> to vector<16x128xf32>
    %686 = vector.broadcast %683 : f32 to vector<16x128xf32>
    %687 = arith.mulf %686, %685 : vector<16x128xf32>
    %688 = arith.addf %682, %687 : vector<16x128xf32>
    %c60 = arith.constant 60 : index
    %689 = memref.load %arg2[%c60] : memref<98xf32, #tpu.memory_space<smem>>
    %c1_548 = arith.constant 1 : index
    %c4_549 = arith.constant 4 : index
    %c1_550 = arith.constant 1 : index
    %c0_551 = arith.constant 0 : index
    %690 = vector.load %arg5[%c1_548, %c4_549, %c1_550, %c0_551] : memref<2x7x22x128xf32, #tpu.memory_space<vmem>>, vector<1x1x16x128xf32>
    %691 = vector.shape_cast %690 : vector<1x1x16x128xf32> to vector<16x128xf32>
    %692 = vector.broadcast %689 : f32 to vector<16x128xf32>
    %693 = arith.mulf %692, %691 : vector<16x128xf32>
    %694 = arith.addf %688, %693 : vector<16x128xf32>
    %c67 = arith.constant 67 : index
    %695 = memref.load %arg2[%c67] : memref<98xf32, #tpu.memory_space<smem>>
    %c1_552 = arith.constant 1 : index
    %c4_553 = arith.constant 4 : index
    %c2_554 = arith.constant 2 : index
    %c0_555 = arith.constant 0 : index
    %696 = vector.load %arg5[%c1_552, %c4_553, %c2_554, %c0_555] : memref<2x7x22x128xf32, #tpu.memory_space<vmem>>, vector<1x1x16x128xf32>
    %697 = vector.shape_cast %696 : vector<1x1x16x128xf32> to vector<16x128xf32>
    %698 = vector.broadcast %695 : f32 to vector<16x128xf32>
    %699 = arith.mulf %698, %697 : vector<16x128xf32>
    %700 = arith.addf %694, %699 : vector<16x128xf32>
    %c74 = arith.constant 74 : index
    %701 = memref.load %arg2[%c74] : memref<98xf32, #tpu.memory_space<smem>>
    %c1_556 = arith.constant 1 : index
    %c4_557 = arith.constant 4 : index
    %c3_558 = arith.constant 3 : index
    %c0_559 = arith.constant 0 : index
    %702 = vector.load %arg5[%c1_556, %c4_557, %c3_558, %c0_559] : memref<2x7x22x128xf32, #tpu.memory_space<vmem>>, vector<1x1x16x128xf32>
    %703 = vector.shape_cast %702 : vector<1x1x16x128xf32> to vector<16x128xf32>
    %704 = vector.broadcast %701 : f32 to vector<16x128xf32>
    %705 = arith.mulf %704, %703 : vector<16x128xf32>
    %706 = arith.addf %700, %705 : vector<16x128xf32>
    %c81 = arith.constant 81 : index
    %707 = memref.load %arg2[%c81] : memref<98xf32, #tpu.memory_space<smem>>
    %c1_560 = arith.constant 1 : index
    %c4_561 = arith.constant 4 : index
    %c4_562 = arith.constant 4 : index
    %c0_563 = arith.constant 0 : index
    %708 = vector.load %arg5[%c1_560, %c4_561, %c4_562, %c0_563] : memref<2x7x22x128xf32, #tpu.memory_space<vmem>>, vector<1x1x16x128xf32>
    %709 = vector.shape_cast %708 : vector<1x1x16x128xf32> to vector<16x128xf32>
    %710 = vector.broadcast %707 : f32 to vector<16x128xf32>
    %711 = arith.mulf %710, %709 : vector<16x128xf32>
    %712 = arith.addf %706, %711 : vector<16x128xf32>
    %c88 = arith.constant 88 : index
    %713 = memref.load %arg2[%c88] : memref<98xf32, #tpu.memory_space<smem>>
    %c1_564 = arith.constant 1 : index
    %c4_565 = arith.constant 4 : index
    %c5_566 = arith.constant 5 : index
    %c0_567 = arith.constant 0 : index
    %714 = vector.load %arg5[%c1_564, %c4_565, %c5_566, %c0_567] : memref<2x7x22x128xf32, #tpu.memory_space<vmem>>, vector<1x1x16x128xf32>
    %715 = vector.shape_cast %714 : vector<1x1x16x128xf32> to vector<16x128xf32>
    %716 = vector.broadcast %713 : f32 to vector<16x128xf32>
    %717 = arith.mulf %716, %715 : vector<16x128xf32>
    %718 = arith.addf %712, %717 : vector<16x128xf32>
    %c95 = arith.constant 95 : index
    %719 = memref.load %arg2[%c95] : memref<98xf32, #tpu.memory_space<smem>>
    %c1_568 = arith.constant 1 : index
    %c4_569 = arith.constant 4 : index
    %c6_570 = arith.constant 6 : index
    %c0_571 = arith.constant 0 : index
    %720 = vector.load %arg5[%c1_568, %c4_569, %c6_570, %c0_571] : memref<2x7x22x128xf32, #tpu.memory_space<vmem>>, vector<1x1x16x128xf32>
    %721 = vector.shape_cast %720 : vector<1x1x16x128xf32> to vector<16x128xf32>
    %722 = vector.broadcast %719 : f32 to vector<16x128xf32>
    %723 = arith.mulf %722, %721 : vector<16x128xf32>
    %724 = arith.addf %718, %723 : vector<16x128xf32>
    %c54 = arith.constant 54 : index
    %725 = memref.load %arg2[%c54] : memref<98xf32, #tpu.memory_space<smem>>
    %c1_572 = arith.constant 1 : index
    %c5_573 = arith.constant 5 : index
    %c0_574 = arith.constant 0 : index
    %c0_575 = arith.constant 0 : index
    %726 = vector.load %arg5[%c1_572, %c5_573, %c0_574, %c0_575] : memref<2x7x22x128xf32, #tpu.memory_space<vmem>>, vector<1x1x16x128xf32>
    %727 = vector.shape_cast %726 : vector<1x1x16x128xf32> to vector<16x128xf32>
    %728 = vector.broadcast %725 : f32 to vector<16x128xf32>
    %729 = arith.mulf %728, %727 : vector<16x128xf32>
    %730 = arith.addf %724, %729 : vector<16x128xf32>
    %c61 = arith.constant 61 : index
    %731 = memref.load %arg2[%c61] : memref<98xf32, #tpu.memory_space<smem>>
    %c1_576 = arith.constant 1 : index
    %c5_577 = arith.constant 5 : index
    %c1_578 = arith.constant 1 : index
    %c0_579 = arith.constant 0 : index
    %732 = vector.load %arg5[%c1_576, %c5_577, %c1_578, %c0_579] : memref<2x7x22x128xf32, #tpu.memory_space<vmem>>, vector<1x1x16x128xf32>
    %733 = vector.shape_cast %732 : vector<1x1x16x128xf32> to vector<16x128xf32>
    %734 = vector.broadcast %731 : f32 to vector<16x128xf32>
    %735 = arith.mulf %734, %733 : vector<16x128xf32>
    %736 = arith.addf %730, %735 : vector<16x128xf32>
    %c68 = arith.constant 68 : index
    %737 = memref.load %arg2[%c68] : memref<98xf32, #tpu.memory_space<smem>>
    %c1_580 = arith.constant 1 : index
    %c5_581 = arith.constant 5 : index
    %c2_582 = arith.constant 2 : index
    %c0_583 = arith.constant 0 : index
    %738 = vector.load %arg5[%c1_580, %c5_581, %c2_582, %c0_583] : memref<2x7x22x128xf32, #tpu.memory_space<vmem>>, vector<1x1x16x128xf32>
    %739 = vector.shape_cast %738 : vector<1x1x16x128xf32> to vector<16x128xf32>
    %740 = vector.broadcast %737 : f32 to vector<16x128xf32>
    %741 = arith.mulf %740, %739 : vector<16x128xf32>
    %742 = arith.addf %736, %741 : vector<16x128xf32>
    %c75 = arith.constant 75 : index
    %743 = memref.load %arg2[%c75] : memref<98xf32, #tpu.memory_space<smem>>
    %c1_584 = arith.constant 1 : index
    %c5_585 = arith.constant 5 : index
    %c3_586 = arith.constant 3 : index
    %c0_587 = arith.constant 0 : index
    %744 = vector.load %arg5[%c1_584, %c5_585, %c3_586, %c0_587] : memref<2x7x22x128xf32, #tpu.memory_space<vmem>>, vector<1x1x16x128xf32>
    %745 = vector.shape_cast %744 : vector<1x1x16x128xf32> to vector<16x128xf32>
    %746 = vector.broadcast %743 : f32 to vector<16x128xf32>
    %747 = arith.mulf %746, %745 : vector<16x128xf32>
    %748 = arith.addf %742, %747 : vector<16x128xf32>
    %c82 = arith.constant 82 : index
    %749 = memref.load %arg2[%c82] : memref<98xf32, #tpu.memory_space<smem>>
    %c1_588 = arith.constant 1 : index
    %c5_589 = arith.constant 5 : index
    %c4_590 = arith.constant 4 : index
    %c0_591 = arith.constant 0 : index
    %750 = vector.load %arg5[%c1_588, %c5_589, %c4_590, %c0_591] : memref<2x7x22x128xf32, #tpu.memory_space<vmem>>, vector<1x1x16x128xf32>
    %751 = vector.shape_cast %750 : vector<1x1x16x128xf32> to vector<16x128xf32>
    %752 = vector.broadcast %749 : f32 to vector<16x128xf32>
    %753 = arith.mulf %752, %751 : vector<16x128xf32>
    %754 = arith.addf %748, %753 : vector<16x128xf32>
    %c89 = arith.constant 89 : index
    %755 = memref.load %arg2[%c89] : memref<98xf32, #tpu.memory_space<smem>>
    %c1_592 = arith.constant 1 : index
    %c5_593 = arith.constant 5 : index
    %c5_594 = arith.constant 5 : index
    %c0_595 = arith.constant 0 : index
    %756 = vector.load %arg5[%c1_592, %c5_593, %c5_594, %c0_595] : memref<2x7x22x128xf32, #tpu.memory_space<vmem>>, vector<1x1x16x128xf32>
    %757 = vector.shape_cast %756 : vector<1x1x16x128xf32> to vector<16x128xf32>
    %758 = vector.broadcast %755 : f32 to vector<16x128xf32>
    %759 = arith.mulf %758, %757 : vector<16x128xf32>
    %760 = arith.addf %754, %759 : vector<16x128xf32>
    %c96 = arith.constant 96 : index
    %761 = memref.load %arg2[%c96] : memref<98xf32, #tpu.memory_space<smem>>
    %c1_596 = arith.constant 1 : index
    %c5_597 = arith.constant 5 : index
    %c6_598 = arith.constant 6 : index
    %c0_599 = arith.constant 0 : index
    %762 = vector.load %arg5[%c1_596, %c5_597, %c6_598, %c0_599] : memref<2x7x22x128xf32, #tpu.memory_space<vmem>>, vector<1x1x16x128xf32>
    %763 = vector.shape_cast %762 : vector<1x1x16x128xf32> to vector<16x128xf32>
    %764 = vector.broadcast %761 : f32 to vector<16x128xf32>
    %765 = arith.mulf %764, %763 : vector<16x128xf32>
    %766 = arith.addf %760, %765 : vector<16x128xf32>
    %c55 = arith.constant 55 : index
    %767 = memref.load %arg2[%c55] : memref<98xf32, #tpu.memory_space<smem>>
    %c1_600 = arith.constant 1 : index
    %c6_601 = arith.constant 6 : index
    %c0_602 = arith.constant 0 : index
    %c0_603 = arith.constant 0 : index
    %768 = vector.load %arg5[%c1_600, %c6_601, %c0_602, %c0_603] : memref<2x7x22x128xf32, #tpu.memory_space<vmem>>, vector<1x1x16x128xf32>
    %769 = vector.shape_cast %768 : vector<1x1x16x128xf32> to vector<16x128xf32>
    %770 = vector.broadcast %767 : f32 to vector<16x128xf32>
    %771 = arith.mulf %770, %769 : vector<16x128xf32>
    %772 = arith.addf %766, %771 : vector<16x128xf32>
    %c62 = arith.constant 62 : index
    %773 = memref.load %arg2[%c62] : memref<98xf32, #tpu.memory_space<smem>>
    %c1_604 = arith.constant 1 : index
    %c6_605 = arith.constant 6 : index
    %c1_606 = arith.constant 1 : index
    %c0_607 = arith.constant 0 : index
    %774 = vector.load %arg5[%c1_604, %c6_605, %c1_606, %c0_607] : memref<2x7x22x128xf32, #tpu.memory_space<vmem>>, vector<1x1x16x128xf32>
    %775 = vector.shape_cast %774 : vector<1x1x16x128xf32> to vector<16x128xf32>
    %776 = vector.broadcast %773 : f32 to vector<16x128xf32>
    %777 = arith.mulf %776, %775 : vector<16x128xf32>
    %778 = arith.addf %772, %777 : vector<16x128xf32>
    %c69 = arith.constant 69 : index
    %779 = memref.load %arg2[%c69] : memref<98xf32, #tpu.memory_space<smem>>
    %c1_608 = arith.constant 1 : index
    %c6_609 = arith.constant 6 : index
    %c2_610 = arith.constant 2 : index
    %c0_611 = arith.constant 0 : index
    %780 = vector.load %arg5[%c1_608, %c6_609, %c2_610, %c0_611] : memref<2x7x22x128xf32, #tpu.memory_space<vmem>>, vector<1x1x16x128xf32>
    %781 = vector.shape_cast %780 : vector<1x1x16x128xf32> to vector<16x128xf32>
    %782 = vector.broadcast %779 : f32 to vector<16x128xf32>
    %783 = arith.mulf %782, %781 : vector<16x128xf32>
    %784 = arith.addf %778, %783 : vector<16x128xf32>
    %c76 = arith.constant 76 : index
    %785 = memref.load %arg2[%c76] : memref<98xf32, #tpu.memory_space<smem>>
    %c1_612 = arith.constant 1 : index
    %c6_613 = arith.constant 6 : index
    %c3_614 = arith.constant 3 : index
    %c0_615 = arith.constant 0 : index
    %786 = vector.load %arg5[%c1_612, %c6_613, %c3_614, %c0_615] : memref<2x7x22x128xf32, #tpu.memory_space<vmem>>, vector<1x1x16x128xf32>
    %787 = vector.shape_cast %786 : vector<1x1x16x128xf32> to vector<16x128xf32>
    %788 = vector.broadcast %785 : f32 to vector<16x128xf32>
    %789 = arith.mulf %788, %787 : vector<16x128xf32>
    %790 = arith.addf %784, %789 : vector<16x128xf32>
    %c83 = arith.constant 83 : index
    %791 = memref.load %arg2[%c83] : memref<98xf32, #tpu.memory_space<smem>>
    %c1_616 = arith.constant 1 : index
    %c6_617 = arith.constant 6 : index
    %c4_618 = arith.constant 4 : index
    %c0_619 = arith.constant 0 : index
    %792 = vector.load %arg5[%c1_616, %c6_617, %c4_618, %c0_619] : memref<2x7x22x128xf32, #tpu.memory_space<vmem>>, vector<1x1x16x128xf32>
    %793 = vector.shape_cast %792 : vector<1x1x16x128xf32> to vector<16x128xf32>
    %794 = vector.broadcast %791 : f32 to vector<16x128xf32>
    %795 = arith.mulf %794, %793 : vector<16x128xf32>
    %796 = arith.addf %790, %795 : vector<16x128xf32>
    %c90 = arith.constant 90 : index
    %797 = memref.load %arg2[%c90] : memref<98xf32, #tpu.memory_space<smem>>
    %c1_620 = arith.constant 1 : index
    %c6_621 = arith.constant 6 : index
    %c5_622 = arith.constant 5 : index
    %c0_623 = arith.constant 0 : index
    %798 = vector.load %arg5[%c1_620, %c6_621, %c5_622, %c0_623] : memref<2x7x22x128xf32, #tpu.memory_space<vmem>>, vector<1x1x16x128xf32>
    %799 = vector.shape_cast %798 : vector<1x1x16x128xf32> to vector<16x128xf32>
    %800 = vector.broadcast %797 : f32 to vector<16x128xf32>
    %801 = arith.mulf %800, %799 : vector<16x128xf32>
    %802 = arith.addf %796, %801 : vector<16x128xf32>
    %c97 = arith.constant 97 : index
    %803 = memref.load %arg2[%c97] : memref<98xf32, #tpu.memory_space<smem>>
    %c1_624 = arith.constant 1 : index
    %c6_625 = arith.constant 6 : index
    %c6_626 = arith.constant 6 : index
    %c0_627 = arith.constant 0 : index
    %804 = vector.load %arg5[%c1_624, %c6_625, %c6_626, %c0_627] : memref<2x7x22x128xf32, #tpu.memory_space<vmem>>, vector<1x1x16x128xf32>
    %805 = vector.shape_cast %804 : vector<1x1x16x128xf32> to vector<16x128xf32>
    %806 = vector.broadcast %803 : f32 to vector<16x128xf32>
    %807 = arith.mulf %806, %805 : vector<16x128xf32>
    %808 = arith.addf %802, %807 : vector<16x128xf32>
    %809 = vector.extract_strided_slice %808 {offsets = [0, 0], sizes = [1, 16], strides = [1, 1]} : vector<16x128xf32> to vector<1x16xf32>
    %c0_628 = arith.constant 0 : index
    %c0_629 = arith.constant 0 : index
    %810 = vector.load %arg6[%c0_628, %c0_629] : memref<1x256xf32, #tpu.memory_space<vmem>>, vector<1x16xf32>
    tpu.vector_store %arg6[%c0_628, %c0_629], %809 {strides = array<i32>} : memref<1x256xf32, #tpu.memory_space<vmem>>, vector<1x16xf32>,
    %811 = vector.extract_strided_slice %808 {offsets = [1, 0], sizes = [1, 16], strides = [1, 1]} : vector<16x128xf32> to vector<1x16xf32>
    %c0_630 = arith.constant 0 : index
    %c16_631 = arith.constant 16 : index
    %812 = vector.load %arg6[%c0_630, %c16_631] : memref<1x256xf32, #tpu.memory_space<vmem>>, vector<1x16xf32>
    tpu.vector_store %arg6[%c0_630, %c16_631], %811 {strides = array<i32>} : memref<1x256xf32, #tpu.memory_space<vmem>>, vector<1x16xf32>,
    %813 = vector.extract_strided_slice %808 {offsets = [2, 0], sizes = [1, 16], strides = [1, 1]} : vector<16x128xf32> to vector<1x16xf32>
    %c0_632 = arith.constant 0 : index
    %c32_633 = arith.constant 32 : index
    %814 = vector.load %arg6[%c0_632, %c32_633] : memref<1x256xf32, #tpu.memory_space<vmem>>, vector<1x16xf32>
    tpu.vector_store %arg6[%c0_632, %c32_633], %813 {strides = array<i32>} : memref<1x256xf32, #tpu.memory_space<vmem>>, vector<1x16xf32>,
    %815 = vector.extract_strided_slice %808 {offsets = [3, 0], sizes = [1, 16], strides = [1, 1]} : vector<16x128xf32> to vector<1x16xf32>
    %c0_634 = arith.constant 0 : index
    %c48_635 = arith.constant 48 : index
    %816 = vector.load %arg6[%c0_634, %c48_635] : memref<1x256xf32, #tpu.memory_space<vmem>>, vector<1x16xf32>
    tpu.vector_store %arg6[%c0_634, %c48_635], %815 {strides = array<i32>} : memref<1x256xf32, #tpu.memory_space<vmem>>, vector<1x16xf32>,
    %817 = vector.extract_strided_slice %808 {offsets = [4, 0], sizes = [1, 16], strides = [1, 1]} : vector<16x128xf32> to vector<1x16xf32>
    %c0_636 = arith.constant 0 : index
    %c64_637 = arith.constant 64 : index
    %818 = vector.load %arg6[%c0_636, %c64_637] : memref<1x256xf32, #tpu.memory_space<vmem>>, vector<1x16xf32>
    tpu.vector_store %arg6[%c0_636, %c64_637], %817 {strides = array<i32>} : memref<1x256xf32, #tpu.memory_space<vmem>>, vector<1x16xf32>,
    %819 = vector.extract_strided_slice %808 {offsets = [5, 0], sizes = [1, 16], strides = [1, 1]} : vector<16x128xf32> to vector<1x16xf32>
    %c0_638 = arith.constant 0 : index
    %c80_639 = arith.constant 80 : index
    %820 = vector.load %arg6[%c0_638, %c80_639] : memref<1x256xf32, #tpu.memory_space<vmem>>, vector<1x16xf32>
    tpu.vector_store %arg6[%c0_638, %c80_639], %819 {strides = array<i32>} : memref<1x256xf32, #tpu.memory_space<vmem>>, vector<1x16xf32>,
    %821 = vector.extract_strided_slice %808 {offsets = [6, 0], sizes = [1, 16], strides = [1, 1]} : vector<16x128xf32> to vector<1x16xf32>
    %c0_640 = arith.constant 0 : index
    %c96_641 = arith.constant 96 : index
    %822 = vector.load %arg6[%c0_640, %c96_641] : memref<1x256xf32, #tpu.memory_space<vmem>>, vector<1x16xf32>
    tpu.vector_store %arg6[%c0_640, %c96_641], %821 {strides = array<i32>} : memref<1x256xf32, #tpu.memory_space<vmem>>, vector<1x16xf32>,
    %823 = vector.extract_strided_slice %808 {offsets = [7, 0], sizes = [1, 16], strides = [1, 1]} : vector<16x128xf32> to vector<1x16xf32>
    %c0_642 = arith.constant 0 : index
    %c112 = arith.constant 112 : index
    %824 = vector.load %arg6[%c0_642, %c112] : memref<1x256xf32, #tpu.memory_space<vmem>>, vector<1x16xf32>
    tpu.vector_store %arg6[%c0_642, %c112], %823 {strides = array<i32>} : memref<1x256xf32, #tpu.memory_space<vmem>>, vector<1x16xf32>,
    %825 = vector.extract_strided_slice %808 {offsets = [8, 0], sizes = [1, 16], strides = [1, 1]} : vector<16x128xf32> to vector<1x16xf32>
    %c0_643 = arith.constant 0 : index
    %c128 = arith.constant 128 : index
    %826 = vector.load %arg6[%c0_643, %c128] : memref<1x256xf32, #tpu.memory_space<vmem>>, vector<1x16xf32>
    tpu.vector_store %arg6[%c0_643, %c128], %825 {strides = array<i32>} : memref<1x256xf32, #tpu.memory_space<vmem>>, vector<1x16xf32>,
    %827 = vector.extract_strided_slice %808 {offsets = [9, 0], sizes = [1, 16], strides = [1, 1]} : vector<16x128xf32> to vector<1x16xf32>
    %c0_644 = arith.constant 0 : index
    %c144 = arith.constant 144 : index
    %828 = vector.load %arg6[%c0_644, %c144] : memref<1x256xf32, #tpu.memory_space<vmem>>, vector<1x16xf32>
    tpu.vector_store %arg6[%c0_644, %c144], %827 {strides = array<i32>} : memref<1x256xf32, #tpu.memory_space<vmem>>, vector<1x16xf32>,
    %829 = vector.extract_strided_slice %808 {offsets = [10, 0], sizes = [1, 16], strides = [1, 1]} : vector<16x128xf32> to vector<1x16xf32>
    %c0_645 = arith.constant 0 : index
    %c160 = arith.constant 160 : index
    %830 = vector.load %arg6[%c0_645, %c160] : memref<1x256xf32, #tpu.memory_space<vmem>>, vector<1x16xf32>
    tpu.vector_store %arg6[%c0_645, %c160], %829 {strides = array<i32>} : memref<1x256xf32, #tpu.memory_space<vmem>>, vector<1x16xf32>,
    %831 = vector.extract_strided_slice %808 {offsets = [11, 0], sizes = [1, 16], strides = [1, 1]} : vector<16x128xf32> to vector<1x16xf32>
    %c0_646 = arith.constant 0 : index
    %c176 = arith.constant 176 : index
    %832 = vector.load %arg6[%c0_646, %c176] : memref<1x256xf32, #tpu.memory_space<vmem>>, vector<1x16xf32>
    tpu.vector_store %arg6[%c0_646, %c176], %831 {strides = array<i32>} : memref<1x256xf32, #tpu.memory_space<vmem>>, vector<1x16xf32>,
    %833 = vector.extract_strided_slice %808 {offsets = [12, 0], sizes = [1, 16], strides = [1, 1]} : vector<16x128xf32> to vector<1x16xf32>
    %c0_647 = arith.constant 0 : index
    %c192 = arith.constant 192 : index
    %834 = vector.load %arg6[%c0_647, %c192] : memref<1x256xf32, #tpu.memory_space<vmem>>, vector<1x16xf32>
    tpu.vector_store %arg6[%c0_647, %c192], %833 {strides = array<i32>} : memref<1x256xf32, #tpu.memory_space<vmem>>, vector<1x16xf32>,
    %835 = vector.extract_strided_slice %808 {offsets = [13, 0], sizes = [1, 16], strides = [1, 1]} : vector<16x128xf32> to vector<1x16xf32>
    %c0_648 = arith.constant 0 : index
    %c208 = arith.constant 208 : index
    %836 = vector.load %arg6[%c0_648, %c208] : memref<1x256xf32, #tpu.memory_space<vmem>>, vector<1x16xf32>
    tpu.vector_store %arg6[%c0_648, %c208], %835 {strides = array<i32>} : memref<1x256xf32, #tpu.memory_space<vmem>>, vector<1x16xf32>,
    %837 = vector.extract_strided_slice %808 {offsets = [14, 0], sizes = [1, 16], strides = [1, 1]} : vector<16x128xf32> to vector<1x16xf32>
    %c0_649 = arith.constant 0 : index
    %c224 = arith.constant 224 : index
    %838 = vector.load %arg6[%c0_649, %c224] : memref<1x256xf32, #tpu.memory_space<vmem>>, vector<1x16xf32>
    tpu.vector_store %arg6[%c0_649, %c224], %837 {strides = array<i32>} : memref<1x256xf32, #tpu.memory_space<vmem>>, vector<1x16xf32>,
    %839 = vector.extract_strided_slice %808 {offsets = [15, 0], sizes = [1, 16], strides = [1, 1]} : vector<16x128xf32> to vector<1x16xf32>
    %c0_650 = arith.constant 0 : index
    %c240 = arith.constant 240 : index
    %840 = vector.load %arg6[%c0_650, %c240] : memref<1x256xf32, #tpu.memory_space<vmem>>, vector<1x16xf32>
    tpu.vector_store %arg6[%c0_650, %c240], %839 {strides = array<i32>} : memref<1x256xf32, #tpu.memory_space<vmem>>, vector<1x16xf32>,
    %c0_651 = arith.constant 0 : index
    %841 = memref.load %arg3[%c0_651] : memref<2xf32, #tpu.memory_space<smem>>
    %c1_652 = arith.constant 1 : index
    %842 = memref.load %arg3[%c1_652] : memref<2xf32, #tpu.memory_space<smem>>
    %c0_653 = arith.constant 0 : index
    %c0_654 = arith.constant 0 : index
    %843 = vector.load %arg6[%c0_653, %c0_654] : memref<1x256xf32, #tpu.memory_space<vmem>>, vector<1x256xf32>
    %844 = vector.broadcast %841 : f32 to vector<1x256xf32>
    %845 = arith.mulf %844, %843 : vector<1x256xf32>
    %846 = vector.broadcast %842 : f32 to vector<1x256xf32>
    %847 = arith.addf %845, %846 : vector<1x256xf32>
    %848 = arith.negf %847 : vector<1x256xf32>
    %849 = math.exp %848 : vector<1x256xf32>
    %cst_655 = arith.constant 1.000000e+00 : f32
    %850 = vector.broadcast %cst_655 : f32 to vector<1x256xf32>
    %851 = arith.addf %850, %849 : vector<1x256xf32>
    %852 = arith.divf %850, %851 : vector<1x256xf32>
    %c0_656 = arith.constant 0 : index
    %c0_657 = arith.constant 0 : index
    %c0_658 = arith.constant 0 : index
    %853 = vector.load %arg1[%c0_656, %c0_657, %c0_658] : memref<1x4x256xf32, #tpu.memory_space<vmem>>, vector<1x4x256xf32>
    %854 = vector.shape_cast %853 : vector<1x4x256xf32> to vector<4x256xf32>
    %855 = vector.broadcast %852 : vector<1x256xf32> to vector<4x256xf32>
    %856 = arith.mulf %854, %855 : vector<4x256xf32>
    %c0_659 = arith.constant 0 : index
    %c0_660 = arith.constant 0 : index
    %c0_661 = arith.constant 0 : index
    %857 = vector.load %arg4[%c0_659, %c0_660, %c0_661] : memref<1x4x256xf32, #tpu.memory_space<vmem>>, vector<1x4x256xf32>
    %858 = vector.shape_cast %857 : vector<1x4x256xf32> to vector<4x256xf32>
    %859 = vector.shape_cast %856 : vector<4x256xf32> to vector<1x4x256xf32>
    tpu.vector_store %arg4[%c0_659, %c0_660, %c0_661], %859 {strides = array<i32>} : memref<1x4x256xf32, #tpu.memory_space<vmem>>, vector<1x4x256xf32>,
    return
  }
  func.func @transform_0(%arg0: i32) -> (i32, i32, i32) {
    %c0_i32 = arith.constant 0 : i32
    %c0_i32_0 = arith.constant 0 : i32
    %c0_i32_1 = arith.constant 0 : i32
    return %arg0, %c0_i32, %c0_i32_0 : i32, i32, i32
  }
  func.func @transform_1(%arg0: i32) -> i32 {
    %c0_i32 = arith.constant 0 : i32
    %c0_i32_0 = arith.constant 0 : i32
    return %c0_i32 : i32
  }
  func.func @transform_2(%arg0: i32) -> i32 {
    %c0_i32 = arith.constant 0 : i32
    %c0_i32_0 = arith.constant 0 : i32
    return %c0_i32 : i32
  }
  func.func @transform_3(%arg0: i32) -> (i32, i32, i32) {
    %c0_i32 = arith.constant 0 : i32
    %c0_i32_0 = arith.constant 0 : i32
    %c0_i32_1 = arith.constant 0 : i32
    return %arg0, %c0_i32, %c0_i32_0 : i32, i32, i32
  }
}

</mosaic_0001>

<bundles_post_ra>
// kernel: tpu_custom_call.1
= control target key start
LH: loop header
LB: loop body
LE: loop exit
PB: predicated region body
PF: predicated region fallthrough
CT: control target
= control target key end

     0   :  { %8 = vsyncpa [#allocation5], 0  ;;  %s2797_s0 = inlined_call_operand.hbm [shape: f32[2,4,256], index: 0, kind: input, shape index: {}]   ;;  %s2798_s1 = inlined_call_operand.vmem [shape: f32[98], index: 1, kind: input, shape index: {}]   ;;  %s2799_s2 = inlined_call_operand.vmem [shape: f32[2], index: 2, kind: input, shape index: {}]   ;;  %s2800_s3 = inlined_call_operand.hbm [shape: f32[2,4,256], index: 3, kind: output, shape index: {}]  }
   0x1   :  { %10 = vsyncpa [#allocation5 + $0x1], 0 }
   0x2   :  { %11 = vsyncpa [#allocation7], 0 }
   0x3   :  { %12 = vsyncpa [#allocation10], 0 }
   0x4   :  { %13 = vsyncpa [#allocation6], 0 }
   0x5   :  { %15 = vsyncpa [#allocation6 + $0x1], 0  ;;  %s2017_s12 = smov 0   ;;  %s2019_s13 = smov 0  }
   0x6   :  { %s2021_s14 = smov 0   ;;  %s2023_s15 = smov 0  }
   0x7 LB: > { %s2038_s16 = sadd.s32 4294967295, %s1968_s15   ;;  %s1624_s17 = sadd.s32 4294967294, %s1968_s15   ;;  %s1968_s15 = sphi %s2023_s15, %s2848_s15   ;;  %s1964_s14 = sphi %s2021_s14, %s2847_s14   ;;  %s1960_s13 = sphi %s2019_s13, %s2846_s13   ;;  %s1956_s12 = sphi %s2017_s12, %s2845_s12  }
   0x8   : > { %p41_p0 = scmp.ne.s32.totalorder %s1960_s13, %s1956_s12  ;;  %p2801_p1 = scmp.eq.s32.totalorder %s2038_s16, 0 }
   0x9   : > { %p113_p3 = scmp.eq.s32.totalorder %s1624_s17, 1  ;;  %p1625_p5 = scmp.ge.s32.totalorder %s1968_s15, 1 }
   0xa   : > { %p2047_p4 = por %p2801_p1, %p41_p0  ;;  %p120_p7 = scmp.lt.s32.totalorder %s1968_s15, 3 }
   0xb   : > { %p2052_p6 = por %p113_p3, %p41_p0  ;;  %s133_s22 = sshll.u32 %s2798_s1, 4  ;;  %s134_s22 = int_to_ptr.vmem [resolvable:$true] %s133_s22 }
   0xc   : > { %s2805_s18 = scalar_select %p2047_p4, 1, 0 }
   0xd   : > { %s2806_s19 = scalar_select %p2052_p6, 1, 0 }
   0xe   : > { %p2060_p8 = pnand %p1625_p5, %p120_p7  ;;  %s144_s26 = sshll.u32 %s2799_s2, 4  ;;  %s145_s26 = int_to_ptr.vmem [resolvable:$true] %s144_s26 }
   0xf   : > { %s2077_s28 = sadd.s32 1, %s1968_s15   ;;  %s1838_s30 = scalar_lea.vmem %s134_s22, 16 }
  0x10   : > { %s2807_s23 = scalar_select %p2060_p8, 1, 0 }
  0x11   : > { %p1755_p10 = pneg %p2060_p8  ;;  %s25_s29 = ssub.s32 %s1968_s15, %s2077_s28 }
  0x12   : > { %p1839_p12 = scmp.ne.s32.totalorder %s134_s22, %s1838_s30  ;;  %p1846_p5 = scmp.lt.s32.totalorder %s134_s22, %s134_s22 }
  0x13   : > { %p2072_p11 = pnand %p1755_p10, %p2801_p1  ;;  %p1847_p7 = scmp.lt.s32.totalorder %s1838_s30, %s1838_s30 }
  0x15   : > { %p1840_p13 = pneg %p2072_p11  ;;  %p1848_p9 = por %p1847_p7, %p1846_p5 }
  0x17   : > { %p1841_p0 = pnand %p1840_p13, %p1839_p12 }
  0x19   : > { %p1842_p3 = pneg %p1841_p0 }
  0x1b   : > { %p1849_p2 = pnand %p1848_p9, %p1842_p3 }
  0x1d   : > { %1852 = shalt.err (!%p1849_p2)
}
  0x1e   : > { %s1970_s4 = smov [#allocation8]   ;;  %s1853_s5 = scalar_lea.vmem %s145_s26, 16 }
  0x1f   : > { %1758 = dma.vmem_to_smem (!%p2072_p11), %s134_s22, 16, %s1970_s4, [#allocation7]  }
  0x20   : > { %p1854_p10 = scmp.ne.s32.totalorder %s145_s26, %s1853_s5  ;;  %p1861_p4 = scmp.lt.s32.totalorder %s145_s26, %s145_s26 }
  0x21   : > { %p1862_p8 = scmp.lt.s32.totalorder %s1853_s5, %s1853_s5 }
  0x22   : > { %p1856_p1 = pnand %p1854_p10, %p1840_p13 }
  0x23   : > { %p1863_p12 = por %p1862_p8, %p1861_p4 }
  0x24   : > { %p1857_p6 = pneg %p1856_p1 }
  0x26   : > { %p1864_p0 = pnand %p1863_p12, %p1857_p6 }
  0x28   : > { %1867 = shalt.err (!%p1864_p0)
}
  0x29   : > { %s1971_s6 = smov [#allocation9]   ;;  %p26_p2 = scmp.eq.s32.totalorder %s25_s29, 0 }
  0x2a   : > { %1761 = dma.vmem_to_smem (!%p2072_p11), %s145_s26, 16, %s1971_s6, [#allocation10]  }
  0x2b   : > { %s28_s7 = sadd.s32 1, %s1964_s14  ;;  %p35_p1 = scmp.ne.s32.totalorder %s1964_s14, %s1960_s13 }
  0x2c   : > { %p36_p9 = scmp.eq.s32.totalorder %s1968_s15, 0  ;;  %p2809_p6 = scmp.eq.s32.totalorder %s2038_s16, 1 }
  0x2d   : > { %s2092_s8 = scalar_select %p26_p2, %s1964_s14, %s28_s7  }
  0x2e   : > { %p37_p4 = por %p36_p9, %p35_p1  ;;  %p2096_p8 = por %p2809_p6, %p35_p1 }
  0x2f   : > { %p1772_p13 = scmp.lt.s32.totalorder %s1968_s15, 2  ;;  %s155_s10 = sand.u32 1, %s1964_s14  }
  0x30   : > { %s2810_s9 = scalar_select %p2096_p8, 1, 0 }
  0x31   : > { %s1629_s11 = sshll.u32 %s155_s10, 3  ;;  %s1741_s17 = sshll.u32 %s1968_s15, 7 }
  0x32   : > { %s2106_s22 = scalar_lea.hbm %s2797_s0, %s1741_s17  ;;  %s159_s24 = scalar_lea.vmem [#allocation4], %s1629_s11 }
  0x33   : > { %s167_s25 = sshll.u32 %s159_s24, 4  ;;  %p2108_p11 = pnand %p1772_p13, %p37_p4  ;;  %s168_s25 = int_to_ptr.vmem [resolvable:$true] %s167_s25 }
  0x34   : > { %s156_s27 = scalar_lea.sflag [#allocation5], %s155_s10  ;;  %s1868_s29 = scalar_lea.hbm %s2106_s22, 128 }
  0x35   : > { %p1869_p3 = scmp.ne.s32.totalorder %s2106_s22, %s1868_s29  ;;  %p1870_p5 = pneg %p2108_p11 }
  0x36   : > { %s1873_s5 = scalar_lea.hbm %s2797_s0, 256  ;;  %p1874_p12 = scmp.lt.s32.totalorder %s2106_s22, %s2797_s0 }
  0x37   : > { %p1871_p7 = pnand %p1870_p5, %p1869_p3  ;;  %p1875_p0 = scmp.lt.s32.totalorder %s1873_s5, %s1868_s29 }
  0x39   : > { %p1872_p10 = pneg %p1871_p7  ;;  %p1876_p2 = por %p1875_p0, %p1874_p12 }
  0x3b   : > { %p1877_p1 = pnand %p1876_p2, %p1872_p10 }
  0x3d   : > { %1880 = shalt.err (!%p1877_p1)
}
  0x3e   : > { %s1881_s11 = scalar_lea.vmem %s168_s25, 128  ;;  %s1972_s10 = smov [#allocation4]  }
  0x3f   : > { %p1882_p9 = scmp.ne.s32.totalorder %s168_s25, %s1881_s11  ;;  %s1886_s17 = sshll.u32 %s1972_s10, 4  ;;  %s1887_s17 = int_to_ptr.vmem [resolvable:$false] %s1886_s17 }
  0x40   : > { %s1888_s20 = scalar_lea.vmem %s1887_s17, 256  ;;  %p1889_p13 = scmp.lt.s32.totalorder %s168_s25, %s1887_s17 }
  0x41   : > { %p1884_p4 = pnand %p1882_p9, %p1870_p5  ;;  %p1890_p3 = scmp.lt.s32.totalorder %s1888_s20, %s1881_s11 }
  0x43   : > { %p1885_p6 = pneg %p1884_p4  ;;  %p1891_p7 = por %p1890_p3, %p1889_p13 }
  0x45   : > { %p1892_p8 = pnand %p1891_p7, %p1885_p6 }
  0x47   : > { %1895 = shalt.err (!%p1892_p8)
}
  0x48   : > { %1765 = dma.hbm_to_vmem [thread:$0]  (!%p2108_p11), %s2106_s22, 128, %s168_s25, %s156_s27  }
  0x49   : > { %p2812_p10 = scmp.ne.s32.totalorder %s2807_s23, 0 }
  0x4a   : > { %s2129_s21 = sand.u32 (!%p2812_p10), 1, %s1960_s13   ;;  %p2813_p8 = scmp.ne.s32.totalorder (!%p2812_p10), %s2805_s18, 0 }
  0x4b   : > { %176 = sbr.rel (%p2812_p10) target bundleno = 826 (0x33a), region = 32  ;;  %s1633_s24 = sshll.u32 (!%p2812_p10), %s2129_s21, 3 }
  0x4c   : > { %s179_s29 = scalar_lea.sflag (!%p2812_p10), [#allocation5], %s2129_s21  ;;  %s2135_s30 = scalar_lea.vmem (!%p2812_p10), [#allocation4], %s1633_s24 }
  0x50   : > { %1939 = dma.done.wait (%p2813_p8), %s179_s29, 128  }
  0x51   : > { %1941 = vsyncadd (%p2813_p8), %s179_s29, 4294967168  ;;  %p2814_p11 = scmp.eq.s32.totalorder %s2038_s16, 0 }
  0x53   : > { %1943 = dma.done.wait (%p2814_p11), [#allocation7], 16   ;;  %p2815_p5 = pmov %p2814_p11 }
  0x55   : > { %1945 = vsyncadd (%p2815_p5), [#allocation7], 4294967280  ;;  %p2816_p12 = pmov %p2815_p5 }
  0x56   : > { %p2817_p0 = pmov %p2815_p5 }
  0x57   : > { %1947 = dma.done.wait (%p2816_p12), [#allocation10], 16  }
  0x58   : > { %1949 = vsyncadd (%p2817_p0), [#allocation10], 4294967280 }
  0x59   : > { %195 = sfence }
  0x5a   : > { %v214_v0 = vld [vmem:[%s2135_s30] sm:$0xff]  ;;  %vm218_vm0 = vcmask 1043456   ;;  %vm251_vm1 = vcmask 23552   ;;  %v1973_v3 = vmov 0.0   ;;  %vm254_vm2 = vcmask 179352   ;;  %s1974_s18 = smov 99  }
  0x5b   : > { %v219_v1 = vsel %vm218_vm0, %v214_v0, -inf  ;;  %v216_v2 = vcombine.high %v214_v0, %v214_v0  ;;  %252 = vst.msk [vmem:[#allocation2 + $0x3] sm:$0xff] %vm251_vm1, %v1973_v3  ;;  %249 = vst [vmem:[#allocation2] sm:$0x7] %v1973_v3  ;;  %s1975_s23 = smov 3   ;;  %v233_v14 = vsel %vm218_vm0, %v214_v0, 0.0 }
  0x5c   : > { %250 = vst [vmem:[#allocation2 + $0x13] sm:$0x7] %v1973_v3  ;;  %253 = vst.msk [vmem:[#allocation2 + $0xb] sm:$0xff] %vm251_vm1, %v1973_v3  ;;  %v220_v4 = vrot.slane %v219_v1, 4  ;;  %s1976_s22 = smov 83   ;;  %s1977_s25 = smov 115  }
  0x5d   : > { %325 = vst [vmem:[#allocation2 + $0xa8] sm:$0x7] %v1973_v3  ;;  %326 = vst [vmem:[#allocation2 + $0xbb] sm:$0x7] %v1973_v3  ;;  %v226_v5 = vsel %vm218_vm0, %v216_v2, -inf  ;;  %v234_v16 = vrot.slane %v233_v14, 4 }
  0x5e   : > { %327 = vst.msk [vmem:[#allocation2 + $0xab] sm:$0xff] %vm251_vm1, %v1973_v3  ;;  %328 = vst.msk [vmem:[#allocation2 + $0xb3] sm:$0xff] %vm251_vm1, %v1973_v3  ;;  %v221_v6 = vmax.f32 %v219_v1, %v220_v4  ;;  %v227_v8 = vrot.slane %v226_v5, 4  ;;  %s1978_s26 = smov 51   ;;  %s1979_s27 = smov 67   ;;  %v240_v24 = vsel %vm218_vm0, %v216_v2, 0.0 }
  0x5f   : > { %255 = vst.msk [vmem:[#allocation2 + $0x3] sm:$0xff] %vm254_vm2, %v1973_v3  ;;  %256 = vst.msk [vmem:[#allocation2 + $0xb] sm:$0xff] %vm254_vm2, %v1973_v3  ;;  %v235_v18 = vadd.f32 %v234_v16, %v233_v14  ;;  %s1980_s4 = smov 19   ;;  %s1981_s5 = smov 35   ;;  %vm261_vm3 = vcmask 147480   ;;  %v241_v41 = vrot.slane %v240_v24, 4 }
  0x60   : > { %329 = vst.msk [vmem:[#allocation2 + $0xab] sm:$0xff] %vm254_vm2, %v1973_v3  ;;  %330 = vst.msk [vmem:[#allocation2 + $0xb3] sm:$0xff] %vm254_vm2, %v1973_v3  ;;  %v222_v7 = vrot.slane %v221_v6, 2  ;;  %v228_v11 = vmax.f32 %v226_v5, %v227_v8  ;;  %s1982_s6 = smov 126   ;;  %s1983_s7 = smov 127  }
  0x61   : > { %v236_v20 = vrot.slane %v235_v18, 2  ;;  %s1984_s11 = smov 125   ;;  %v242_v44 = vadd.f32 %v241_v41, %v240_v24  ;;  %s1985_s10 = smov 124  }
  0x62   : > { %v223_v9 = vmax.f32 %v221_v6, %v222_v7  ;;  %v229_v13 = vrot.slane %v228_v11, 2  ;;  %s1986_s17 = smov 123   ;;  %s1987_s20 = smov 122  }
  0x63   : > { %v237_v21 = vadd.f32 %v236_v20, %v235_v18  ;;  %v243_v48 = vrot.slane %v242_v44, 2  ;;  %s523_s29 = sld [smem:[#allocation8]]  ;;  %p2842_p1 = scmp.ne.s32.totalorder %s2810_s9, 0 }
  0x64   : > { %v224_v10 = vrot.slane %v223_v9, 1  ;;  %v230_v15 = vmax.f32 %v228_v11, %v229_v13 }
  0x65   : > { %v238_v22 = vrot.slane %v237_v21, 1  ;;  %v244_v50 = vadd.f32 %v243_v48, %v242_v44 }
  0x66   : > { %v225_v12 = vmax.f32 %v223_v9, %v224_v10  ;;  %v231_v17 = vrot.slane %v230_v15, 1 }
  0x67   : > { %v239_v23 = vadd.f32 %v238_v22, %v237_v21  ;;  %v245_v51 = vrot.slane %v244_v50, 1 }
  0x68   : > { %267 = vrot.lane.b32.xlu1 %v225_v12, %s1974_s18  ;;  %258 = vrot.lane.b32.xlu0 %v225_v12, %s1975_s23  ;;  %v232_v19 = vmax.f32 %v230_v15, %v231_v17 }
  0x69   : > { %v247_v25 = vmul.f32 0.25, %v239_v23  ;;  %v246_v52 = vadd.f32 %v245_v51, %v244_v50  ;;  %v526_v55 = vstv %s523_s29  ;;  %s2252_s29 = sld [smem:[#allocation8 + $0xf]] }
  0x6b   : > { %v248_v53 = vmul.f32 0.25, %v246_v52 }
  0x6c   : > { %271 = vrot.lane.b32.xlu1 %v225_v12, %s1976_s22  ;;  %263 = vrot.lane.b32.xlu0 %v225_v12, %s1977_s25 }
  0x70   : > { %279 = vrot.lane.b32.xlu1 %v225_v12, %s1978_s26  ;;  %275 = vrot.lane.b32.xlu0 %v225_v12, %s1979_s27 }
  0x74   : > { %287 = vrot.lane.b32.xlu1 %v225_v12, %s1980_s4  ;;  %283 = vrot.lane.b32.xlu0 %v225_v12, %s1981_s5 }
  0x78   : > { %296 = vrot.lane.b32.xlu1 %v232_v19, %s1977_s25  ;;  %292 = vrot.lane.b32.xlu0 %v232_v19, %s1975_s23 }
  0x7c   : > { %304 = vrot.lane.b32.xlu1 %v232_v19, %s1976_s22  ;;  %300 = vrot.lane.b32.xlu0 %v232_v19, %s1974_s18 }
  0x80   : > { %312 = vrot.lane.b32.xlu1 %v232_v19, %s1978_s26  ;;  %308 = vrot.lane.b32.xlu0 %v232_v19, %s1979_s27 }
  0x84   : > { %320 = vrot.lane.b32.xlu1 %v232_v19, %s1980_s4  ;;  %316 = vrot.lane.b32.xlu0 %v232_v19, %s1981_s5 }
  0x88   : > { %332 = vrot.lane.b32.xlu1 %v247_v25, %s1975_s23  ;;  %336 = vrot.lane.b32.xlu0 %v247_v25, %s1977_s25 }
  0xda   : > { %v268_v26 = vpop.permute.xlu1 %267  ;;  %v259_v27 = vpop.permute.xlu0 %258 }
  0xdb   : > { %270 = vst.msk [vmem:[#allocation2 + $0x5] sm:$0x1] %vm261_vm3, %v268_v26  ;;  %262 = vst.msk [vmem:[#allocation2 + $0x3] sm:$0x1] %vm261_vm3, %v259_v27 }
  0xde   : > { %v272_v28 = vpop.permute.xlu1 %271  ;;  %v264_v29 = vpop.permute.xlu0 %263 }
  0xdf   : > { %274 = vst.msk [vmem:[#allocation2 + $0x6] sm:$0x1] %vm261_vm3, %v272_v28  ;;  %266 = vst.msk [vmem:[#allocation2 + $0x4] sm:$0x1] %vm261_vm3, %v264_v29 }
  0xe2   : > { %v280_v30 = vpop.permute.xlu1 %279  ;;  %v276_v31 = vpop.permute.xlu0 %275 }
  0xe3   : > { %282 = vst.msk [vmem:[#allocation2 + $0x8] sm:$0x1] %vm261_vm3, %v280_v30  ;;  %278 = vst.msk [vmem:[#allocation2 + $0x7] sm:$0x1] %vm261_vm3, %v276_v31 }
  0xe6   : > { %v288_v32 = vpop.permute.xlu1 %287  ;;  %v284_v33 = vpop.permute.xlu0 %283 }
  0xe7   : > { %290 = vst.msk [vmem:[#allocation2 + $0xa] sm:$0x1] %vm261_vm3, %v288_v32  ;;  %286 = vst.msk [vmem:[#allocation2 + $0x9] sm:$0x1] %vm261_vm3, %v284_v33 }
  0xea   : > { %v2180_v34 = vld [vmem:[#allocation2] sm:$0xff]  ;;  %v297_v35 = vpop.permute.xlu1 %296  ;;  %v293_v36 = vpop.permute.xlu0 %292 }
  0xeb   : > { %299 = vst.msk [vmem:[#allocation2 + $0xc] sm:$0x1] %vm261_vm3, %v297_v35  ;;  %295 = vst.msk [vmem:[#allocation2 + $0xb] sm:$0x1] %vm261_vm3, %v293_v36  ;;  %410 = vrot.lane.b32.xlu1 %v2180_v34, %s1982_s6  ;;  %400 = vrot.lane.b32.xlu0 %v2180_v34, %s1983_s7  ;;  %v532_v62 = vld [vmem:[#allocation2 + $0x1] sm:$0xff]  ;;  %v527_v4 = vmul.f32 %v526_v55, %v2180_v34 }
  0xee   : > { %v305_v37 = vpop.permute.xlu1 %304  ;;  %v301_v38 = vpop.permute.xlu0 %300  ;;  %v540_v0 = vld [vmem:[#allocation2 + $0x2] sm:$0xff] }
  0xef   : > { %307 = vst.msk [vmem:[#allocation2 + $0xe] sm:$0x1] %vm261_vm3, %v305_v37  ;;  %303 = vst.msk [vmem:[#allocation2 + $0xd] sm:$0x1] %vm261_vm3, %v301_v38  ;;  %420 = vrot.lane.b32.xlu0 %v2180_v34, %s1984_s11  ;;  %v548_v14 = vld [vmem:[#allocation2 + $0x3] sm:$0xff] }
  0xf2   : > { %v313_v39 = vpop.permute.xlu1 %312  ;;  %v309_v40 = vpop.permute.xlu0 %308  ;;  %v556_v18 = vld [vmem:[#allocation2 + $0x4] sm:$0xff] }
  0xf3   : > { %315 = vst.msk [vmem:[#allocation2 + $0x10] sm:$0x1] %vm261_vm3, %v313_v39  ;;  %311 = vst.msk [vmem:[#allocation2 + $0xf] sm:$0x1] %vm261_vm3, %v309_v40  ;;  %344 = vrot.lane.b32.xlu0 %v247_v25, %s1976_s22  ;;  %v564_v29 = vld [vmem:[#allocation2 + $0x5] sm:$0xff] }
  0xf6   : > { %v321_v42 = vpop.permute.xlu1 %320  ;;  %v317_v43 = vpop.permute.xlu0 %316  ;;  %v572_v33 = vld [vmem:[#allocation2 + $0x6] sm:$0xff] }
  0xf7   : > { %323 = vst.msk [vmem:[#allocation2 + $0x12] sm:$0x1] %vm261_vm3, %v321_v42  ;;  %319 = vst.msk [vmem:[#allocation2 + $0x11] sm:$0x1] %vm261_vm3, %v317_v43 }
  0xfa   : > { %v525_v45 = vld [vmem:[#allocation2 + $0x8] sm:$0xff]  ;;  %v333_v46 = vpop.permute.xlu1 %332  ;;  %v337_v47 = vpop.permute.xlu0 %336 }
  0xfb   : > { %402 = vrot.lane.b32.xlu1 %v525_v45, %s1983_s7  ;;  %335 = vst.msk [vmem:[#allocation2 + $0xab] sm:$0x1] %vm261_vm3, %v333_v46  ;;  %339 = vst.msk [vmem:[#allocation2 + $0xac] sm:$0x1] %vm261_vm3, %v337_v47  ;;  %v533_v54 = vld [vmem:[#allocation2 + $0x9] sm:$0xff]  ;;  %v528_v58 = vmul.f32 %v526_v55, %v525_v45  ;;  %v598_v47 = vstv %s2252_s29  ;;  %s2287_s29 = sld [smem:[#allocation8 + $0x1e]] }
  0xfe   : > { %v399_v49 = vld [vmem:[#allocation2 + $0x10] sm:$0x3f] }
  0xff   : > { %340 = vrot.lane.b32.xlu1 %v247_v25, %s1974_s18  ;;  %404 = vrot.lane.b32.xlu0 %v399_v49, %s1983_s7  ;;  %v541_v57 = vld [vmem:[#allocation2 + $0xa] sm:$0xff] }
 0x100   : > { %v549_v1 = vld [vmem:[#allocation2 + $0xb] sm:$0xff] }
 0x101   : > { %v557_v10 = vld [vmem:[#allocation2 + $0xc] sm:$0xff] }
 0x102   : > { %v565_v19 = vld [vmem:[#allocation2 + $0xd] sm:$0xff] }
 0x103   : > { %348 = vrot.lane.b32.xlu1 %v247_v25, %s1979_s27  ;;  %352 = vrot.lane.b32.xlu0 %v247_v25, %s1978_s26  ;;  %v573_v27 = vld [vmem:[#allocation2 + $0xe] sm:$0xff] }
 0x107   : > { %356 = vrot.lane.b32.xlu1 %v247_v25, %s1981_s5  ;;  %360 = vrot.lane.b32.xlu0 %v247_v25, %s1980_s4 }
 0x10b   : > { %414 = vrot.lane.b32.xlu1 %v399_v49, %s1982_s6  ;;  %412 = vrot.lane.b32.xlu0 %v525_v45, %s1982_s6 }
 0x10f   : > { %365 = vrot.lane.b32.xlu1 %v248_v53, %s1975_s23  ;;  %369 = vrot.lane.b32.xlu0 %v248_v53, %s1977_s25  ;;  %s1638_s23 = sld [smem:[#allocation8 + $0xe]] }
 0x110   : > { %s2232_s25 = sld [smem:[#allocation8 + $0x1c]] }
 0x113   : > { %373 = vrot.lane.b32.xlu1 %v248_v53, %s1974_s18  ;;  %377 = vrot.lane.b32.xlu0 %v248_v53, %s1976_s22  ;;  %s1637_s18 = sld [smem:[#allocation8 + $0x7]] }
 0x114   : > { %s2230_s22 = sld [smem:[#allocation8 + $0x15]] }
 0x115   : > { %v542_v60 = vstv %s1638_s23  ;;  %s2256_s23 = sld [smem:[#allocation8 + $0x1d]] }
 0x116   : > { %v544_v61 = vmul.f32 %v542_v60, %v541_v57  ;;  %v543_v8 = vmul.f32 %v542_v60, %v540_v0  ;;  %v558_v15 = vstv %s2232_s25  ;;  %s2263_s25 = sld [smem:[#allocation8 + $0x2b]] }
 0x117   : > { %422 = vrot.lane.b32.xlu1 %v525_v45, %s1984_s11  ;;  %385 = vrot.lane.b32.xlu0 %v248_v53, %s1978_s26  ;;  %s2239_s26 = sld [smem:[#allocation8 + $0x23]]  ;;  %v560_v17 = vmul.f32 %v558_v15, %v557_v10  ;;  %v559_v25 = vmul.f32 %v558_v15, %v556_v18 }
 0x119   : > { %v534_v56 = vstv %s1637_s18  ;;  %s2254_s18 = sld [smem:[#allocation8 + $0x16]] }
 0x11a   : > { %v536_v59 = vmul.f32 %v534_v56, %v533_v54  ;;  %v535_v5 = vmul.f32 %v534_v56, %v532_v62  ;;  %v550_v7 = vstv %s2230_s22  ;;  %s2260_s22 = sld [smem:[#allocation8 + $0x24]] }
 0x11b   : > { %381 = vrot.lane.b32.xlu1 %v248_v53, %s1979_s27  ;;  %424 = vrot.lane.b32.xlu0 %v399_v49, %s1984_s11  ;;  %v552_v9 = vmul.f32 %v550_v7, %v549_v1  ;;  %s2245_s27 = sld [smem:[#allocation8 + $0x2a]]  ;;  %v551_v21 = vmul.f32 %v550_v7, %v548_v14 }
 0x11c   : > { %v538_v63 = vadd.f32 %v536_v59, %v528_v58  ;;  %v537_v12 = vadd.f32 %v535_v5, %v527_v4  ;;  %v614_v58 = vstv %s2256_s23  ;;  %s2295_s23 = sld [smem:[#allocation8 + $0x2c]] }
 0x11d   : > { %v566_v23 = vstv %s2239_s26  ;;  %s2266_s26 = sld [smem:[#allocation8 + $0x2]] }
 0x11e   : > { %v546_v6 = vadd.f32 %v544_v61, %v538_v63  ;;  %v545_v16 = vadd.f32 %v543_v8, %v537_v12  ;;  %v568_v26 = vmul.f32 %v566_v23, %v565_v19  ;;  %v567_v36 = vmul.f32 %v566_v23, %v564_v29 }
 0x11f   : > { %389 = vrot.lane.b32.xlu1 %v248_v53, %s1981_s5  ;;  %393 = vrot.lane.b32.xlu0 %v248_v53, %s1980_s4  ;;  %s1643_s4 = sld [smem:[#allocation8 + $0x1]]  ;;  %v606_v54 = vstv %s2254_s18 }
 0x120   : > { %v554_v13 = vadd.f32 %v552_v9, %v546_v6  ;;  %v553_v24 = vadd.f32 %v551_v21, %v545_v16  ;;  %s2250_s5 = sld [smem:[#allocation8 + $0x8]]  ;;  %v630_v9 = vstv %s2263_s25 }
 0x121   : > { %v574_v30 = vstv %s2245_s27  ;;  %s2274_s27 = sld [smem:[#allocation8 + $0x9]] }
 0x122   : > { %v562_v22 = vadd.f32 %v560_v17, %v554_v13  ;;  %v561_v31 = vadd.f32 %v559_v25, %v553_v24  ;;  %v576_v32 = vmul.f32 %v574_v30, %v573_v27  ;;  %v575_v40 = vmul.f32 %v574_v30, %v572_v33  ;;  %s2292_s18 = sld [smem:[#allocation8 + $0x25]] }
 0x123   : > { %430 = vrot.lane.b32.xlu1 %v2180_v34, %s1985_s10  ;;  %432 = vrot.lane.b32.xlu0 %v525_v45, %s1985_s10  ;;  %s2303_s25 = sld [smem:[#allocation8 + $0xa]] }
 0x124   : > { %v570_v28 = vadd.f32 %v568_v26, %v562_v22  ;;  %v569_v39 = vadd.f32 %v567_v36, %v561_v31 }
 0x126   : > { %v578_v37 = vadd.f32 %v576_v32, %v570_v28  ;;  %v577_v46 = vadd.f32 %v575_v40, %v569_v39 }
 0x127   : > { %434 = vrot.lane.b32.xlu1 %v399_v49, %s1985_s10  ;;  %440 = vrot.lane.b32.xlu0 %v2180_v34, %s1986_s17  ;;  %v646_v36 = vstv %s2274_s27  ;;  %s2310_s27 = sld [smem:[#allocation8 + $0x18]] }
 0x12b   : > { %442 = vrot.lane.b32.xlu1 %v525_v45, %s1986_s17  ;;  %444 = vrot.lane.b32.xlu0 %v399_v49, %s1986_s17 }
 0x12f   : > { %450 = vrot.lane.b32.xlu1 %v2180_v34, %s1987_s20  ;;  %452 = vrot.lane.b32.xlu0 %v525_v45, %s1987_s20  ;;  %v582_v34 = vstv %s1643_s4  ;;  %v590_v45 = vstv %s2250_s5  ;;  %s2279_s4 = sld [smem:[#allocation8 + $0x10]] }
 0x130   : > { %s2284_s5 = sld [smem:[#allocation8 + $0x17]] }
 0x133   : > { %454 = vrot.lane.b32.xlu1 %v399_v49, %s1987_s20 }
 0x15d   : > { %v2234_v2 = vpop.permute.xlu1 %410  ;;  %v401_v3 = vpop.permute.xlu0 %400 }
 0x15e   : > { %417 = vst [vmem:[#allocation2 + $0x30] sm:$0xff] %v2234_v2  ;;  %407 = vst [vmem:[#allocation2 + $0x18] sm:$0xff] %v401_v3  ;;  %v583_v43 = vmul.f32 %v582_v34, %v401_v3  ;;  %v622_v3 = vstv %s2260_s22  ;;  %s2299_s22 = sld [smem:[#allocation8 + $0x3]] }
 0x160   : > { %v585_v51 = vadd.f32 %v583_v43, %v577_v46 }
 0x161   : > { %v2241_v11 = vpop.permute.xlu0 %420 }
 0x162   : > { %427 = vst [vmem:[#allocation2 + $0x48] sm:$0xff] %v2241_v11 }
 0x165   : > { %v345_v20 = vpop.permute.xlu0 %344 }
 0x166   : > { %347 = vst.msk [vmem:[#allocation2 + $0xae] sm:$0x1] %vm261_vm3, %v345_v20  ;;  %v638_v20 = vstv %s2266_s26  ;;  %s2307_s26 = sld [smem:[#allocation8 + $0x11]] }
 0x167   : > { %v639_v29 = vmul.f32 %v638_v20, %v2234_v2  ;;  %v654_v2 = vstv %s2279_s4  ;;  %s2314_s4 = sld [smem:[#allocation8 + $0x1f]] }
 0x16d   : > { %v403_v35 = vpop.permute.xlu1 %402 }
 0x16e   : > { %408 = vst [vmem:[#allocation2 + $0x20] sm:$0xff] %v403_v35  ;;  %v584_v38 = vmul.f32 %v582_v34, %v403_v35 }
 0x170   : > { %v586_v41 = vadd.f32 %v584_v38, %v578_v37 }
 0x171   : > { %v341_v42 = vpop.permute.xlu1 %340  ;;  %v405_v44 = vpop.permute.xlu0 %404 }
 0x172   : > { %343 = vst.msk [vmem:[#allocation2 + $0xad] sm:$0x1] %vm261_vm3, %v341_v42  ;;  %409 = vst [vmem:[#allocation2 + $0x28] sm:$0x3f] %v405_v44 }
 0x175   : > { %v588_v48 = vld [vmem:[#allocation2 + $0x19] sm:$0xff]  ;;  %v349_v50 = vpop.permute.xlu1 %348  ;;  %v353_v53 = vpop.permute.xlu0 %352 }
 0x176   : > { %v596_v49 = vld [vmem:[#allocation2 + $0x1a] sm:$0xff]  ;;  %v591_v52 = vmul.f32 %v590_v45, %v588_v48  ;;  %351 = vst.msk [vmem:[#allocation2 + $0xaf] sm:$0x1] %vm261_vm3, %v349_v50  ;;  %355 = vst.msk [vmem:[#allocation2 + $0xb0] sm:$0x1] %vm261_vm3, %v353_v53 }
 0x177   : > { %v604_v55 = vld [vmem:[#allocation2 + $0x1b] sm:$0xff]  ;;  %v599_v57 = vmul.f32 %v598_v47, %v596_v49 }
 0x178   : > { %v593_v56 = vadd.f32 %v591_v52, %v585_v51  ;;  %v612_v59 = vld [vmem:[#allocation2 + $0x1c] sm:$0xff]  ;;  %v607_v62 = vmul.f32 %v606_v54, %v604_v55  ;;  %v670_v55 = vstv %s2287_s29  ;;  %s2323_s29 = sld [smem:[#allocation8 + $0x2d]] }
 0x179   : > { %v357_v60 = vpop.permute.xlu1 %356  ;;  %v589_v63 = vld [vmem:[#allocation2 + $0x21] sm:$0xff]  ;;  %v361_v1 = vpop.permute.xlu0 %360  ;;  %v615_v7 = vmul.f32 %v614_v58, %v612_v59 }
 0x17a   : > { %v601_v61 = vadd.f32 %v599_v57, %v593_v56  ;;  %v597_v0 = vld [vmem:[#allocation2 + $0x22] sm:$0xff]  ;;  %359 = vst.msk [vmem:[#allocation2 + $0xb1] sm:$0x1] %vm261_vm3, %v357_v60  ;;  %v592_v5 = vmul.f32 %v590_v45, %v589_v63  ;;  %363 = vst.msk [vmem:[#allocation2 + $0xb2] sm:$0x1] %vm261_vm3, %v361_v1  ;;  %v678_v63 = vstv %s2292_s18  ;;  %s2330_s18 = sld [smem:[#allocation8 + $0x4]] }
 0x17b   : > { %v620_v4 = vld [vmem:[#allocation2 + $0x1d] sm:$0xff]  ;;  %v600_v13 = vmul.f32 %v598_v47, %v597_v0  ;;  %v621_v25 = vld [vmem:[#allocation2 + $0x25] sm:$0xff]  ;;  %v662_v47 = vstv %s2284_s5  ;;  %s2317_s5 = sld [smem:[#allocation8 + $0x26]] }
 0x17c   : > { %v609_v6 = vadd.f32 %v607_v62, %v601_v61  ;;  %v605_v8 = vld [vmem:[#allocation2 + $0x23] sm:$0xff]  ;;  %v594_v12 = vadd.f32 %v592_v5, %v586_v41  ;;  %v623_v17 = vmul.f32 %v622_v3, %v620_v4  ;;  %v624_v34 = vmul.f32 %v622_v3, %v621_v25 }
 0x17d   : > { %v628_v10 = vld [vmem:[#allocation2 + $0x1e] sm:$0xff]  ;;  %v2277_v14 = vld [vmem:[#allocation2 + $0xa8] sm:$0xff]  ;;  %v415_v15 = vpop.permute.xlu1 %414  ;;  %v413_v19 = vpop.permute.xlu0 %412  ;;  %v608_v22 = vmul.f32 %v606_v54, %v605_v8  ;;  %v686_v8 = vstv %s2295_s23  ;;  %v702_v25 = vstv %s2303_s25  ;;  %s2339_s23 = sld [smem:[#allocation8 + $0xb]] }
 0x17e   : > { %v617_v16 = vadd.f32 %v615_v7, %v609_v6  ;;  %v613_v18 = vld [vmem:[#allocation2 + $0x24] sm:$0xff]  ;;  %419 = vst [vmem:[#allocation2 + $0x40] sm:$0x3f] %v415_v15  ;;  %463 = vrot.lane.b32.xlu0 %v2277_v14, %s1983_s7  ;;  %v602_v21 = vadd.f32 %v600_v13, %v594_v12  ;;  %418 = vst [vmem:[#allocation2 + $0x38] sm:$0xff] %v413_v19  ;;  %v631_v24 = vmul.f32 %v630_v9, %v628_v10  ;;  %s2352_s25 = sld [smem:[#allocation8 + $0x19]] }
 0x17f   : > { %v616_v27 = vmul.f32 %v614_v58, %v613_v18  ;;  %v629_v31 = vld [vmem:[#allocation2 + $0x26] sm:$0xff]  ;;  %v640_v45 = vmul.f32 %v638_v20, %v413_v19  ;;  %v694_v18 = vstv %s2299_s22  ;;  %s2342_s22 = sld [smem:[#allocation8 + $0x12]] }
 0x180   : > { %v625_v23 = vadd.f32 %v623_v17, %v617_v16  ;;  %v610_v26 = vadd.f32 %v608_v22, %v602_v21  ;;  %v632_v38 = vmul.f32 %v630_v9, %v629_v31 }
 0x181   : > { %v366_v28 = vpop.permute.xlu1 %365  ;;  %v370_v32 = vpop.permute.xlu0 %369 }
 0x182   : > { %v633_v30 = vadd.f32 %v631_v24, %v625_v23  ;;  %368 = vst.msk [vmem:[#allocation2 + $0xb3] sm:$0x1] %vm261_vm3, %v366_v28  ;;  %v618_v33 = vadd.f32 %v616_v27, %v610_v26  ;;  %372 = vst.msk [vmem:[#allocation2 + $0xb4] sm:$0x1] %vm261_vm3, %v370_v32  ;;  %v695_v28 = vmul.f32 %v694_v18, %v2241_v11  ;;  %v710_v32 = vstv %s2307_s26  ;;  %s2359_s26 = sld [smem:[#allocation8 + $0x20]] }
 0x184   : > { %v641_v35 = vadd.f32 %v639_v29, %v633_v30  ;;  %v626_v37 = vadd.f32 %v624_v34, %v618_v33 }
 0x185   : > { %v374_v39 = vpop.permute.xlu1 %373  ;;  %v644_v40 = vld [vmem:[#allocation2 + $0x31] sm:$0xff]  ;;  %v645_v41 = vld [vmem:[#allocation2 + $0x39] sm:$0xff]  ;;  %v378_v43 = vpop.permute.xlu0 %377 }
 0x186   : > { %v652_v42 = vld [vmem:[#allocation2 + $0x32] sm:$0xff]  ;;  %376 = vst.msk [vmem:[#allocation2 + $0xb5] sm:$0x1] %vm261_vm3, %v374_v39  ;;  %v634_v44 = vadd.f32 %v632_v38, %v626_v37  ;;  %v647_v46 = vmul.f32 %v646_v36, %v644_v40  ;;  %380 = vst.msk [vmem:[#allocation2 + $0xb6] sm:$0x1] %vm261_vm3, %v378_v43  ;;  %v653_v48 = vld [vmem:[#allocation2 + $0x3a] sm:$0xff]  ;;  %v648_v51 = vmul.f32 %v646_v36, %v645_v41 }
 0x187   : > { %v660_v49 = vld [vmem:[#allocation2 + $0x33] sm:$0xff]  ;;  %v655_v53 = vmul.f32 %v654_v2, %v652_v42  ;;  %v661_v56 = vld [vmem:[#allocation2 + $0x3b] sm:$0xff]  ;;  %v656_v60 = vmul.f32 %v654_v2, %v653_v48  ;;  %v718_v2 = vstv %s2310_s27  ;;  %s2373_s27 = sld [smem:[#allocation8 + $0x2e]] }
 0x188   : > { %v642_v50 = vadd.f32 %v640_v45, %v634_v44  ;;  %v649_v52 = vadd.f32 %v647_v46, %v641_v35  ;;  %v668_v57 = vld [vmem:[#allocation2 + $0x34] sm:$0xff]  ;;  %v663_v62 = vmul.f32 %v662_v47, %v660_v49  ;;  %v669_v0 = vld [vmem:[#allocation2 + $0x3c] sm:$0xff]  ;;  %v664_v4 = vmul.f32 %v662_v47, %v661_v56 }
 0x189   : > { %v423_v54 = vpop.permute.xlu1 %422  ;;  %v386_v58 = vpop.permute.xlu0 %385  ;;  %v676_v1 = vld [vmem:[#allocation2 + $0x35] sm:$0xff]  ;;  %v671_v6 = vmul.f32 %v670_v55, %v668_v57  ;;  %v677_v9 = vld [vmem:[#allocation2 + $0x3d] sm:$0xff]  ;;  %v672_v15 = vmul.f32 %v670_v55, %v669_v0  ;;  %v726_v47 = vstv %s2314_s4  ;;  %v734_v55 = vstv %s2317_s5  ;;  %s2388_s4 = sld [smem:[#allocation8 + $0xc]] }
 0x18a   : > { %428 = vst [vmem:[#allocation2 + $0x50] sm:$0xff] %v423_v54  ;;  %v650_v59 = vadd.f32 %v648_v51, %v642_v50  ;;  %v657_v61 = vadd.f32 %v655_v53, %v649_v52  ;;  %388 = vst.msk [vmem:[#allocation2 + $0xb8] sm:$0x1] %vm261_vm3, %v386_v58  ;;  %v684_v10 = vld [vmem:[#allocation2 + $0x36] sm:$0xff]  ;;  %v679_v17 = vmul.f32 %v678_v63, %v676_v1  ;;  %v685_v19 = vld [vmem:[#allocation2 + $0x3e] sm:$0xff]  ;;  %v742_v0 = vstv %s2323_s29  ;;  %s2393_s5 = sld [smem:[#allocation8 + $0x13]] }
 0x18b   : > { %v680_v21 = vmul.f32 %v678_v63, %v677_v9  ;;  %v687_v23 = vmul.f32 %v686_v8, %v684_v10  ;;  %v688_v30 = vmul.f32 %v686_v8, %v685_v19  ;;  %v696_v36 = vmul.f32 %v694_v18, %v423_v54  ;;  %s2398_s29 = sld [smem:[#allocation8 + $0x1a]] }
 0x18c   : > { %v658_v3 = vadd.f32 %v656_v60, %v650_v59  ;;  %v665_v5 = vadd.f32 %v663_v62, %v657_v61  ;;  %v750_v10 = vstv %s2330_s18  ;;  %v758_v18 = vstv %s2339_s23  ;;  %s2408_s18 = sld [smem:[#allocation8 + $0x28]] }
 0x18d   : > { %v382_v7 = vpop.permute.xlu1 %381  ;;  %v425_v12 = vpop.permute.xlu0 %424  ;;  %s2414_s23 = sld [smem:[#allocation8 + $0x2f]] }
 0x18e   : > { %384 = vst.msk [vmem:[#allocation2 + $0xb7] sm:$0x1] %vm261_vm3, %v382_v7  ;;  %v666_v13 = vadd.f32 %v664_v4, %v658_v3  ;;  %v673_v16 = vadd.f32 %v671_v6, %v665_v5  ;;  %429 = vst [vmem:[#allocation2 + $0x58] sm:$0x3f] %v425_v12 }
 0x190   : > { %v674_v20 = vadd.f32 %v672_v15, %v666_v13  ;;  %v681_v22 = vadd.f32 %v679_v17, %v673_v16 }
 0x191   : > { %v390_v24 = vpop.permute.xlu1 %389  ;;  %v700_v26 = vld [vmem:[#allocation2 + $0x49] sm:$0xff]  ;;  %v394_v27 = vpop.permute.xlu0 %393 }
 0x192   : > { %392 = vst.msk [vmem:[#allocation2 + $0xb9] sm:$0x1] %vm261_vm3, %v390_v24  ;;  %v682_v29 = vadd.f32 %v680_v21, %v674_v20  ;;  %v689_v31 = vadd.f32 %v687_v23, %v681_v22  ;;  %396 = vst.msk [vmem:[#allocation2 + $0xba] sm:$0x1] %vm261_vm3, %v394_v27  ;;  %v708_v33 = vld [vmem:[#allocation2 + $0x4a] sm:$0xff]  ;;  %v703_v37 = vmul.f32 %v702_v25, %v700_v26 }
 0x193   : > { %v716_v11 = vld [vmem:[#allocation2 + $0x4b] sm:$0xff]  ;;  %v711_v45 = vmul.f32 %v710_v32, %v708_v33  ;;  %v774_v33 = vstv %s2352_s25  ;;  %s2430_s25 = sld [smem:[#allocation8 + $0x14]] }
 0x194   : > { %v690_v34 = vadd.f32 %v688_v30, %v682_v29  ;;  %v697_v35 = vadd.f32 %v695_v28, %v689_v31  ;;  %v724_v48 = vld [vmem:[#allocation2 + $0x4c] sm:$0xff]  ;;  %v719_v51 = vmul.f32 %v718_v2, %v716_v11 }
 0x195   : > { %v2325_v38 = vld [vmem:[#allocation2 + $0xb0] sm:$0xff]  ;;  %v2327_v39 = vpop.permute.xlu1 %430  ;;  %v2333_v42 = vpop.permute.xlu0 %432  ;;  %v727_v60 = vmul.f32 %v726_v47, %v724_v48 }
 0x196   : > { %v701_v40 = vld [vmem:[#allocation2 + $0x51] sm:$0xff]  ;;  %437 = vst [vmem:[#allocation2 + $0x60] sm:$0xff] %v2327_v39  ;;  %465 = vrot.lane.b32.xlu1 %v2325_v38, %s1983_s7  ;;  %v698_v43 = vadd.f32 %v696_v36, %v690_v34  ;;  %v705_v44 = vadd.f32 %v703_v37, %v697_v35  ;;  %438 = vst [vmem:[#allocation2 + $0x68] sm:$0xff] %v2333_v42  ;;  %v751_v23 = vmul.f32 %v750_v10, %v2327_v39 }
 0x197   : > { %v709_v41 = vld [vmem:[#allocation2 + $0x52] sm:$0xff]  ;;  %v704_v46 = vmul.f32 %v702_v25, %v701_v40  ;;  %v766_v25 = vstv %s2342_s22  ;;  %v752_v31 = vmul.f32 %v750_v10, %v2333_v42  ;;  %v782_v40 = vstv %s2359_s26  ;;  %s2425_s22 = sld [smem:[#allocation8 + $0xd]] }
 0x198   : > { %v717_v49 = vld [vmem:[#allocation2 + $0x53] sm:$0xff]  ;;  %v713_v50 = vadd.f32 %v711_v45, %v705_v44  ;;  %v712_v53 = vmul.f32 %v710_v32, %v709_v41  ;;  %s2440_s26 = sld [smem:[#allocation8 + $0x22]] }
 0x199   : > { %v706_v52 = vadd.f32 %v704_v46, %v698_v43  ;;  %v435_v54 = vpop.permute.xlu1 %434  ;;  %v732_v56 = vld [vmem:[#allocation2 + $0x4d] sm:$0xff]  ;;  %v2344_v58 = vpop.permute.xlu0 %440  ;;  %v720_v62 = vmul.f32 %v718_v2, %v717_v49  ;;  %v2349_v63 = vld [vmem:[#allocation2 + $0xb8] sm:$0x3f] }
 0x19a   : > { %v725_v57 = vld [vmem:[#allocation2 + $0x54] sm:$0xff]  ;;  %439 = vst [vmem:[#allocation2 + $0x70] sm:$0x3f] %v435_v54  ;;  %473 = vrot.lane.b32.xlu1 %v2277_v14, %s1982_s6  ;;  %v721_v59 = vadd.f32 %v719_v51, %v713_v50  ;;  %447 = vst [vmem:[#allocation2 + $0x78] sm:$0xff] %v2344_v58  ;;  %467 = vrot.lane.b32.xlu0 %v2349_v63, %s1983_s7  ;;  %v735_v5 = vmul.f32 %v734_v55, %v732_v56  ;;  %s2365_s7 = sld [smem:[#allocation8 + $0x27]]  ;;  %v798_v54 = vstv %s2373_s27 }
 0x19b   : > { %v714_v61 = vadd.f32 %v712_v53, %v706_v52  ;;  %v740_v1 = vld [vmem:[#allocation2 + $0x4e] sm:$0xff]  ;;  %v728_v7 = vmul.f32 %v726_v47, %v725_v57  ;;  %v741_v9 = vld [vmem:[#allocation2 + $0x56] sm:$0xff]  ;;  %s2450_s27 = sld [smem:[#allocation8 + $0x31]] }
 0x19c   : > { %v733_v3 = vld [vmem:[#allocation2 + $0x55] sm:$0xff]  ;;  %v729_v4 = vadd.f32 %v727_v60, %v721_v59  ;;  %v743_v15 = vmul.f32 %v742_v0, %v740_v1  ;;  %v744_v22 = vmul.f32 %v742_v0, %v741_v9 }
 0x19d   : > { %v722_v6 = vadd.f32 %v720_v62, %v714_v61  ;;  %v2356_v8 = vpop.permute.xlu1 %442  ;;  %v445_v12 = vpop.permute.xlu0 %444  ;;  %v736_v17 = vmul.f32 %v734_v55, %v733_v3  ;;  %v756_v19 = vld [vmem:[#allocation2 + $0x61] sm:$0xff] }
 0x19e   : > { %448 = vst [vmem:[#allocation2 + $0x80] sm:$0xff] %v2356_v8  ;;  %477 = vrot.lane.b32.xlu1 %v2349_v63, %s1982_s6  ;;  %v737_v13 = vadd.f32 %v735_v5, %v729_v4  ;;  %449 = vst [vmem:[#allocation2 + $0x88] sm:$0x3f] %v445_v12  ;;  %475 = vrot.lane.b32.xlu0 %v2325_v38, %s1982_s6  ;;  %v764_v26 = vld [vmem:[#allocation2 + $0x62] sm:$0xff]  ;;  %v759_v32 = vmul.f32 %v758_v18, %v756_v19  ;;  %s2383_s6 = sld [smem:[#allocation8 + $0x5]] }
 0x19f   : > { %v730_v16 = vadd.f32 %v728_v7, %v722_v6  ;;  %v772_v34 = vld [vmem:[#allocation2 + $0x63] sm:$0xff]  ;;  %v767_v39 = vmul.f32 %v766_v25, %v764_v26  ;;  %v814_v6 = vstv %s2388_s4  ;;  %s1687_s4 = sld [smem:[#allocation8 + $0x3f]] }
 0x1a0   : > { %v745_v20 = vadd.f32 %v743_v15, %v737_v13  ;;  %v780_v41 = vld [vmem:[#allocation2 + $0x64] sm:$0xff]  ;;  %v775_v44 = vmul.f32 %v774_v33, %v772_v34  ;;  %v790_v47 = vstv %s2365_s7  ;;  %v822_v15 = vstv %s2393_s5  ;;  %s2443_s7 = sld [smem:[#allocation8 + $0x29]] }
 0x1a1   : > { %v738_v21 = vadd.f32 %v736_v17, %v730_v16  ;;  %v2370_v24 = vpop.permute.xlu1 %450  ;;  %v757_v27 = vld [vmem:[#allocation2 + $0x69] sm:$0xff]  ;;  %v2376_v28 = vpop.permute.xlu0 %452  ;;  %v783_v51 = vmul.f32 %v782_v40, %v780_v41  ;;  %s1688_s5 = sld [smem:[#allocation8 + $0x46]] }
 0x1a2   : > { %457 = vst [vmem:[#allocation2 + $0x90] sm:$0xff] %v2370_v24  ;;  %485 = vrot.lane.b32.xlu1 %v2325_v38, %s1984_s11  ;;  %v753_v30 = vadd.f32 %v751_v23, %v745_v20  ;;  %458 = vst [vmem:[#allocation2 + $0x98] sm:$0xff] %v2376_v28  ;;  %v765_v35 = vld [vmem:[#allocation2 + $0x6a] sm:$0xff]  ;;  %483 = vrot.lane.b32.xlu0 %v2277_v14, %s1984_s11  ;;  %v760_v2 = vmul.f32 %v758_v18, %v757_v27 }
 0x1a3   : > { %v746_v29 = vadd.f32 %v744_v22, %v738_v21  ;;  %v773_v42 = vld [vmem:[#allocation2 + $0x6b] sm:$0xff]  ;;  %v768_v46 = vmul.f32 %v766_v25, %v765_v35  ;;  %v830_v22 = vstv %s2398_s29  ;;  %s2459_s29 = sld [smem:[#allocation8 + $0x4d]] }
 0x1a4   : > { %v761_v37 = vadd.f32 %v759_v32, %v753_v30  ;;  %v788_v48 = vld [vmem:[#allocation2 + $0x65] sm:$0xff]  ;;  %v776_v53 = vmul.f32 %v774_v33, %v773_v42  ;;  %v789_v56 = vld [vmem:[#allocation2 + $0x6d] sm:$0xff]  ;;  %v806_v0 = vstv %s2383_s6  ;;  %v854_v42 = vstv %s2414_s23  ;;  %s1686_s6 = sld [smem:[#allocation8 + $0x38]] }
 0x1a5   : > { %v754_v36 = vadd.f32 %v752_v31, %v746_v29  ;;  %v455_v11 = vpop.permute.xlu1 %454  ;;  %v781_v49 = vld [vmem:[#allocation2 + $0x6c] sm:$0xff]  ;;  %v791_v59 = vmul.f32 %v790_v47, %v788_v48  ;;  %v792_v5 = vmul.f32 %v790_v47, %v789_v56  ;;  %v812_v7 = vld [vmem:[#allocation2 + $0x79] sm:$0xff]  ;;  %v807_v13 = vmul.f32 %v806_v0, %v2344_v58  ;;  %v813_v17 = vld [vmem:[#allocation2 + $0x81] sm:$0xff]  ;;  %s2466_s23 = sld [smem:[#allocation8 + $0x32]] }
 0x1a6   : > { %459 = vst [vmem:[#allocation2 + $0xa0] sm:$0x3f] %v455_v11  ;;  %493 = vrot.lane.b32.xlu1 %v2277_v14, %s1985_s10  ;;  %v769_v43 = vadd.f32 %v767_v39, %v761_v37  ;;  %487 = vrot.lane.b32.xlu0 %v2349_v63, %s1984_s11  ;;  %v796_v55 = vld [vmem:[#allocation2 + $0x66] sm:$0xff]  ;;  %v784_v61 = vmul.f32 %v782_v40, %v781_v49  ;;  %v797_v62 = vld [vmem:[#allocation2 + $0x6e] sm:$0xff]  ;;  %s2403_s11 = sld [smem:[#allocation8 + $0x21]]  ;;  %v820_v16 = vld [vmem:[#allocation2 + $0x7a] sm:$0xff] }
 0x1a7   : > { %v762_v45 = vadd.f32 %v760_v2, %v754_v36  ;;  %v799_v3 = vmul.f32 %v798_v54, %v796_v55  ;;  %v800_v12 = vmul.f32 %v798_v54, %v797_v62  ;;  %v808_v20 = vmul.f32 %v806_v0, %v2356_v8  ;;  %v828_v23 = vld [vmem:[#allocation2 + $0x7b] sm:$0xff]  ;;  %v829_v32 = vld [vmem:[#allocation2 + $0x83] sm:$0xff] }
 0x1a8   : > { %v777_v50 = vadd.f32 %v775_v44, %v769_v43  ;;  %v815_v21 = vmul.f32 %v814_v6, %v812_v7  ;;  %v821_v25 = vld [vmem:[#allocation2 + $0x82] sm:$0xff]  ;;  %v823_v27 = vmul.f32 %v822_v15, %v820_v16  ;;  %v816_v29 = vmul.f32 %v814_v6, %v813_v17 }
 0x1a9   : > { %v770_v52 = vadd.f32 %v768_v46, %v762_v45  ;;  %v836_v31 = vld [vmem:[#allocation2 + $0x7c] sm:$0xff]  ;;  %v831_v33 = vmul.f32 %v830_v22, %v828_v23  ;;  %v824_v35 = vmul.f32 %v822_v15, %v821_v25  ;;  %v846_v36 = vstv %s2408_s18  ;;  %v837_v39 = vld [vmem:[#allocation2 + $0x84] sm:$0xff]  ;;  %v868_v55 = vld [vmem:[#allocation2 + $0x91] sm:$0xff]  ;;  %s2463_s18 = sld [smem:[#allocation8 + $0x5b]] }
 0x1aa   : > { %497 = vrot.lane.b32.xlu1 %v2349_v63, %s1985_s10  ;;  %v785_v57 = vadd.f32 %v783_v51, %v777_v50  ;;  %495 = vrot.lane.b32.xlu0 %v2325_v38, %s1985_s10  ;;  %s2420_s10 = sld [smem:[#allocation8 + $0x6]]  ;;  %v844_v37 = vld [vmem:[#allocation2 + $0x7d] sm:$0xff]  ;;  %v832_v41 = vmul.f32 %v830_v22, %v829_v32  ;;  %v845_v44 = vld [vmem:[#allocation2 + $0x85] sm:$0xff]  ;;  %v870_v54 = vstv %s2425_s22  ;;  %v876_v62 = vld [vmem:[#allocation2 + $0x92] sm:$0xff]  ;;  %v894_v15 = vstv %s2440_s26 }
 0x1ab   : > { %v778_v60 = vadd.f32 %v776_v53, %v770_v52  ;;  %v852_v43 = vld [vmem:[#allocation2 + $0x7e] sm:$0xff]  ;;  %v847_v46 = vmul.f32 %v846_v36, %v844_v37  ;;  %v853_v49 = vld [vmem:[#allocation2 + $0x86] sm:$0xff]  ;;  %v848_v53 = vmul.f32 %v846_v36, %v845_v44  ;;  %v884_v7 = vld [vmem:[#allocation2 + $0x93] sm:$0xff]  ;;  %s2471_s22 = sld [smem:[#allocation8 + $0x40]] }
 0x1ac   : > { %v793_v1 = vadd.f32 %v791_v59, %v785_v57  ;;  %v838_v30 = vstv %s2403_s11  ;;  %v855_v51 = vmul.f32 %v854_v42, %v852_v43  ;;  %v856_v59 = vmul.f32 %v854_v42, %v853_v49  ;;  %v892_v16 = vld [vmem:[#allocation2 + $0x94] sm:$0xff]  ;;  %s2461_s11 = sld [smem:[#allocation8 + $0x54]] }
 0x1ad   : > { %v786_v4 = vadd.f32 %v784_v61, %v778_v60  ;;  %v839_v11 = vmul.f32 %v838_v30, %v836_v31  ;;  %v840_v48 = vmul.f32 %v838_v30, %v837_v39  ;;  %v878_v61 = vstv %s2430_s25  ;;  %v869_v0 = vld [vmem:[#allocation2 + $0x99] sm:$0xff]  ;;  %s2475_s25 = sld [smem:[#allocation8 + $0x47]] }
 0x1ae   : > { %505 = vrot.lane.b32.xlu1 %v2325_v38, %s1986_s17  ;;  %v801_v9 = vadd.f32 %v799_v3, %v793_v1  ;;  %503 = vrot.lane.b32.xlu0 %v2277_v14, %s1986_s17  ;;  %v885_v17 = vld [vmem:[#allocation2 + $0x9b] sm:$0xff]  ;;  %v926_v49 = vstv %s1686_s6  ;;  %s2483_s26 = sld [smem:[#allocation8 + $0x55]] }
 0x1af   : > { %v794_v10 = vadd.f32 %v792_v5, %v786_v4  ;;  %v871_v5 = vmul.f32 %v870_v54, %v868_v55  ;;  %v900_v22 = vld [vmem:[#allocation2 + $0x95] sm:$0xff]  ;;  %v901_v31 = vld [vmem:[#allocation2 + $0x9d] sm:$0xff]  ;;  %v940_v55 = vld [vmem:[#allocation2 + $0xab] sm:$0xff]  ;;  %s2501_s6 = sld [smem:[#allocation8 + $0x41]] }
 0x1b0   : > { %v809_v19 = vadd.f32 %v807_v13, %v801_v9  ;;  %v877_v9 = vld [vmem:[#allocation2 + $0x9a] sm:$0xff]  ;;  %v872_v13 = vmul.f32 %v870_v54, %v869_v0  ;;  %v948_v0 = vld [vmem:[#allocation2 + $0xac] sm:$0xff] }
 0x1b1   : > { %v802_v18 = vadd.f32 %v800_v12, %v794_v10  ;;  %v893_v23 = vld [vmem:[#allocation2 + $0x9c] sm:$0xff] }
 0x1b2   : > { %513 = vrot.lane.b32.xlu1 %v2277_v14, %s1987_s20  ;;  %v817_v26 = vadd.f32 %v815_v21, %v809_v19  ;;  %507 = vrot.lane.b32.xlu0 %v2349_v63, %s1986_s17  ;;  %s2435_s17 = sld [smem:[#allocation8 + $0x1b]]  ;;  %v902_v21 = vstv %s2443_s7  ;;  %v908_v30 = vld [vmem:[#allocation2 + $0x96] sm:$0xff]  ;;  %v909_v36 = vld [vmem:[#allocation2 + $0x9e] sm:$0xff] }
 0x1b3   : > { %v810_v58 = vadd.f32 %v808_v20, %v802_v18  ;;  %s2486_s7 = sld [smem:[#allocation8 + $0x5c]] }
 0x1b4   : > { %v825_v8 = vadd.f32 %v823_v27, %v817_v26 }
 0x1b5   : > { %v818_v34 = vadd.f32 %v816_v29, %v810_v58  ;;  %v895_v58 = vmul.f32 %v894_v15, %v892_v16 }
 0x1b6   : > { %517 = vrot.lane.b32.xlu1 %v2349_v63, %s1987_s20  ;;  %v833_v2 = vadd.f32 %v831_v33, %v825_v8  ;;  %515 = vrot.lane.b32.xlu0 %v2325_v38, %s1987_s20  ;;  %v862_v63 = vstv %s2420_s10  ;;  %s2447_s20 = sld [smem:[#allocation8 + $0x30]]  ;;  %v903_v8 = vmul.f32 %v902_v21, %v900_v22 }
 0x1b7   : > { %v826_v40 = vadd.f32 %v824_v35, %v818_v34  ;;  %v863_v60 = vmul.f32 %v862_v63, %v2370_v24  ;;  %v864_v4 = vmul.f32 %v862_v63, %v2376_v28  ;;  %v879_v24 = vmul.f32 %v878_v61, %v876_v62  ;;  %v924_v63 = vld [vmem:[#allocation2 + $0xa9] sm:$0xff]  ;;  %s2469_s10 = sld [smem:[#allocation8 + $0x39]] }
 0x1b8   : > { %v841_v45 = vadd.f32 %v839_v11, %v833_v2  ;;  %v886_v6 = vstv %s2435_s17  ;;  %v880_v28 = vmul.f32 %v878_v61, %v877_v9  ;;  %v896_v34 = vmul.f32 %v894_v15, %v893_v23  ;;  %v956_v9 = vld [vmem:[#allocation2 + $0xad] sm:$0xff]  ;;  %s2477_s17 = sld [smem:[#allocation8 + $0x4e]] }
 0x1b9   : > { %v834_v47 = vadd.f32 %v832_v41, %v826_v40  ;;  %v887_v19 = vmul.f32 %v886_v6, %v884_v7  ;;  %v888_v27 = vmul.f32 %v886_v6, %v885_v17  ;;  %v918_v35 = vstv %s2450_s27  ;;  %s2495_s27 = sld [smem:[#allocation8 + $0x3a]] }
 0x1ba   : > { %v849_v50 = vadd.f32 %v847_v46, %v841_v45  ;;  %v904_v11 = vmul.f32 %v902_v21, %v901_v31  ;;  %v919_v40 = vmul.f32 %v918_v35, %v2277_v14  ;;  %v920_v44 = vmul.f32 %v918_v35, %v2325_v38  ;;  %v957_v21 = vld [vmem:[#allocation2 + $0xb5] sm:$0xff] }
 0x1bb   : > { %v842_v52 = vadd.f32 %v840_v48, %v834_v47  ;;  %v942_v38 = vstv %s1688_s5  ;;  %v950_v62 = vstv %s2459_s29  ;;  %v958_v7 = vstv %s2461_s11  ;;  %v965_v31 = vld [vmem:[#allocation2 + $0xb6] sm:$0xff]  ;;  %s2513_s5 = sld [smem:[#allocation8 + $0x4f]] }
 0x1bc   : > { %v857_v56 = vadd.f32 %v855_v51, %v849_v50  ;;  %v910_v29 = vstv %s2447_s20  ;;  %v927_v50 = vmul.f32 %v926_v49, %v924_v63  ;;  %v934_v51 = vstv %s1687_s4  ;;  %s2489_s20 = sld [smem:[#allocation8 + $0x33]] }
 0x1bd   : > { %v850_v57 = vadd.f32 %v848_v53, %v842_v52  ;;  %v911_v39 = vmul.f32 %v910_v29, %v908_v30  ;;  %v912_v43 = vmul.f32 %v910_v29, %v909_v36  ;;  %v932_v52 = vld [vmem:[#allocation2 + $0xaa] sm:$0xff]  ;;  %v959_v15 = vmul.f32 %v958_v7, %v956_v9  ;;  %s2507_s4 = sld [smem:[#allocation8 + $0x48]] }
 0x1be   : > { %v865_v3 = vadd.f32 %v863_v60, %v857_v56  ;;  %v925_v53 = vld [vmem:[#allocation2 + $0xb1] sm:$0xff]  ;;  %v935_v54 = vmul.f32 %v934_v51, %v932_v52  ;;  %v943_v60 = vmul.f32 %v942_v38, %v940_v55  ;;  %v966_v17 = vstv %s2463_s18  ;;  %s2516_s29 = sld [smem:[#allocation8 + $0x56]] }
 0x1bf   : > { %v858_v1 = vadd.f32 %v856_v59, %v850_v57  ;;  %v928_v56 = vmul.f32 %v926_v49, %v925_v53  ;;  %v933_v59 = vld [vmem:[#allocation2 + $0xb2] sm:$0xff]  ;;  %v960_v29 = vmul.f32 %v958_v7, %v957_v21  ;;  %v1014_v63 = vstv %s2483_s26  ;;  %s2520_s11 = sld [smem:[#allocation8 + $0x5d]] }
 0x1c0   : > { %v873_v12 = vadd.f32 %v871_v5, %v865_v3  ;;  %v951_v5 = vmul.f32 %v950_v62, %v948_v0  ;;  %s2526_s18 = sld [smem:[#allocation8 + $0x34]] }
 0x1c1   : > { %v866_v10 = vadd.f32 %v864_v4, %v858_v1  ;;  %v936_v1 = vmul.f32 %v934_v51, %v933_v59  ;;  %v941_v4 = vld [vmem:[#allocation2 + $0xb3] sm:$0xff]  ;;  %s2558_s26 = sld [smem:[#allocation8 + $0x5e]] }
 0x1c2   : > { %v881_v18 = vadd.f32 %v879_v24, %v873_v12  ;;  %v949_v24 = vld [vmem:[#allocation2 + $0xb4] sm:$0xff] }
 0x1c3   : > { %v874_v20 = vadd.f32 %v872_v13, %v866_v10  ;;  %v944_v10 = vmul.f32 %v942_v38, %v941_v4 }
 0x1c4   : > { %v889_v25 = vadd.f32 %v887_v19, %v881_v18  ;;  %v964_v18 = vld [vmem:[#allocation2 + $0xae] sm:$0xff]  ;;  %v974_v19 = vstv %s2466_s23  ;;  %s2532_s23 = sld [smem:[#allocation8 + $0x3b]] }
 0x1c5   : > { %v882_v26 = vadd.f32 %v880_v28, %v874_v20  ;;  %v952_v20 = vmul.f32 %v950_v62, %v949_v24  ;;  %v967_v23 = vmul.f32 %v966_v17, %v964_v18  ;;  %v1038_v24 = vstv %s2495_s27  ;;  %s2568_s27 = sld [smem:[#allocation8 + $0x43]] }
 0x1c6   : > { %v897_v32 = vadd.f32 %v895_v58, %v889_v25 }
 0x1c7   : > { %v890_v33 = vadd.f32 %v888_v27, %v882_v26  ;;  %v982_v26 = vstv %s2469_s10  ;;  %s2539_s10 = sld [smem:[#allocation8 + $0x42]] }
 0x1c8   : > { %v905_v37 = vadd.f32 %v903_v8, %v897_v32  ;;  %v990_v32 = vstv %s2471_s22  ;;  %s2545_s22 = sld [smem:[#allocation8 + $0x49]] }
 0x1c9   : > { %v898_v2 = vadd.f32 %v896_v34, %v890_v33 }
 0x1ca   : > { %v913_v41 = vadd.f32 %v911_v39, %v905_v37  ;;  %v998_v39 = vstv %s2475_s25  ;;  %s2548_s25 = sld [smem:[#allocation8 + $0x50]] }
 0x1cb   : > { %v906_v42 = vadd.f32 %v904_v11, %v898_v2 }
 0x1cc   : > { %v921_v45 = vadd.f32 %v919_v40, %v913_v41  ;;  %v968_v40 = vmul.f32 %v966_v17, %v965_v31 }
 0x1cd   : > { %v914_v46 = vadd.f32 %v912_v43, %v906_v42 }
 0x1ce   : > { %v929_v14 = vadd.f32 %v927_v50, %v921_v45 }
 0x1cf   : > { %v922_v47 = vadd.f32 %v920_v44, %v914_v46  ;;  %v1006_v44 = vstv %s2477_s17  ;;  %s2551_s17 = sld [smem:[#allocation8 + $0x57]] }
 0x1d0   : > { %v937_v57 = vadd.f32 %v935_v54, %v929_v14 }
 0x1d1   : > { %v930_v61 = vadd.f32 %v928_v56, %v922_v47  ;;  %v1022_v56 = vstv %s2486_s7  ;;  %s2561_s7 = sld [smem:[#allocation8 + $0x35]] }
 0x1d2   : > { %v945_v3 = vadd.f32 %v943_v60, %v937_v57 }
 0x1d3   : > { %v938_v6 = vadd.f32 %v936_v1, %v930_v61 }
 0x1d4   : > { %v953_v12 = vadd.f32 %v951_v5, %v945_v3  ;;  %v1030_v3 = vstv %s2489_s20  ;;  %s2564_s20 = sld [smem:[#allocation8 + $0x3c]] }
 0x1d5   : > { %v946_v16 = vadd.f32 %v944_v10, %v938_v6 }
 0x1d6   : > { %v961_v28 = vadd.f32 %v959_v15, %v953_v12 }
 0x1d7   : > { %v954_v58 = vadd.f32 %v952_v20, %v946_v16 }
 0x1d8   : > { %v969_v30 = vadd.f32 %v967_v23, %v961_v28  ;;  %v1046_v28 = vstv %s2501_s6  ;;  %s2571_s6 = sld [smem:[#allocation8 + $0x4a]] }
 0x1d9   : > { %v962_v36 = vadd.f32 %v960_v29, %v954_v58  ;;  %v1054_v29 = vstv %s2507_s4  ;;  %s2574_s4 = sld [smem:[#allocation8 + $0x51]] }
 0x1db   : > { %v970_v47 = vadd.f32 %v968_v40, %v962_v36 }
 0x1f0   : > { %v464_v48 = vpop.permute.xlu0 %463 }
 0x1f1   : > { %470 = vst [vmem:[#allocation2 + $0xc0] sm:$0xff] %v464_v48  ;;  %v975_v25 = vmul.f32 %v974_v19, %v464_v48 }
 0x1f3   : > { %v977_v35 = vadd.f32 %v975_v25, %v969_v30 }
 0x208   : > { %v466_v13 = vpop.permute.xlu1 %465 }
 0x209   : > { %471 = vst [vmem:[#allocation2 + $0xc8] sm:$0xff] %v466_v13  ;;  %v976_v41 = vmul.f32 %v974_v19, %v466_v13 }
 0x20b   : > { %v978_v53 = vadd.f32 %v976_v41, %v970_v47 }
 0x20c   : > { %v2479_v22 = vpop.permute.xlu1 %473  ;;  %v468_v27 = vpop.permute.xlu0 %467 }
 0x20d   : > { %480 = vst [vmem:[#allocation2 + $0xd8] sm:$0xff] %v2479_v22  ;;  %472 = vst [vmem:[#allocation2 + $0xd0] sm:$0x3f] %v468_v27  ;;  %v1031_v17 = vmul.f32 %v1030_v3, %v2479_v22 }
 0x210   : > { %v980_v8 = vld [vmem:[#allocation2 + $0xc1] sm:$0xff]  ;;  %v478_v34 = vpop.permute.xlu1 %477  ;;  %v2491_v11 = vpop.permute.xlu0 %475 }
 0x211   : > { %v988_v33 = vld [vmem:[#allocation2 + $0xc2] sm:$0xff]  ;;  %v983_v37 = vmul.f32 %v982_v26, %v980_v8  ;;  %482 = vst [vmem:[#allocation2 + $0xe8] sm:$0x3f] %v478_v34  ;;  %481 = vst [vmem:[#allocation2 + $0xe0] sm:$0xff] %v2491_v11  ;;  %v1062_v34 = vstv %s2513_s5  ;;  %s2577_s5 = sld [smem:[#allocation8 + $0x58]] }
 0x212   : > { %v996_v2 = vld [vmem:[#allocation2 + $0xc3] sm:$0xff]  ;;  %v991_v43 = vmul.f32 %v990_v32, %v988_v33 }
 0x213   : > { %v985_v42 = vadd.f32 %v983_v37, %v977_v35  ;;  %v1004_v45 = vld [vmem:[#allocation2 + $0xc4] sm:$0xff]  ;;  %v999_v49 = vmul.f32 %v998_v39, %v996_v2  ;;  %v1032_v2 = vmul.f32 %v1030_v3, %v2491_v11 }
 0x214   : > { %v2497_v46 = vpop.permute.xlu1 %485  ;;  %v1012_v50 = vld [vmem:[#allocation2 + $0xc5] sm:$0xff]  ;;  %v2503_v14 = vpop.permute.xlu0 %483  ;;  %v1007_v38 = vmul.f32 %v1006_v44, %v1004_v45  ;;  %v1013_v12 = vld [vmem:[#allocation2 + $0xcd] sm:$0xff] }
 0x215   : > { %v993_v48 = vadd.f32 %v991_v43, %v985_v42  ;;  %491 = vst [vmem:[#allocation2 + $0xf8] sm:$0xff] %v2497_v46  ;;  %v981_v51 = vld [vmem:[#allocation2 + $0xc9] sm:$0xff]  ;;  %490 = vst [vmem:[#allocation2 + $0xf0] sm:$0xff] %v2503_v14  ;;  %v1015_v62 = vmul.f32 %v1014_v63, %v1012_v50  ;;  %v1070_v42 = vstv %s2516_s29  ;;  %v1078_v50 = vstv %s2520_s11  ;;  %s2581_s29 = sld [smem:[#allocation8 + $0x5f]] }
 0x216   : > { %v989_v52 = vld [vmem:[#allocation2 + $0xca] sm:$0xff]  ;;  %v984_v55 = vmul.f32 %v982_v26, %v981_v51  ;;  %v1016_v26 = vmul.f32 %v1014_v63, %v1013_v12  ;;  %s2584_s11 = sld [smem:[#allocation8 + $0x36]] }
 0x217   : > { %v1001_v54 = vadd.f32 %v999_v49, %v993_v48  ;;  %v1020_v57 = vld [vmem:[#allocation2 + $0xc6] sm:$0xff]  ;;  %v992_v1 = vmul.f32 %v990_v32, %v989_v52  ;;  %v1021_v20 = vld [vmem:[#allocation2 + $0xce] sm:$0xff] }
 0x218   : > { %v997_v59 = vld [vmem:[#allocation2 + $0xcb] sm:$0xff]  ;;  %v2509_v60 = vpop.permute.xlu1 %493  ;;  %v986_v0 = vadd.f32 %v984_v55, %v978_v53  ;;  %v488_v5 = vpop.permute.xlu0 %487  ;;  %v1023_v7 = vmul.f32 %v1022_v56, %v1020_v57  ;;  %v1036_v13 = vld [vmem:[#allocation2 + $0xd9] sm:$0xff]  ;;  %v1024_v32 = vmul.f32 %v1022_v56, %v1021_v20  ;;  %v1037_v35 = vld [vmem:[#allocation2 + $0xe1] sm:$0xff]  ;;  %v1086_v57 = vstv %s2526_s18  ;;  %s2587_s18 = sld [smem:[#allocation8 + $0x3d]] }
 0x219   : > { %v1009_v61 = vadd.f32 %v1007_v38, %v1001_v54  ;;  %500 = vst [vmem:[#allocation2 + $0x108] sm:$0xff] %v2509_v60  ;;  %v1005_v4 = vld [vmem:[#allocation2 + $0xcc] sm:$0xff]  ;;  %v1000_v10 = vmul.f32 %v998_v39, %v997_v59  ;;  %492 = vst [vmem:[#allocation2 + $0x100] sm:$0x3f] %v488_v5  ;;  %v1044_v21 = vld [vmem:[#allocation2 + $0xda] sm:$0xff]  ;;  %v1039_v27 = vmul.f32 %v1038_v24, %v1036_v13  ;;  %v1102_v13 = vstv %s2539_s10  ;;  %s2594_s10 = sld [smem:[#allocation8 + $0x4b]] }
 0x21a   : > { %v994_v9 = vadd.f32 %v992_v1, %v986_v0  ;;  %v1008_v19 = vmul.f32 %v1006_v44, %v1005_v4  ;;  %v1052_v30 = vld [vmem:[#allocation2 + $0xdb] sm:$0xff]  ;;  %v1047_v33 = vmul.f32 %v1046_v28, %v1044_v21  ;;  %v1040_v48 = vmul.f32 %v1038_v24, %v1037_v35  ;;  %v1053_v11 = vld [vmem:[#allocation2 + $0xe3] sm:$0xff] }
 0x21b   : > { %v1017_v6 = vadd.f32 %v1015_v62, %v1009_v61  ;;  %v1060_v36 = vld [vmem:[#allocation2 + $0xdc] sm:$0xff]  ;;  %v1055_v41 = vmul.f32 %v1054_v29, %v1052_v30  ;;  %v1061_v56 = vld [vmem:[#allocation2 + $0xe4] sm:$0xff]  ;;  %v1056_v62 = vmul.f32 %v1054_v29, %v1053_v11  ;;  %v1094_v4 = vstv %s2532_s23  ;;  %s2591_s23 = sld [smem:[#allocation8 + $0x44]] }
 0x21c   : > { %v498_v15 = vpop.permute.xlu1 %497  ;;  %v1002_v18 = vadd.f32 %v1000_v10, %v994_v9  ;;  %v2522_v23 = vpop.permute.xlu0 %495  ;;  %v1045_v43 = vld [vmem:[#allocation2 + $0xe2] sm:$0xff]  ;;  %v1063_v63 = vmul.f32 %v1062_v34, %v1060_v36  ;;  %v1092_v5 = vld [vmem:[#allocation2 + $0xf1] sm:$0xff]  ;;  %v1064_v9 = vmul.f32 %v1062_v34, %v1061_v56  ;;  %v1087_v12 = vmul.f32 %v1086_v57, %v2503_v14 }
 0x21d   : > { %v1025_v16 = vadd.f32 %v1023_v7, %v1017_v6  ;;  %502 = vst [vmem:[#allocation2 + $0x118] sm:$0x3f] %v498_v15  ;;  %501 = vst [vmem:[#allocation2 + $0x110] sm:$0xff] %v2522_v23  ;;  %v1068_v44 = vld [vmem:[#allocation2 + $0xdd] sm:$0xff]  ;;  %v1048_v54 = vmul.f32 %v1046_v28, %v1045_v43  ;;  %v1069_v3 = vld [vmem:[#allocation2 + $0xe5] sm:$0xff]  ;;  %v1110_v20 = vstv %s2545_s22  ;;  %s2597_s22 = sld [smem:[#allocation8 + $0x52]] }
 0x21e   : > { %v1010_v58 = vadd.f32 %v1008_v19, %v1002_v18  ;;  %v1076_v51 = vld [vmem:[#allocation2 + $0xde] sm:$0xff]  ;;  %v1071_v55 = vmul.f32 %v1070_v42, %v1068_v44  ;;  %v1077_v24 = vld [vmem:[#allocation2 + $0xe6] sm:$0xff]  ;;  %v1100_v15 = vld [vmem:[#allocation2 + $0xf2] sm:$0xff]  ;;  %v1095_v19 = vmul.f32 %v1094_v4, %v1092_v5 }
 0x21f   : > { %v1033_v25 = vadd.f32 %v1031_v17, %v1025_v16  ;;  %v1079_v1 = vmul.f32 %v1078_v50, %v1076_v51  ;;  %v1072_v17 = vmul.f32 %v1070_v42, %v1069_v3  ;;  %v1108_v28 = vld [vmem:[#allocation2 + $0xf3] sm:$0xff] }
 0x220   : > { %v2528_v22 = vpop.permute.xlu1 %505  ;;  %v1018_v31 = vadd.f32 %v1016_v26, %v1010_v58  ;;  %v2534_v37 = vpop.permute.xlu0 %503  ;;  %v1103_v58 = vmul.f32 %v1102_v13, %v1100_v15  ;;  %v1118_v26 = vstv %s2548_s25  ;;  %v1093_v29 = vld [vmem:[#allocation2 + $0xf9] sm:$0xff]  ;;  %s2600_s25 = sld [smem:[#allocation8 + $0x59]] }
 0x221   : > { %v1041_v8 = vadd.f32 %v1039_v27, %v1033_v25  ;;  %511 = vst [vmem:[#allocation2 + $0x128] sm:$0xff] %v2528_v22  ;;  %510 = vst [vmem:[#allocation2 + $0x120] sm:$0xff] %v2534_v37  ;;  %v1080_v25 = vmul.f32 %v1078_v50, %v1077_v24  ;;  %v1116_v27 = vld [vmem:[#allocation2 + $0xf4] sm:$0xff] }
 0x222   : > { %v1026_v39 = vadd.f32 %v1024_v32, %v1018_v31  ;;  %v1088_v31 = vmul.f32 %v1086_v57, %v2497_v46  ;;  %v1124_v34 = vld [vmem:[#allocation2 + $0xf5] sm:$0xff] }
 0x223   : > { %v1049_v40 = vadd.f32 %v1047_v33, %v1041_v8  ;;  %v1111_v8 = vmul.f32 %v1110_v20, %v1108_v28  ;;  %v1126_v33 = vstv %s2551_s17  ;;  %v1101_v35 = vld [vmem:[#allocation2 + $0xfa] sm:$0xff]  ;;  %v1182_v28 = vstv %s2577_s5  ;;  %s2604_s17 = sld [smem:[#allocation8 + $0x60]] }
 0x224   : > { %v2541_v45 = vpop.permute.xlu1 %513  ;;  %v1034_v47 = vadd.f32 %v1032_v2, %v1026_v39  ;;  %v508_v52 = vpop.permute.xlu0 %507  ;;  %v1119_v2 = vmul.f32 %v1118_v26, %v1116_v27  ;;  %v1132_v42 = vld [vmem:[#allocation2 + $0xf6] sm:$0xff]  ;;  %v1127_v46 = vmul.f32 %v1126_v33, %v1124_v34  ;;  %s2627_s5 = sld [smem:[#allocation8 + $0x61]] }
 0x225   : > { %v1057_v49 = vadd.f32 %v1055_v41, %v1049_v40  ;;  %520 = vst [vmem:[#allocation2 + $0x138] sm:$0xff] %v2541_v45  ;;  %512 = vst [vmem:[#allocation2 + $0x130] sm:$0x3f] %v508_v52  ;;  %v1096_v40 = vmul.f32 %v1094_v4, %v1093_v29  ;;  %v1134_v41 = vstv %s2558_s26  ;;  %v1109_v43 = vld [vmem:[#allocation2 + $0xfb] sm:$0xff]  ;;  %v1149_v15 = vld [vmem:[#allocation2 + $0x111] sm:$0xff]  ;;  %v1190_v29 = vstv %s2581_s29  ;;  %s2607_s26 = sld [smem:[#allocation8 + $0x37]] }
 0x226   : > { %v1042_v53 = vadd.f32 %v1040_v48, %v1034_v47  ;;  %v1104_v48 = vmul.f32 %v1102_v13, %v1101_v35  ;;  %v1135_v11 = vmul.f32 %v1134_v41, %v1132_v42  ;;  %v1112_v52 = vmul.f32 %v1110_v20, %v1109_v43  ;;  %v1173_v34 = vld [vmem:[#allocation2 + $0x114] sm:$0xff]  ;;  %s1989_s29 = smov 16  }
 0x227   : > { %v1065_v38 = vadd.f32 %v1063_v63, %v1057_v49  ;;  %v1142_v49 = vstv %s2561_s7  ;;  %v1117_v63 = vld [vmem:[#allocation2 + $0xfc] sm:$0xff]  ;;  %v1174_v13 = vstv %s2574_s4  ;;  %v1198_v35 = vstv %s2584_s11  ;;  %s2610_s7 = sld [smem:[#allocation8 + $0x3e]]  ;;  %s1990_s11 = smov 32  }
 0x228   : > { %v518_v59 = vpop.permute.xlu1 %517  ;;  %v1050_v61 = vadd.f32 %v1048_v54, %v1042_v53  ;;  %v2553_v6 = vpop.permute.xlu0 %515  ;;  %v1125_v53 = vld [vmem:[#allocation2 + $0xfd] sm:$0xff]  ;;  %v1150_v54 = vstv %s2564_s20  ;;  %v1143_v56 = vmul.f32 %v1142_v49, %v2509_v60  ;;  %v1206_v42 = vstv %s2587_s18  ;;  %s2614_s20 = sld [smem:[#allocation8 + $0x45]]  ;;  %s1991_s18 = smov 64  }
 0x229   : > { %v1073_v0 = vadd.f32 %v1071_v55, %v1065_v38  ;;  %522 = vst [vmem:[#allocation2 + $0x148] sm:$0x3f] %v518_v59  ;;  %521 = vst [vmem:[#allocation2 + $0x140] sm:$0xff] %v2553_v6  ;;  %v1148_v38 = vld [vmem:[#allocation2 + $0x109] sm:$0xff]  ;;  %v1120_v59 = vmul.f32 %v1118_v26, %v1117_v63  ;;  %v1128_v4 = vmul.f32 %v1126_v33, %v1125_v53  ;;  %v1204_v43 = vld [vmem:[#allocation2 + $0x121] sm:$0xff]  ;;  %v1214_v63 = vstv %s2591_s23  ;;  %s2623_s4 = sld [smem:[#allocation8 + $0x5a]] }
 0x22a   : > { %v1058_v7 = vadd.f32 %v1056_v62, %v1050_v61  ;;  %v1133_v61 = vld [vmem:[#allocation2 + $0xfe] sm:$0xff]  ;;  %v1158_v62 = vstv %s2568_s27  ;;  %v1151_v5 = vmul.f32 %v1150_v54, %v1148_v38  ;;  %v1207_v53 = vmul.f32 %v1206_v42, %v1204_v43  ;;  %s2617_s27 = sld [smem:[#allocation8 + $0x4c]]  ;;  %s1992_s23 = smov 48  }
 0x22b   : > { %v1081_v10 = vadd.f32 %v1079_v1, %v1073_v0  ;;  %v1156_v0 = vld [vmem:[#allocation2 + $0x10a] sm:$0xff]  ;;  %v1988_v43 = vmov 1966171168  }
 0x22c   : > { %v1066_v16 = vadd.f32 %v1064_v9, %v1058_v7  ;;  %v1166_v7 = vstv %s2571_s6  ;;  %v1164_v9 = vld [vmem:[#allocation2 + $0x10b] sm:$0xff]  ;;  %v1159_v24 = vmul.f32 %v1158_v62, %v1156_v0  ;;  %v1220_v38 = vld [vmem:[#allocation2 + $0x123] sm:$0xff]  ;;  %s2620_s6 = sld [smem:[#allocation8 + $0x53]] }
 0x22d   : > { %v1089_v18 = vadd.f32 %v1087_v12, %v1081_v10  ;;  %v1136_v12 = vmul.f32 %v1134_v41, %v1133_v61  ;;  %v1167_v20 = vmul.f32 %v1166_v7, %v1164_v9  ;;  %v1181_v41 = vld [vmem:[#allocation2 + $0x115] sm:$0xff]  ;;  %v1205_v61 = vld [vmem:[#allocation2 + $0x129] sm:$0xff]  ;;  %v1238_v9 = vstv %s2600_s25  ;;  %s1995_s25 = smov 112  }
 0x22e   : > { %v1074_v21 = vadd.f32 %v1072_v17, %v1066_v16  ;;  %v1172_v16 = vld [vmem:[#allocation2 + $0x10c] sm:$0xff] }
 0x22f   : > { %v1097_v14 = vadd.f32 %v1095_v19, %v1089_v18  ;;  %v1144_v18 = vmul.f32 %v1142_v49, %v2522_v23  ;;  %v1175_v27 = vmul.f32 %v1174_v13, %v1172_v16  ;;  %v1189_v49 = vld [vmem:[#allocation2 + $0x116] sm:$0xff]  ;;  %v1246_v16 = vstv %s2604_s17  ;;  %s1490_s17 = sld [smem:[#allocation9]] }
 0x230   : > { %v1082_v30 = vadd.f32 %v1080_v25, %v1074_v21  ;;  %v1157_v21 = vld [vmem:[#allocation2 + $0x112] sm:$0xff] }
 0x231   : > { %v1105_v32 = vadd.f32 %v1103_v58, %v1097_v14  ;;  %v1180_v25 = vld [vmem:[#allocation2 + $0x10d] sm:$0xff]  ;;  %v1152_v58 = vmul.f32 %v1150_v54, %v1149_v15  ;;  %v1160_v23 = vmul.f32 %v1158_v62, %v1157_v21  ;;  %v1222_v54 = vstv %s2594_s10  ;;  %s1993_s10 = smov 80  }
 0x232   : > { %v1090_v36 = vadd.f32 %v1088_v31, %v1082_v30  ;;  %v1165_v30 = vld [vmem:[#allocation2 + $0x113] sm:$0xff]  ;;  %v1183_v33 = vmul.f32 %v1182_v28, %v1180_v25  ;;  %v1230_v62 = vstv %s2597_s22  ;;  %v1244_v15 = vld [vmem:[#allocation2 + $0x126] sm:$0xff]  ;;  %s1994_s22 = smov 96  }
 0x233   : > { %v1113_v39 = vadd.f32 %v1111_v8, %v1105_v32  ;;  %v1188_v31 = vld [vmem:[#allocation2 + $0x10e] sm:$0xff] }
 0x234   : > { %v1098_v47 = vadd.f32 %v1096_v40, %v1090_v36  ;;  %v1191_v40 = vmul.f32 %v1190_v29, %v1188_v31 }
 0x235   : > { %v1121_v44 = vadd.f32 %v1119_v2, %v1113_v39  ;;  %v1168_v39 = vmul.f32 %v1166_v7, %v1165_v30  ;;  %v1236_v7 = vld [vmem:[#allocation2 + $0x125] sm:$0xff] }
 0x236   : > { %v1106_v51 = vadd.f32 %v1104_v48, %v1098_v47  ;;  %v1199_v48 = vmul.f32 %v1198_v35, %v2534_v37  ;;  %v1228_v37 = vld [vmem:[#allocation2 + $0x124] sm:$0xff] }
 0x237   : > { %v1129_v50 = vadd.f32 %v1127_v46, %v1121_v44  ;;  %v1176_v46 = vmul.f32 %v1174_v13, %v1173_v34  ;;  %v1221_v13 = vld [vmem:[#allocation2 + $0x12b] sm:$0xff] }
 0x238   : > { %v1114_v57 = vadd.f32 %v1112_v52, %v1106_v51  ;;  %v1184_v51 = vmul.f32 %v1182_v28, %v1181_v41  ;;  %v1254_v28 = vstv %s2607_s26  ;;  %v1224_v21 = vmul.f32 %v1222_v54, %v1221_v13  ;;  %v1245_v34 = vld [vmem:[#allocation2 + $0x12e] sm:$0xff]  ;;  %s1734_s26 = sld [smem:[#allocation9 + $0x1]] }
 0x239   : > { %v1137_v55 = vadd.f32 %v1135_v11, %v1129_v50  ;;  %v1212_v50 = vld [vmem:[#allocation2 + $0x122] sm:$0xff]  ;;  %v1255_v31 = vmul.f32 %v1254_v28, %v2541_v45  ;;  %v1278_v41 = vstv %s2617_s27 }
 0x23a   : > { %v1122_v3 = vadd.f32 %v1120_v59, %v1114_v57  ;;  %v1215_v59 = vmul.f32 %v1214_v63, %v1212_v50  ;;  %v1261_v50 = vld [vmem:[#allocation2 + $0x141] sm:$0xff] }
 0x23b   : > { %v1145_v1 = vadd.f32 %v1143_v56, %v1137_v55  ;;  %v1192_v56 = vmul.f32 %v1190_v29, %v1189_v49  ;;  %v1237_v29 = vld [vmem:[#allocation2 + $0x12d] sm:$0xff]  ;;  %v1284_v49 = vld [vmem:[#allocation2 + $0x13c] sm:$0xff] }
 0x23c   : > { %v1130_v10 = vadd.f32 %v1128_v4, %v1122_v3  ;;  %v1223_v3 = vmul.f32 %v1222_v54, %v1220_v38  ;;  %v1292_v54 = vld [vmem:[#allocation2 + $0x13d] sm:$0xff]  ;;  %v1294_v38 = vstv %s2623_s4 }
 0x23d   : > { %v1153_v60 = vadd.f32 %v1151_v5, %v1145_v1  ;;  %v1200_v1 = vmul.f32 %v1198_v35, %v2528_v22  ;;  %v1213_v5 = vld [vmem:[#allocation2 + $0x12a] sm:$0xff] }
 0x23e   : > { %v1138_v17 = vadd.f32 %v1136_v12, %v1130_v10  ;;  %v1208_v12 = vmul.f32 %v1206_v42, %v1205_v61  ;;  %v1216_v22 = vmul.f32 %v1214_v63, %v1213_v5  ;;  %v1307_v42 = vlaneseq }
 0x23f   : > { %v1161_v19 = vadd.f32 %v1159_v24, %v1153_v60  ;;  %v1231_v24 = vmul.f32 %v1230_v62, %v1228_v37  ;;  %v1286_v63 = vstv %s2620_s6  ;;  %v1295_v5 = vmul.f32 %v1294_v38, %v1292_v54 }
 0x240   : > { %v1146_v14 = vadd.f32 %v1144_v18, %v1138_v17  ;;  %v1287_v37 = vmul.f32 %v1286_v63, %v1284_v49  ;;  %vm2639_vm4 = vcmp.lt.s32.totalorder %v1307_v42, 16  ;;  %vm1338_vm5 = vcmp.ge.s32.totalorder %v1307_v42, 16 }
 0x241   : > { %v1169_v26 = vadd.f32 %v1167_v20, %v1161_v19  ;;  %v1239_v19 = vmul.f32 %v1238_v9, %v1236_v7  ;;  %v1229_v20 = vld [vmem:[#allocation2 + $0x12c] sm:$0xff]  ;;  %vm1339_vm6 = vcmp.lt.s32.totalorder %v1307_v42, 32  ;;  %vm2650_vm8 = vcmp.ge.s32.totalorder %v1307_v42, 32 }
 0x242   : > { %v1154_v32 = vadd.f32 %v1152_v58, %v1146_v14  ;;  %v1247_v14 = vmul.f32 %v1246_v16, %v1244_v15  ;;  %v1293_v15 = vld [vmem:[#allocation2 + $0x145] sm:$0xff]  ;;  %vm1340_vm7 = vmand %vm1338_vm5, %vm1339_vm6  ;;  %vm2655_vm9 = vcmp.lt.s32.totalorder %v1307_v42, 48  ;;  %vm2664_vm11 = vcmp.ge.s32.totalorder %v1307_v42, 48 }
 0x243   : > { %v1177_v8 = vadd.f32 %v1175_v27, %v1169_v26  ;;  %v1260_v26 = vld [vmem:[#allocation2 + $0x139] sm:$0xff]  ;;  %v1262_v27 = vstv %s2610_s7  ;;  %vm1348_vm10 = vmand %vm2650_vm8, %vm2655_vm9  ;;  %vm2669_vm12 = vcmp.lt.s32.totalorder %v1307_v42, 64  ;;  %vm2674_vm13 = vcmp.ge.s32.totalorder %v1307_v42, 64  ;;  %s1742_s7 = sshll.u32 %s2038_s16, 7 }
 0x244   : > { %v1162_v36 = vadd.f32 %v1160_v23, %v1154_v32  ;;  %v1232_v23 = vmul.f32 %v1230_v62, %v1229_v20  ;;  %v1264_v62 = vmul.f32 %v1262_v27, %v1261_v50  ;;  %vm2679_vm14 = vcmp.lt.s32.totalorder %v1307_v42, 80  ;;  %vm1356_vm15 = vmand %vm2664_vm11, %vm2669_vm12 }
 0x245   : > { %v1185_v2 = vadd.f32 %v1183_v33, %v1177_v8  ;;  %v1268_v8 = vld [vmem:[#allocation2 + $0x13a] sm:$0xff]  ;;  %v1270_v33 = vstv %s2614_s20  ;;  %vm1378_vm0 = vmand %vm2674_vm13, %vm2679_vm14  ;;  %vm2692_vm1 = vcmp.ge.s32.totalorder %v1307_v42, 80  ;;  %vm2697_vm2 = vcmp.lt.s32.totalorder %v1307_v42, 96  ;;  %s213_s20 = scalar_lea.vmem [#allocation11], %s1633_s24 }
 0x246   : > { %v1170_v44 = vadd.f32 %v1168_v39, %v1162_v36  ;;  %v1263_v36 = vmul.f32 %v1262_v27, %v1260_v26  ;;  %v1271_v45 = vmul.f32 %v1270_v33, %v1268_v8  ;;  %vm1393_vm3 = vmand %vm2692_vm1, %vm2697_vm2  ;;  %vm2721_vm5 = vcmp.lt.s32.totalorder %v1307_v42, 112  ;;  %s1532_s27 = sshll.u32 %s213_s20, 4  ;;  %s1533_s27 = int_to_ptr.vmem [resolvable:$true] %s1532_s27 }
 0x247   : > { %v1193_v47 = vadd.f32 %v1191_v40, %v1185_v2  ;;  %v1240_v2 = vmul.f32 %v1238_v9, %v1237_v29  ;;  %v1276_v40 = vld [vmem:[#allocation2 + $0x13b] sm:$0xff]  ;;  %vm1408_vm8 = vcmp.lt.s32.totalorder %v1307_v42, 128 }
 0x248   : > { %v1178_v11 = vadd.f32 %v1176_v46, %v1170_v44  ;;  %v1314_v44 = vunpack.c.l.s4 %v1988_v43 }
 0x249   : > { %v1201_v52 = vadd.f32 %v1199_v48, %v1193_v47  ;;  %v1248_v48 = vmul.f32 %v1246_v16, %v1245_v34  ;;  %v1495_v16 = vstv %s1734_s26 }
 0x24a   : > { %v1186_v55 = vadd.f32 %v1184_v51, %v1178_v11  ;;  %v1279_v51 = vmul.f32 %v1278_v41, %v1276_v40 }
 0x24b   : > { %v1209_v57 = vadd.f32 %v1207_v53, %v1201_v52  ;;  %v1256_v53 = vmul.f32 %v1254_v28, %v2553_v6 }
 0x24c   : > { %v1194_v0 = vadd.f32 %v1192_v56, %v1186_v55  ;;  %v1315_v55 = vunpack.c.0.s8 %v1314_v44  ;;  %v2634_v56 = vshrl.u32 %v1307_v42, 7 }
 0x24d   : > { %v1217_v4 = vadd.f32 %v1215_v59, %v1209_v57  ;;  %v1269_v57 = vld [vmem:[#allocation2 + $0x142] sm:$0xff] }
 0x24e   : > { %v1202_v10 = vadd.f32 %v1200_v1, %v1194_v0  ;;  %v1300_v0 = vld [vmem:[#allocation2 + $0x13e] sm:$0xff]  ;;  %v1302_v1 = vstv %s2627_s5  ;;  %v1272_v9 = vmul.f32 %v1270_v33, %v1269_v57  ;;  %v1318_v6 = vsub.s32 %v1315_v55, %v2634_v56  ;;  %s1530_s5 = scalar_lea.hbm %s2800_s3, %s1742_s7 }
 0x24f   : > { %v1225_v60 = vadd.f32 %v1223_v3, %v1217_v4  ;;  %v1277_v3 = vld [vmem:[#allocation2 + $0x143] sm:$0xff] }
 0x250   : > { %v1210_v17 = vadd.f32 %v1208_v12, %v1202_v10  ;;  %v1285_v10 = vld [vmem:[#allocation2 + $0x144] sm:$0xff]  ;;  %v1280_v13 = vmul.f32 %v1278_v41, %v1277_v3 }
 0x251   : > { %v1233_v18 = vadd.f32 %v1231_v24, %v1225_v60  ;;  %v1303_v60 = vmul.f32 %v1302_v1, %v1300_v0 }
 0x252   : > { %v1218_v58 = vadd.f32 %v1216_v22, %v1210_v17 }
 0x253   : > { %v1241_v25 = vadd.f32 %v1239_v19, %v1233_v18  ;;  %v1288_v18 = vmul.f32 %v1286_v63, %v1285_v10  ;;  %v1301_v19 = vld [vmem:[#allocation2 + $0x146] sm:$0xff] }
 0x254   : > { %v1226_v32 = vadd.f32 %v1224_v21, %v1218_v58  ;;  %v1296_v21 = vmul.f32 %v1294_v38, %v1293_v15  ;;  %v1304_v58 = vmul.f32 %v1302_v1, %v1301_v19 }
 0x255   : > { %v1249_v30 = vadd.f32 %v1247_v14, %v1241_v25 }
 0x256   : > { %v1234_v39 = vadd.f32 %v1232_v23, %v1226_v32 }
 0x257   : > { %v1257_v35 = vadd.f32 %v1255_v31, %v1249_v30 }
 0x258   : > { %v1242_v47 = vadd.f32 %v1240_v2, %v1234_v39 }
 0x259   : > { %v1265_v46 = vadd.f32 %v1263_v36, %v1257_v35 }
 0x25a   : > { %v1250_v52 = vadd.f32 %v1248_v48, %v1242_v47 }
 0x25b   : > { %v1273_v11 = vadd.f32 %v1271_v45, %v1265_v46 }
 0x25c   : > { %v1258_v61 = vadd.f32 %v1256_v53, %v1250_v52 }
 0x25d   : > { %v1281_v59 = vadd.f32 %v1279_v51, %v1273_v11 }
 0x25e   : > { %v1266_v7 = vadd.f32 %v1264_v62, %v1258_v61 }
 0x25f   : > { %v1289_v4 = vadd.f32 %v1287_v37, %v1281_v59 }
 0x260   : > { %v1274_v24 = vadd.f32 %v1272_v9, %v1266_v7 }
 0x261   : > { %v1297_v12 = vadd.f32 %v1295_v5, %v1289_v4 }
 0x262   : > { %v1282_v22 = vadd.f32 %v1280_v13, %v1274_v24  ;;  %v1493_v13 = vstv %s1490_s17 }
 0x263   : > { %v1305_v17 = vadd.f32 %v1303_v60, %v1297_v12 }
 0x264   : > { %v1290_v28 = vadd.f32 %v1288_v18, %v1282_v22 }
 0x265   : > { %v1319_v20 = vrot.slane %v1305_v17, %v1318_v6  ;;  %1311 = vst.msk [vmem:[#allocation3] sm:$0x1] %vm2639_vm4, %v1305_v17  ;;  %v1358_v30 = vcombine.high %v1305_v17, %v1305_v17 }
 0x266   : > { %v1298_v14 = vadd.f32 %v1296_v21, %v1290_v28  ;;  %v1507_v28 = vsub.s32 0, %v2634_v56  ;;  %v1511_v21 = vsub.s32 1, %v2634_v56 }
 0x267   : > { %v1320_v25 = vcombine.high %v1319_v20, %v1319_v20  ;;  %v1327_v27 = vrot.slane %v1319_v20, %v1318_v6  ;;  %v1365_v8 = vrot.slane %v1358_v30, %v1318_v6 }
 0x268   : > { %v1306_v29 = vadd.f32 %v1304_v58, %v1298_v14 }
 0x269   : > { %v1334_v26 = vrot.slane %v1320_v25, %v1318_v6  ;;  %v1342_v32 = vcombine.high %v1327_v27, %v1327_v27  ;;  %v1372_v36 = vrot.slane %v1365_v8, %v1318_v6  ;;  %v1380_v41 = vcombine.high %v1365_v8, %v1365_v8 }
 0x26a   : > { %v1419_v31 = vrot.slane %v1306_v29, %v1318_v6  ;;  %1411 = vst.msk [vmem:[#allocation3 + $0x1] sm:$0x1] %vm2639_vm4, %v1306_v29  ;;  %v1449_v35 = vcombine.high %v1306_v29, %v1306_v29  ;;  %vm2716_vm4 = vcmp.ge.s32.totalorder %v1307_v42, 96 }
 0x26b   : > { %1335 = vrot.lane.b32.xlu0 %v1334_v26, %s1989_s29  ;;  %v1350_v40 = vcombine.high %v1334_v26, %v1334_v26  ;;  %v1387_v44 = vrot.slane %v1380_v41, %v1318_v6  ;;  %v1395_v47 = vcombine.high %v1372_v36, %v1372_v36  ;;  %vm1401_vm6 = vmand %vm2716_vm4, %vm2721_vm5  ;;  %v1503_v26 = vld [vmem:[%s2135_s30] sm:$0xff] }
 0x26c   : > { %v1420_v23 = vcombine.high %v1419_v31, %v1419_v31  ;;  %v1427_v34 = vrot.slane %v1419_v31, %v1318_v6  ;;  %v1456_v2 = vrot.slane %v1449_v35, %v1318_v6 }
 0x26d   : > { %v1403_v49 = vcombine.high %v1387_v44, %v1387_v44 }
 0x26e   : > { %v1434_v33 = vrot.slane %v1420_v23, %v1318_v6  ;;  %v1439_v39 = vcombine.high %v1427_v34, %v1427_v34  ;;  %v1463_v43 = vrot.slane %v1456_v2, %v1318_v6  ;;  %v1468_v45 = vcombine.high %v1456_v2, %v1456_v2 }
 0x26f   : > { %1343 = vrot.lane.b32.xlu0 %v1342_v32, %s1990_s11 }
 0x270   : > { %1435 = vrot.lane.b32.xlu1 %v1434_v33, %s1989_s29  ;;  %v1444_v46 = vcombine.high %v1434_v33, %v1434_v33  ;;  %v1475_v48 = vrot.slane %v1468_v45, %v1318_v6  ;;  %v1480_v63 = vcombine.high %v1463_v43, %v1463_v43  ;;  %s1518_s29 = scalar_lea.sflag [#allocation6], %s2129_s21 }
 0x272   : > { %v1485_v50 = vcombine.high %v1475_v48, %v1475_v48 }
 0x273   : > { %1373 = vrot.lane.b32.xlu0 %v1372_v36, %s1991_s18 }
 0x274   : > { %1440 = vrot.lane.b32.xlu1 %v1439_v39, %s1990_s11  ;;  %s1896_s11 = scalar_lea.vmem %s1533_s27, 128 }
 0x275   : > { %p1897_p2 = scmp.ne.s32.totalorder %s1533_s27, %s1896_s11 }
 0x277   : > { %1351 = vrot.lane.b32.xlu0 %v1350_v40, %s1992_s23  ;;  %p1898_p9 = pnand %p1897_p2, %p2842_p1 }
 0x278   : > { %1464 = vrot.lane.b32.xlu1 %v1463_v43, %s1991_s18  ;;  %s1996_s18 = smov [#allocation11]  }
 0x279   : > { %p1899_p4 = pneg %p1898_p9  ;;  %s1900_s30 = sshll.u32 %s1996_s18, 4  ;;  %s1901_s30 = int_to_ptr.vmem [resolvable:$false] %s1900_s30 }
 0x27a   : > { %s1902_s16 = scalar_lea.vmem %s1901_s30, 256  ;;  %p1903_p6 = scmp.lt.s32.totalorder %s1533_s27, %s1901_s30 }
 0x27b   : > { %1388 = vrot.lane.b32.xlu0 %v1387_v44, %s1993_s10  ;;  %p1904_p13 = scmp.lt.s32.totalorder %s1902_s16, %s1896_s11 }
 0x27c   : > { %1445 = vrot.lane.b32.xlu1 %v1444_v46, %s1992_s23 }
 0x27d   : > { %p1905_p3 = por %p1904_p13, %p1903_p6 }
 0x27f   : > { %1396 = vrot.lane.b32.xlu0 %v1395_v47, %s1994_s22  ;;  %p1906_p7 = pnand %p1905_p3, %p1899_p4 }
 0x280   : > { %1476 = vrot.lane.b32.xlu1 %v1475_v48, %s1993_s10 }
 0x283   : > { %1404 = vrot.lane.b32.xlu0 %v1403_v49, %s1995_s25 }
 0x284   : > { %1481 = vrot.lane.b32.xlu1 %v1480_v63, %s1994_s22 }
 0x288   : > { %1486 = vrot.lane.b32.xlu1 %v1485_v50, %s1995_s25 }
 0x2dd   : > { %v1336_v52 = vpop.permute.xlu0 %1335 }
 0x2de   : > { %1341 = vst.msk [vmem:[#allocation3] sm:$0x1] %vm1340_vm7, %v1336_v52 }
 0x2e1   : > { %v1344_v53 = vpop.permute.xlu0 %1343 }
 0x2e2   : > { %1349 = vst.msk [vmem:[#allocation3] sm:$0x1] %vm1348_vm10, %v1344_v53  ;;  %v1436_v54 = vpop.permute.xlu1 %1435 }
 0x2e3   : > { %1438 = vst.msk [vmem:[#allocation3 + $0x1] sm:$0x1] %vm1340_vm7, %v1436_v54  ;;  %vm2740_vm7 = vcmp.ge.s32.totalorder %v1307_v42, 112 }
 0x2e4   : > { %vm1409_vm9 = vmand %vm2740_vm7, %vm1408_vm8 }
 0x2e5   : > { %v1374_v57 = vpop.permute.xlu0 %1373 }
 0x2e6   : > { %v1441_v61 = vpop.permute.xlu1 %1440 }
 0x2e7   : > { %1443 = vst.msk [vmem:[#allocation3 + $0x1] sm:$0x1] %vm1348_vm10, %v1441_v61 }
 0x2e9   : > { %v1352_v1 = vpop.permute.xlu0 %1351 }
 0x2ea   : > { %1357 = vst.msk [vmem:[#allocation3] sm:$0x1] %vm1356_vm15, %v1352_v1  ;;  %v1465_v3 = vpop.permute.xlu1 %1464 }
 0x2eb   : > { %1379 = vst.msk [vmem:[#allocation3] sm:$0x1] %vm1378_vm0, %v1374_v57 }
 0x2ed   : > { %v1389_v7 = vpop.permute.xlu0 %1388 }
 0x2ee   : > { %1394 = vst.msk [vmem:[#allocation3] sm:$0x1] %vm1393_vm3, %v1389_v7  ;;  %v1446_v9 = vpop.permute.xlu1 %1445 }
 0x2ef   : > { %1448 = vst.msk [vmem:[#allocation3 + $0x1] sm:$0x1] %vm1356_vm15, %v1446_v9 }
 0x2f0   : > { %1467 = vst.msk [vmem:[#allocation3 + $0x1] sm:$0x1] %vm1378_vm0, %v1465_v3 }
 0x2f1   : > { %v1397_v10 = vpop.permute.xlu0 %1396 }
 0x2f2   : > { %1402 = vst.msk [vmem:[#allocation3] sm:$0x1] %vm1401_vm6, %v1397_v10  ;;  %v1477_v12 = vpop.permute.xlu1 %1476 }
 0x2f3   : > { %1479 = vst.msk [vmem:[#allocation3 + $0x1] sm:$0x1] %vm1393_vm3, %v1477_v12 }
 0x2f5   : > { %v1405_v60 = vpop.permute.xlu0 %1404 }
 0x2f6   : > { %1410 = vst.msk [vmem:[#allocation3] sm:$0x1] %vm1409_vm9, %v1405_v60  ;;  %v1482_v42 = vpop.permute.xlu1 %1481 }
 0x2f7   : > { %1484 = vst.msk [vmem:[#allocation3 + $0x1] sm:$0x1] %vm1401_vm6, %v1482_v42 }
 0x2fa   : > { %v1487_v24 = vpop.permute.xlu1 %1486 }
 0x2fb   : > { %1489 = vst.msk [vmem:[#allocation3 + $0x1] sm:$0x1] %vm1409_vm9, %v1487_v24 }
 0x302   : > { %v1492_v15 = vld [vmem:[#allocation3] sm:$0x3] }
 0x303   : > { %v1494_v17 = vmul.f32 %v1493_v13, %v1492_v15 }
 0x305   : > { %v1496_v22 = vadd.f32 %v1495_v16, %v1494_v17 }
 0x307   : > { %v1735_v18 = vmul.f32 -1.442695, %v1496_v22 }
 0x309   : > { %1834 = vpow2.f32 %v1735_v18 }
 0x316   : > { %v1835_v19 = vpop.eup %1834 }
 0x317   : > { %v1500_v20 = vadd.f32 1.0, %v1835_v19 }
 0x319   : > { %1836 = vrcp.f32 %v1500_v20 }
 0x326   : > { %v1837_v25 = vpop.eup %1836 }
 0x327   : > { %v1508_v14 = vrot.slane %v1837_v25, %v1507_v28  ;;  %v1512_v58 = vrot.slane %v1837_v25, %v1511_v21 }
 0x329   : > { %v1513_v27 = vcombine.low %v1508_v14, %v1512_v58 }
 0x32b   : > { %v1515_v29 = vmul.f32 %v1513_v27, %v1503_v26 }
 0x32d   : > { %1516 = vst [vmem:[%s213_s20] sm:$0xff] %v1515_v29 }
 0x32e   : > { %1909 = shalt.err (!%p1906_p7)
}
 0x32f   : > { %s1910_s24 = scalar_lea.hbm %s1530_s5, 128  ;;  %s1914_s10 = scalar_lea.hbm %s2800_s3, 256 }
 0x330   : > { %p1911_p10 = scmp.ne.s32.totalorder %s1530_s5, %s1910_s24  ;;  %p1915_p5 = scmp.lt.s32.totalorder %s1530_s5, %s2800_s3 }
 0x331   : > { %p1916_p12 = scmp.lt.s32.totalorder %s1914_s10, %s1910_s24 }
 0x332   : > { %p1912_p8 = pnand %p1911_p10, %p2842_p1 }
 0x333   : > { %p1917_p0 = por %p1916_p12, %p1915_p5 }
 0x334   : > { %p1913_p11 = pneg %p1912_p8 }
 0x336   : > { %p1918_p2 = pnand %p1917_p0, %p1913_p11 }
 0x338   : > { %1921 = shalt.err (!%p1918_p2)
}
 0x339   : > { %1753 = dma.vmem_to_hbm [thread:$0]  (%p2842_p1), %s1533_s27, 128, %s1530_s5, %s1518_s29  }
 0x33a PF: > { %s1544_s17 = sand.u32 1, %s1956_s12   ;;  %p2843_p9 = scmp.ne.s32.totalorder %s2806_s19, 0 }
 0x33b   : > { %p2844_p4 = scmp.ge.s32.totalorder %s1968_s15, 2  ;;  %s1545_s26 = scalar_lea.sflag [#allocation6], %s1544_s17 }
 0x33d   : > { %p1767_p6 = pnand %p2844_p4, %p2843_p9 }
 0x33f   : > { %p1768_p13 = pneg %p1767_p6 }
 0x341   : > { %1951 = dma.done.wait (%p1768_p13), %s1545_s26, 128  }
 0x342   : > { %1953 = vsyncadd (%p1768_p13), %s1545_s26, 4294967168  ;;  %p18_p3 = scmp.ge.s32.totalorder %s2077_s28, 4   ;;  %s2845_s12 = smov %s1960_s13 }
 0x343   : > { %s2846_s13 = smov %s1964_s14  ;;  %s2847_s14 = smov %s2092_s8 }
 0x344   : > { %s2848_s15 = smov %s2077_s28  ;;  %20 = sbr.rel (!%p18_p3) target bundleno = 7 (0x7), region = 99 }
 0x349   :  { %1550 = vsyncpa [#allocation5], 1 }
 0x34a   :  { %1552 = vsyncpa [#allocation5 + $0x1], 1 }
 0x34b   :  { %1553 = vsyncpa [#allocation6], 1 }
 0x34c   :  { %1555 = vsyncpa [#allocation6 + $0x1], 1 }
 0x34d   :  { %1556 = vsyncpa [#allocation7], 1 }
 0x34e   :  { %1558 = vsyncpa [#allocation7 + $0x1], 1 }
 0x34f   :  { %1559 = vsyncpa [#allocation10], 1 }

</bundles_post_ra>
